<compile_context>
chip_gen: v7x
topology: tpu7x:2x2x1
jax: 0.10.0
libtpu: 0.0.40
codegen_flags: <defaults>
</compile_context>

<pallas_src>
import functools

import jax
import jax.numpy as jnp
from jax import lax
from jax.experimental import pallas as pl
from jax.experimental.pallas import tpu as pltpu

EPS = 1e-5
LANE = 128
_VMEM_LIMIT = 48 * 1024 * 1024  # <= v7x 64 MiB/TC; conservative on v5e/v6e 128 MiB


def _round_up(x, m):
    return (x + m - 1) // m * m


def _pad_to(a, shape):
    return jnp.pad(a, [(0, t - s) for s, t in zip(a.shape, shape)])


# --------------------------- in-kernel helpers ---------------------------

def _write_stats(st_ref, y, n_valid):
    """Per-tile BN partials: (sum, mean-centered sum-of-squares)."""
    mu = jnp.sum(y, axis=0, keepdims=True) / n_valid
    yc = y - mu
    st_ref[0, 0:1, :] = jnp.sum(y, axis=0, keepdims=True)
    st_ref[0, 1:2, :] = jnp.sum(yc * yc, axis=0, keepdims=True)


def _row_stats(st_ref, y, *, rows, tile):
    """Row-tiled stats; mask padded rows only on the (ragged) last tile."""
    rem = rows % tile
    if rem == 0:
        _write_stats(st_ref, y, float(tile))
    else:
        is_last = pl.program_id(0) == pl.num_programs(0) - 1

        @pl.when(jnp.logical_not(is_last))
        def _():
            _write_stats(st_ref, y, float(tile))

        @pl.when(is_last)
        def _():
            r = lax.broadcasted_iota(jnp.int32, (tile, 1), 0)
            m = r < rem
            ym = jnp.where(m, y, 0.0)
            mu = jnp.sum(ym, axis=0, keepdims=True) / float(rem)
            yc = jnp.where(m, y - mu, 0.0)
            st_ref[0, 0:1, :] = jnp.sum(ym, axis=0, keepdims=True)
            st_ref[0, 1:2, :] = jnp.sum(yc * yc, axis=0, keepdims=True)


# --------------------------- kernels ---------------------------

def _k_conv1_stats(x_ref, w_ref, y_ref, st_ref, *, rows, tile, cdtype):
    """conv1 (1x1 as matmul); emit y1 tile + bn1 partial stats."""
    y = jnp.dot(x_ref[...].astype(cdtype), w_ref[...],
                preferred_element_type=jnp.float32)
    y_ref[...] = y.astype(y_ref.dtype)
    _row_stats(st_ref, y, rows=rows, tile=tile)


def _k_conv2_stats(y1_ref, w2_ref, s_ref, b_ref, y2_ref, st_ref,
                   pad_ref, cat_ref, acc_ref, *, H, W, C, cdtype):
    """bn1+relu, then 3x3 conv as 3 dy-fused matmuls over one image; bn2 stats."""
    # bn1 + relu (all VPU math in f32).
    a = jnp.maximum(y1_ref[0].astype(jnp.float32) * s_ref[...] + b_ref[...], 0.0)

    # Zero only the 1-pixel halo border each step (interior fully overwritten).
    zrow = jnp.zeros((1, W + 2, C), pad_ref.dtype)
    zcol = jnp.zeros((H + 2, 1, C), pad_ref.dtype)
    pad_ref[0:1, :, :] = zrow
    pad_ref[H + 1:H + 2, :, :] = zrow
    pad_ref[:, 0:1, :] = zcol
    pad_ref[:, W + 1:W + 2, :] = zcol
    # TODO(synk): interior store starts at sublane offset 1; could be made fully
    #             aligned with an XLU-roll based circular W-halo layout.
    pad_ref[1:H + 1, 1:W + 1, :] = a

    # dy-fused strip: cat[h, w, dy*C + ci] = pad[h+dy, w, ci]
    # (only leading-axis shifts -> contiguous reads, lane-block-aligned writes).
    for dy in range(3):
        cat_ref[:, :, dy * C:(dy + 1) * C] = pad_ref[dy:dy + H, :, :]

    # Three matmuls with K = 3*C; accumulator touched 3x (write + 2 RMW).
    def tap(dx):
        win = cat_ref[:, dx:dx + W, :].reshape(H * W, 3 * C).astype(cdtype)
        return jnp.dot(win, w2_ref[dx], preferred_element_type=jnp.float32)

    acc_ref[...] = tap(0)
    acc_ref[...] += tap(1)
    acc_ref[...] += tap(2)

    y2 = acc_ref[...]
    y2_ref[...] = y2.reshape(1, H, W, C).astype(y2_ref.dtype)
    _write_stats(st_ref, y2, float(H * W))


def _k_conv3_stats(y2_ref, s_ref, b_ref, w_ref, y3_ref, st_ref, *, rows, tile, cdtype):
    """bn2+relu then conv3 (1x1 as matmul); emit bn3 partial stats."""
    a = jnp.maximum(y2_ref[...].astype(jnp.float32) * s_ref[...] + b_ref[...], 0.0)
    y = jnp.dot(a.astype(cdtype), w_ref[...], preferred_element_type=jnp.float32)
    y3_ref[...] = y.astype(y3_ref.dtype)
    _row_stats(st_ref, y, rows=rows, tile=tile)


def _k_bn_add_relu(y3_ref, s_ref, b_ref, res_ref, o_ref):
    """bn3 affine + residual add + relu."""
    y = y3_ref[...].astype(jnp.float32) * s_ref[...] + b_ref[...]
    o_ref[...] = jnp.maximum(y + res_ref[...], 0.0).astype(o_ref.dtype)


# --------------------------- glue ---------------------------

def _affine_from_stats(stats, counts, total, gamma_p, beta_p):
    """Chan-style combine of per-tile (sum, centered-SS) into BN scale/bias."""
    sums = stats[:, 0, :]                       # (T, C)
    ssc = stats[:, 1, :]                        # (T, C)  centered per tile
    counts = counts.astype(jnp.float32)[:, None]
    mean = jnp.sum(sums, axis=0) / total
    mu_t = sums / counts
    var = (jnp.sum(ssc, axis=0)
           + jnp.sum(counts * jnp.square(mu_t - mean), axis=0)) / total
    var = jnp.maximum(var, 0.0)                 # biased, training-mode variance
    scale = gamma_p * lax.rsqrt(var + EPS)
    bias = beta_p - mean * scale
    return (scale.reshape(1, -1).astype(jnp.float32),
            bias.reshape(1, -1).astype(jnp.float32))


def bottleneck_forward(x_nchw, params, *, tile_r=1024, compute_dtype=jnp.bfloat16):
    """x_nchw: (N, Cin, H, W) float32 -> (N, 4*out_channel, H, W) float32."""
    N, Cin, H, W = x_nchw.shape
    w1, g1, b1, w2, g2, b2, w3, g3, b3 = params
    Cw = w1.shape[0]
    C4 = w3.shape[0]
    assert Cin == C4, "downsample=None requires in_channel == 4*out_channel"
    assert w2.shape == (Cw, Cw, 3, 3), "groups != 1 / stride != 1 not supported"

    R = N * H * W
    Cwp = _round_up(Cw, LANE)
    C4p = _round_up(C4, LANE)
    cd = compute_dtype

    if tile_r >= R:
        tile = R
    else:
        tile = max(8, (int(tile_r) // 8) * 8)
    n_tiles = (R + tile - 1) // tile

    # ---- layout / parameter prep (channel dims padded to lane multiples) ----
    # TODO(synk): keep activations NHWC end-to-end in the surrounding model to
    #             avoid the two wrapper-side NCHW<->NHWC transpose passes.
    x2d = jnp.transpose(x_nchw, (0, 2, 3, 1)).reshape(R, Cin).astype(jnp.float32)
    x2dp = _pad_to(x2d, (R, C4p))                                    # S1 input + residual (f32)
    w1m = _pad_to(jnp.transpose(w1[:, :, 0, 0], (1, 0)), (C4p, Cwp)).astype(cd)
    # conv2 weights pre-fused over dy: index [dx, dy*Cwp + ci, co].
    w2cat = _pad_to(jnp.transpose(w2, (3, 2, 1, 0)), (3, 3, Cwp, Cwp))
    w2cat = w2cat.reshape(3, 3 * Cwp, Cwp).astype(cd)
    w3m = _pad_to(jnp.transpose(w3[:, :, 0, 0], (1, 0)), (Cwp, C4p)).astype(cd)
    g1p, b1p = _pad_to(g1, (Cwp,)), _pad_to(b1, (Cwp,))
    g2p, b2p = _pad_to(g2, (Cwp,)), _pad_to(b2, (Cwp,))
    g3p, b3p = _pad_to(g3, (C4p,)), _pad_to(b3, (C4p,))

    row_spec = lambda C: pl.BlockSpec((tile, C), lambda i: (i, 0))
    st_spec = lambda C: pl.BlockSpec((1, 2, C), lambda i: (i, 0, 0))
    vec_spec = lambda C: pl.BlockSpec((1, C), lambda i: (0, 0))
    cparams = pltpu.CompilerParams(dimension_semantics=("parallel",),
                                   vmem_limit_bytes=_VMEM_LIMIT)

    counts_rows = jnp.full((n_tiles,), float(tile), jnp.float32).at[-1].set(
        float(R - (n_tiles - 1) * tile))
    counts_img = jnp.full((N,), float(H * W), jnp.float32)

    # ---- S1: conv1 + bn1 partial stats ----
    y1, st1 = pl.pallas_call(
        functools.partial(_k_conv1_stats, rows=R, tile=tile, cdtype=cd),
        grid=(n_tiles,),
        in_specs=[row_spec(C4p),
                  pl.BlockSpec((C4p, Cwp), lambda i: (0, 0))],
        out_specs=[row_spec(Cwp), st_spec(Cwp)],
        out_shape=[jax.ShapeDtypeStruct((R, Cwp), cd),
                   jax.ShapeDtypeStruct((n_tiles, 2, Cwp), jnp.float32)],
        compiler_params=cparams,
    )(x2dp, w1m)
    s1, o1b = _affine_from_stats(st1, counts_rows, float(R), g1p, b1p)

    # ---- S2: bn1+relu -> conv2 (3x3, per image) + bn2 partial stats ----
    # TODO(synk): for very large H*W*Cwp images (v7x 64 MiB VMEM), tile H with a
    #             +/-1-row halo instead of whole-image blocks.
    y1_4d = y1.reshape(N, H, W, Cwp)
    y2_4d, st2 = pl.pallas_call(
        functools.partial(_k_conv2_stats, H=H, W=W, C=Cwp, cdtype=cd),
        grid=(N,),
        in_specs=[pl.BlockSpec((1, H, W, Cwp), lambda n: (n, 0, 0, 0)),
                  pl.BlockSpec((3, 3 * Cwp, Cwp), lambda n: (0, 0, 0)),
                  vec_spec(Cwp), vec_spec(Cwp)],
        out_specs=[pl.BlockSpec((1, H, W, Cwp), lambda n: (n, 0, 0, 0)),
                   pl.BlockSpec((1, 2, Cwp), lambda n: (n, 0, 0))],
        out_shape=[jax.ShapeDtypeStruct((N, H, W, Cwp), cd),
                   jax.ShapeDtypeStruct((N, 2, Cwp), jnp.float32)],
        scratch_shapes=[pltpu.VMEM((H + 2, W + 2, Cwp), jnp.float32),   # halo pad
                        pltpu.VMEM((H, W + 2, 3 * Cwp), jnp.float32),   # dy-fused strip
                        pltpu.VMEM((H * W, Cwp), jnp.float32)],         # accumulator
        compiler_params=cparams,
    )(y1_4d, w2cat, s1, o1b)
    s2, o2b = _affine_from_stats(st2, counts_img, float(R), g2p, b2p)

    # ---- S3: bn2+relu -> conv3 + bn3 partial stats ----
    y2_2d = y2_4d.reshape(R, Cwp)
    y3, st3 = pl.pallas_call(
        functools.partial(_k_conv3_stats, rows=R, tile=tile, cdtype=cd),
        grid=(n_tiles,),
        in_specs=[row_spec(Cwp), vec_spec(Cwp), vec_spec(Cwp),
                  pl.BlockSpec((Cwp, C4p), lambda i: (0, 0))],
        out_specs=[row_spec(C4p), st_spec(C4p)],
        out_shape=[jax.ShapeDtypeStruct((R, C4p), cd),
                   jax.ShapeDtypeStruct((n_tiles, 2, C4p), jnp.float32)],
        compiler_params=cparams,
    )(y2_2d, s2, o2b, w3m)
    s3, o3b = _affine_from_stats(st3, counts_rows, float(R), g3p, b3p)

    # ---- S4: bn3 + residual add + relu (residual aliased to output) ----
    out2dp = pl.pallas_call(
        _k_bn_add_relu,
        grid=(n_tiles,),
        in_specs=[row_spec(C4p), vec_spec(C4p), vec_spec(C4p), row_spec(C4p)],
        out_specs=row_spec(C4p),
        out_shape=jax.ShapeDtypeStruct((R, C4p), jnp.float32),
        input_output_aliases={3: 0},
        compiler_params=cparams,
    )(y3, s3, o3b, x2dp)

    out = out2dp.reshape(N, H, W, C4p)[:, :, :, :C4]
    return jnp.transpose(out, (0, 3, 1, 2))


# ----------------------- pure-JAX reference (for checking) -----------------------

def _bn_ref(y_nchw, gamma, beta):
    mean = jnp.mean(y_nchw, axis=(0, 2, 3), keepdims=True)
    var = jnp.mean((y_nchw - mean) ** 2, axis=(0, 2, 3), keepdims=True)
    return ((y_nchw - mean) * jax.lax.rsqrt(var + EPS)
            * gamma[None, :, None, None] + beta[None, :, None, None])


def bottleneck_reference(x, params):
    w1, g1, b1, w2, g2, b2, w3, g3, b3 = params
    dn = ('NCHW', 'OIHW', 'NCHW')
    conv = jax.lax.conv_general_dilated
    o = conv(x, w1, (1, 1), 'VALID', dimension_numbers=dn)
    o = jnp.maximum(_bn_ref(o, g1, b1), 0.0)
    o = conv(o, w2, (1, 1), [(1, 1), (1, 1)], dimension_numbers=dn)
    o = jnp.maximum(_bn_ref(o, g2, b2), 0.0)
    o = conv(o, w3, (1, 1), 'VALID', dimension_numbers=dn)
    o = _bn_ref(o, g3, b3)
    return jnp.maximum(o + x, 0.0)


if __name__ == "__main__":
    # out_channel=4 -> expansion*out=16; downsample=None forces in_channel == 16.
    N, H, W = 2, 16, 16
    in_channel, out_channel, groups, width_per_group = 16, 4, 1, 64
    width = int(out_channel * (width_per_group / 64.0)) * groups        # 4
    c4 = out_channel * 4                                                # 16

    key = jax.random.PRNGKey(0)
    k = jax.random.split(key, 10)
    x = jax.random.normal(k[0], (N, in_channel, H, W), jnp.float32)

    params = (
        jax.random.normal(k[1], (width, in_channel, 1, 1), jnp.float32) * 0.1,  # conv1
        1.0 + 0.1 * jax.random.normal(k[2], (width,), jnp.float32),             # bn1 gamma
        0.1 * jax.random.normal(k[3], (width,), jnp.float32),                   # bn1 beta
        jax.random.normal(k[4], (width, width, 3, 3), jnp.float32) * 0.1,       # conv2
        1.0 + 0.1 * jax.random.normal(k[5], (width,), jnp.float32),             # bn2 gamma
        0.1 * jax.random.normal(k[6], (width,), jnp.float32),                   # bn2 beta
        jax.random.normal(k[7], (c4, width, 1, 1), jnp.float32) * 0.1,          # conv3
        1.0 + 0.1 * jax.random.normal(k[8], (c4,), jnp.float32),                # bn3 gamma
        0.1 * jax.random.normal(k[9], (c4,), jnp.float32),                      # bn3 beta
    )

    ref = jax.block_until_ready(bottleneck_reference(x, params))

    # Default path: bf16 operands / intermediates (tile_r=128 exercises a 4-tile grid).
    fwd_bf16 = jax.jit(functools.partial(bottleneck_forward, tile_r=128))
    out_bf16 = jax.block_until_ready(fwd_bf16(x, params))
    assert out_bf16.shape == (N, c4, H, W), out_bf16.shape
    err_bf16 = float(jnp.max(jnp.abs(out_bf16 - ref)))
    assert jnp.allclose(out_bf16, ref, rtol=5e-2, atol=5e-2), err_bf16

    # f32 path for a tighter numerical check.
    fwd_f32 = jax.jit(functools.partial(bottleneck_forward, tile_r=128,
                                        compute_dtype=jnp.float32))
    out_f32 = jax.block_until_ready(fwd_f32(x, params))
    err_f32 = float(jnp.max(jnp.abs(out_f32 - ref)))
    assert jnp.allclose(out_f32, ref, rtol=1e-2, atol=1e-2), err_f32

    print("KERNEL_OK")
</pallas_src>

<mosaic_0001>
module attributes {stable_mosaic.version = 11 : i64} {
  func.func @_k_conv1_stats(%arg0: i32, %arg1: memref<128x128xf32, #tpu.memory_space<vmem>>, %arg2: memref<128x128xbf16, #tpu.memory_space<vmem>>, %arg3: memref<128x128xbf16, #tpu.memory_space<vmem>>, %arg4: memref<1x2x128xf32, #tpu.memory_space<vmem>>) attributes {dimension_semantics = [#tpu.dimension_semantics<parallel>], iteration_bounds = array<i64: 4>, scalar_prefetch = 0 : i64, scratch_operands = 0 : i64, tpu.core_type = #tpu.core_type<tc>, window_params = [{transform_indices = @transform_0, window_bounds = array<i64: 128, 128>}, {pipeline_mode = #tpu.pipeline_mode<synchronous>, transform_indices = @transform_1, window_bounds = array<i64: 128, 128>}, {transform_indices = @transform_2, window_bounds = array<i64: 128, 128>}, {transform_indices = @transform_3, window_bounds = array<i64: 1, 2, 128>}]} {
    %c0 = arith.constant 0 : index
    %c0_0 = arith.constant 0 : index
    %0 = vector.load %arg1[%c0, %c0_0] : memref<128x128xf32, #tpu.memory_space<vmem>>, vector<128x128xf32>
    %1 = arith.truncf %0 : vector<128x128xf32> to vector<128x128xbf16>
    %c0_1 = arith.constant 0 : index
    %c0_2 = arith.constant 0 : index
    %2 = vector.load %arg2[%c0_1, %c0_2] : memref<128x128xbf16, #tpu.memory_space<vmem>>, vector<128x128xbf16>
    %cst = arith.constant dense<0.000000e+00> : vector<128x128xf32>
    %3 = tpu.matmul %1, %2, %cst {dimension_numbers = #tpu.dot_dimension_numbers<[1], [0], [0], [1], [0, 0, 1, 1], [], []>} : vector<128x128xbf16>, vector<128x128xbf16>, vector<128x128xf32> -> vector<128x128xf32>
    %4 = arith.truncf %3 : vector<128x128xf32> to vector<128x128xbf16>
    %c0_3 = arith.constant 0 : index
    %c0_4 = arith.constant 0 : index
    %5 = vector.load %arg3[%c0_3, %c0_4] : memref<128x128xbf16, #tpu.memory_space<vmem>>, vector<128x128xbf16>
    tpu.vector_store %arg3[%c0_3, %c0_4], %4 {strides = array<i32>} : memref<128x128xbf16, #tpu.memory_space<vmem>>, vector<128x128xbf16>,
    %cst_5 = arith.constant dense<0.000000e+00> : vector<128xf32>
    %6 = vector.multi_reduction <add>, %3, %cst_5 [0] : vector<128x128xf32> to vector<128xf32>
    %7 = vector.shape_cast %6 : vector<128xf32> to vector<1x128xf32>
    %cst_6 = arith.constant 1.280000e+02 : f32
    %8 = vector.broadcast %cst_6 : f32 to vector<1x128xf32>
    %9 = arith.divf %7, %8 : vector<1x128xf32>
    %10 = vector.broadcast %9 : vector<1x128xf32> to vector<128x128xf32>
    %11 = arith.subf %3, %10 : vector<128x128xf32>
    %cst_7 = arith.constant dense<0.000000e+00> : vector<128xf32>
    %12 = vector.multi_reduction <add>, %3, %cst_7 [0] : vector<128x128xf32> to vector<128xf32>
    %13 = vector.shape_cast %12 : vector<128xf32> to vector<1x128xf32>
    %c0_8 = arith.constant 0 : index
    %c0_9 = arith.constant 0 : index
    %c0_10 = arith.constant 0 : index
    %14 = vector.load %arg4[%c0_8, %c0_9, %c0_10] : memref<1x2x128xf32, #tpu.memory_space<vmem>>, vector<1x1x128xf32>
    %15 = vector.shape_cast %14 : vector<1x1x128xf32> to vector<1x128xf32>
    %16 = vector.shape_cast %13 : vector<1x128xf32> to vector<1x1x128xf32>
    tpu.vector_store %arg4[%c0_8, %c0_9, %c0_10], %16 {strides = array<i32>} : memref<1x2x128xf32, #tpu.memory_space<vmem>>, vector<1x1x128xf32>,
    %17 = arith.mulf %11, %11 : vector<128x128xf32>
    %cst_11 = arith.constant dense<0.000000e+00> : vector<128xf32>
    %18 = vector.multi_reduction <add>, %17, %cst_11 [0] : vector<128x128xf32> to vector<128xf32>
    %19 = vector.shape_cast %18 : vector<128xf32> to vector<1x128xf32>
    %c0_12 = arith.constant 0 : index
    %c1 = arith.constant 1 : index
    %c0_13 = arith.constant 0 : index
    %20 = vector.load %arg4[%c0_12, %c1, %c0_13] : memref<1x2x128xf32, #tpu.memory_space<vmem>>, vector<1x1x128xf32>
    %21 = vector.shape_cast %20 : vector<1x1x128xf32> to vector<1x128xf32>
    %22 = vector.shape_cast %19 : vector<1x128xf32> to vector<1x1x128xf32>
    tpu.vector_store %arg4[%c0_12, %c1, %c0_13], %22 {strides = array<i32>} : memref<1x2x128xf32, #tpu.memory_space<vmem>>, vector<1x1x128xf32>,
    return
  }
  func.func @transform_0(%arg0: i32) -> (i32, i32) {
    %c0_i32 = arith.constant 0 : i32
    %c0_i32_0 = arith.constant 0 : i32
    return %arg0, %c0_i32 : i32, i32
  }
  func.func @transform_1(%arg0: i32) -> (i32, i32) {
    %c0_i32 = arith.constant 0 : i32
    %c0_i32_0 = arith.constant 0 : i32
    %c0_i32_1 = arith.constant 0 : i32
    return %c0_i32, %c0_i32_0 : i32, i32
  }
  func.func @transform_2(%arg0: i32) -> (i32, i32) {
    %c0_i32 = arith.constant 0 : i32
    %c0_i32_0 = arith.constant 0 : i32
    return %arg0, %c0_i32 : i32, i32
  }
  func.func @transform_3(%arg0: i32) -> (i32, i32, i32) {
    %c0_i32 = arith.constant 0 : i32
    %c0_i32_0 = arith.constant 0 : i32
    %c0_i32_1 = arith.constant 0 : i32
    return %arg0, %c0_i32, %c0_i32_0 : i32, i32, i32
  }
}

module attributes {stable_mosaic.version = 11 : i64} {
  func.func @_k_conv2_stats(%arg0: i32, %arg1: memref<1x16x16x128xbf16, #tpu.memory_space<vmem>>, %arg2: memref<3x384x128xbf16, #tpu.memory_space<vmem>>, %arg3: memref<1x128xf32, #tpu.memory_space<vmem>>, %arg4: memref<1x128xf32, #tpu.memory_space<vmem>>, %arg5: memref<1x16x16x128xbf16, #tpu.memory_space<vmem>>, %arg6: memref<1x2x128xf32, #tpu.memory_space<vmem>>, %arg7: memref<18x18x128xf32, #tpu.memory_space<vmem>>, %arg8: memref<16x18x384xf32, #tpu.memory_space<vmem>>, %arg9: memref<256x128xf32, #tpu.memory_space<vmem>>) attributes {dimension_semantics = [#tpu.dimension_semantics<parallel>], iteration_bounds = array<i64: 2>, scalar_prefetch = 0 : i64, scratch_operands = 3 : i64, tpu.core_type = #tpu.core_type<tc>, window_params = [{transform_indices = @transform_0, window_bounds = array<i64: 1, 16, 16, 128>}, {pipeline_mode = #tpu.pipeline_mode<synchronous>, transform_indices = @transform_1, window_bounds = array<i64: 3, 384, 128>}, {pipeline_mode = #tpu.pipeline_mode<synchronous>, transform_indices = @transform_2, window_bounds = array<i64: 1, 128>}, {pipeline_mode = #tpu.pipeline_mode<synchronous>, transform_indices = @transform_3, window_bounds = array<i64: 1, 128>}, {transform_indices = @transform_4, window_bounds = array<i64: 1, 16, 16, 128>}, {transform_indices = @transform_5, window_bounds = array<i64: 1, 2, 128>}]} {
    %c0 = arith.constant 0 : index
    %c0_0 = arith.constant 0 : index
    %c0_1 = arith.constant 0 : index
    %c0_2 = arith.constant 0 : index
    %0 = vector.load %arg1[%c0, %c0_0, %c0_1, %c0_2] : memref<1x16x16x128xbf16, #tpu.memory_space<vmem>>, vector<1x16x16x128xbf16>
    %1 = vector.shape_cast %0 : vector<1x16x16x128xbf16> to vector<16x16x128xbf16>
    %2 = arith.extf %1 : vector<16x16x128xbf16> to vector<16x16x128xf32>
    %c0_3 = arith.constant 0 : index
    %c0_4 = arith.constant 0 : index
    %3 = vector.load %arg3[%c0_3, %c0_4] : memref<1x128xf32, #tpu.memory_space<vmem>>, vector<1x128xf32>
    %4 = vector.shape_cast %3 : vector<1x128xf32> to vector<1x1x128xf32>
    %5 = vector.broadcast %4 : vector<1x1x128xf32> to vector<16x16x128xf32>
    %6 = arith.mulf %2, %5 : vector<16x16x128xf32>
    %c0_5 = arith.constant 0 : index
    %c0_6 = arith.constant 0 : index
    %7 = vector.load %arg4[%c0_5, %c0_6] : memref<1x128xf32, #tpu.memory_space<vmem>>, vector<1x128xf32>
    %8 = vector.shape_cast %7 : vector<1x128xf32> to vector<1x1x128xf32>
    %9 = vector.broadcast %8 : vector<1x1x128xf32> to vector<16x16x128xf32>
    %10 = arith.addf %6, %9 : vector<16x16x128xf32>
    %cst = arith.constant 0.000000e+00 : f32
    %11 = vector.broadcast %cst : f32 to vector<16x16x128xf32>
    %12 = arith.maximumf %10, %11 : vector<16x16x128xf32>
    %cst_7 = arith.constant 0.000000e+00 : f32
    %13 = vector.broadcast %cst_7 : f32 to vector<1x18x128xf32>
    %cst_8 = arith.constant 0.000000e+00 : f32
    %14 = vector.broadcast %cst_8 : f32 to vector<18x1x128xf32>
    %c0_9 = arith.constant 0 : index
    %c0_10 = arith.constant 0 : index
    %c0_11 = arith.constant 0 : index
    %15 = vector.load %arg7[%c0_9, %c0_10, %c0_11] : memref<18x18x128xf32, #tpu.memory_space<vmem>>, vector<1x18x128xf32>
    tpu.vector_store %arg7[%c0_9, %c0_10, %c0_11], %13 {strides = array<i32>} : memref<18x18x128xf32, #tpu.memory_space<vmem>>, vector<1x18x128xf32>,
    %c17 = arith.constant 17 : index
    %c0_12 = arith.constant 0 : index
    %c0_13 = arith.constant 0 : index
    %16 = vector.load %arg7[%c17, %c0_12, %c0_13] : memref<18x18x128xf32, #tpu.memory_space<vmem>>, vector<1x18x128xf32>
    tpu.vector_store %arg7[%c17, %c0_12, %c0_13], %13 {strides = array<i32>} : memref<18x18x128xf32, #tpu.memory_space<vmem>>, vector<1x18x128xf32>,
    %c0_14 = arith.constant 0 : index
    %c0_15 = arith.constant 0 : index
    %c0_16 = arith.constant 0 : index
    %17 = vector.load %arg7[%c0_14, %c0_15, %c0_16] : memref<18x18x128xf32, #tpu.memory_space<vmem>>, vector<18x1x128xf32>
    tpu.vector_store %arg7[%c0_14, %c0_15, %c0_16], %14 {strides = array<i32>} : memref<18x18x128xf32, #tpu.memory_space<vmem>>, vector<18x1x128xf32>,
    %c0_17 = arith.constant 0 : index
    %c17_18 = arith.constant 17 : index
    %c0_19 = arith.constant 0 : index
    %18 = vector.load %arg7[%c0_17, %c17_18, %c0_19] : memref<18x18x128xf32, #tpu.memory_space<vmem>>, vector<18x1x128xf32>
    tpu.vector_store %arg7[%c0_17, %c17_18, %c0_19], %14 {strides = array<i32>} : memref<18x18x128xf32, #tpu.memory_space<vmem>>, vector<18x1x128xf32>,
    %c1 = arith.constant 1 : index
    %c1_20 = arith.constant 1 : index
    %c0_21 = arith.constant 0 : index
    %19 = vector.load %arg7[%c1, %c1_20, %c0_21] : memref<18x18x128xf32, #tpu.memory_space<vmem>>, vector<16x16x128xf32>
    tpu.vector_store %arg7[%c1, %c1_20, %c0_21], %12 {strides = array<i32>} : memref<18x18x128xf32, #tpu.memory_space<vmem>>, vector<16x16x128xf32>,
    %c0_22 = arith.constant 0 : index
    %c0_23 = arith.constant 0 : index
    %c0_24 = arith.constant 0 : index
    %20 = vector.load %arg7[%c0_22, %c0_23, %c0_24] : memref<18x18x128xf32, #tpu.memory_space<vmem>>, vector<16x18x128xf32>
    %c0_25 = arith.constant 0 : index
    %c0_26 = arith.constant 0 : index
    %c0_27 = arith.constant 0 : index
    %21 = vector.load %arg8[%c0_25, %c0_26, %c0_27] : memref<16x18x384xf32, #tpu.memory_space<vmem>>, vector<16x18x128xf32>
    tpu.vector_store %arg8[%c0_25, %c0_26, %c0_27], %20 {strides = array<i32>} : memref<16x18x384xf32, #tpu.memory_space<vmem>>, vector<16x18x128xf32>,
    %c1_28 = arith.constant 1 : index
    %c0_29 = arith.constant 0 : index
    %c0_30 = arith.constant 0 : index
    %22 = vector.load %arg7[%c1_28, %c0_29, %c0_30] : memref<18x18x128xf32, #tpu.memory_space<vmem>>, vector<16x18x128xf32>
    %c0_31 = arith.constant 0 : index
    %c0_32 = arith.constant 0 : index
    %c128 = arith.constant 128 : index
    %23 = vector.load %arg8[%c0_31, %c0_32, %c128] : memref<16x18x384xf32, #tpu.memory_space<vmem>>, vector<16x18x128xf32>
    tpu.vector_store %arg8[%c0_31, %c0_32, %c128], %22 {strides = array<i32>} : memref<16x18x384xf32, #tpu.memory_space<vmem>>, vector<16x18x128xf32>,
    %c2 = arith.constant 2 : index
    %c0_33 = arith.constant 0 : index
    %c0_34 = arith.constant 0 : index
    %24 = vector.load %arg7[%c2, %c0_33, %c0_34] : memref<18x18x128xf32, #tpu.memory_space<vmem>>, vector<16x18x128xf32>
    %c0_35 = arith.constant 0 : index
    %c0_36 = arith.constant 0 : index
    %c256 = arith.constant 256 : index
    %25 = vector.load %arg8[%c0_35, %c0_36, %c256] : memref<16x18x384xf32, #tpu.memory_space<vmem>>, vector<16x18x128xf32>
    tpu.vector_store %arg8[%c0_35, %c0_36, %c256], %24 {strides = array<i32>} : memref<16x18x384xf32, #tpu.memory_space<vmem>>, vector<16x18x128xf32>,
    %c0_37 = arith.constant 0 : index
    %c0_38 = arith.constant 0 : index
    %c0_39 = arith.constant 0 : index
    %26 = vector.load %arg8[%c0_37, %c0_38, %c0_39] : memref<16x18x384xf32, #tpu.memory_space<vmem>>, vector<16x16x384xf32>
    %27 = vector.shape_cast %26 : vector<16x16x384xf32> to vector<256x384xf32>
    %28 = arith.truncf %27 : vector<256x384xf32> to vector<256x384xbf16>
    %c0_40 = arith.constant 0 : index
    %c0_41 = arith.constant 0 : index
    %c0_42 = arith.constant 0 : index
    %29 = vector.load %arg2[%c0_40, %c0_41, %c0_42] : memref<3x384x128xbf16, #tpu.memory_space<vmem>>, vector<1x384x128xbf16>
    %30 = vector.shape_cast %29 : vector<1x384x128xbf16> to vector<384x128xbf16>
    %cst_43 = arith.constant dense<0.000000e+00> : vector<256x128xf32>
    %31 = tpu.matmul %28, %30, %cst_43 {dimension_numbers = #tpu.dot_dimension_numbers<[1], [0], [0], [1], [0, 0, 1, 1], [], []>} : vector<256x384xbf16>, vector<384x128xbf16>, vector<256x128xf32> -> vector<256x128xf32>
    %c0_44 = arith.constant 0 : index
    %c0_45 = arith.constant 0 : index
    %32 = vector.load %arg9[%c0_44, %c0_45] : memref<256x128xf32, #tpu.memory_space<vmem>>, vector<256x128xf32>
    tpu.vector_store %arg9[%c0_44, %c0_45], %31 {strides = array<i32>} : memref<256x128xf32, #tpu.memory_space<vmem>>, vector<256x128xf32>,
    %c0_46 = arith.constant 0 : index
    %c0_47 = arith.constant 0 : index
    %33 = vector.load %arg9[%c0_46, %c0_47] : memref<256x128xf32, #tpu.memory_space<vmem>>, vector<256x128xf32>
    %c0_48 = arith.constant 0 : index
    %c1_49 = arith.constant 1 : index
    %c0_50 = arith.constant 0 : index
    %34 = vector.load %arg8[%c0_48, %c1_49, %c0_50] : memref<16x18x384xf32, #tpu.memory_space<vmem>>, vector<16x16x384xf32>
    %35 = vector.shape_cast %34 : vector<16x16x384xf32> to vector<256x384xf32>
    %36 = arith.truncf %35 : vector<256x384xf32> to vector<256x384xbf16>
    %c1_51 = arith.constant 1 : index
    %c0_52 = arith.constant 0 : index
    %c0_53 = arith.constant 0 : index
    %37 = vector.load %arg2[%c1_51, %c0_52, %c0_53] : memref<3x384x128xbf16, #tpu.memory_space<vmem>>, vector<1x384x128xbf16>
    %38 = vector.shape_cast %37 : vector<1x384x128xbf16> to vector<384x128xbf16>
    %cst_54 = arith.constant dense<0.000000e+00> : vector<256x128xf32>
    %39 = tpu.matmul %36, %38, %cst_54 {dimension_numbers = #tpu.dot_dimension_numbers<[1], [0], [0], [1], [0, 0, 1, 1], [], []>} : vector<256x384xbf16>, vector<384x128xbf16>, vector<256x128xf32> -> vector<256x128xf32>
    %40 = arith.addf %33, %39 : vector<256x128xf32>
    %c0_55 = arith.constant 0 : index
    %c0_56 = arith.constant 0 : index
    %41 = vector.load %arg9[%c0_55, %c0_56] : memref<256x128xf32, #tpu.memory_space<vmem>>, vector<256x128xf32>
    tpu.vector_store %arg9[%c0_55, %c0_56], %40 {strides = array<i32>} : memref<256x128xf32, #tpu.memory_space<vmem>>, vector<256x128xf32>,
    %c0_57 = arith.constant 0 : index
    %c0_58 = arith.constant 0 : index
    %42 = vector.load %arg9[%c0_57, %c0_58] : memref<256x128xf32, #tpu.memory_space<vmem>>, vector<256x128xf32>
    %c0_59 = arith.constant 0 : index
    %c2_60 = arith.constant 2 : index
    %c0_61 = arith.constant 0 : index
    %43 = vector.load %arg8[%c0_59, %c2_60, %c0_61] : memref<16x18x384xf32, #tpu.memory_space<vmem>>, vector<16x16x384xf32>
    %44 = vector.shape_cast %43 : vector<16x16x384xf32> to vector<256x384xf32>
    %45 = arith.truncf %44 : vector<256x384xf32> to vector<256x384xbf16>
    %c2_62 = arith.constant 2 : index
    %c0_63 = arith.constant 0 : index
    %c0_64 = arith.constant 0 : index
    %46 = vector.load %arg2[%c2_62, %c0_63, %c0_64] : memref<3x384x128xbf16, #tpu.memory_space<vmem>>, vector<1x384x128xbf16>
    %47 = vector.shape_cast %46 : vector<1x384x128xbf16> to vector<384x128xbf16>
    %cst_65 = arith.constant dense<0.000000e+00> : vector<256x128xf32>
    %48 = tpu.matmul %45, %47, %cst_65 {dimension_numbers = #tpu.dot_dimension_numbers<[1], [0], [0], [1], [0, 0, 1, 1], [], []>} : vector<256x384xbf16>, vector<384x128xbf16>, vector<256x128xf32> -> vector<256x128xf32>
    %49 = arith.addf %42, %48 : vector<256x128xf32>
    %c0_66 = arith.constant 0 : index
    %c0_67 = arith.constant 0 : index
    %50 = vector.load %arg9[%c0_66, %c0_67] : memref<256x128xf32, #tpu.memory_space<vmem>>, vector<256x128xf32>
    tpu.vector_store %arg9[%c0_66, %c0_67], %49 {strides = array<i32>} : memref<256x128xf32, #tpu.memory_space<vmem>>, vector<256x128xf32>,
    %c0_68 = arith.constant 0 : index
    %c0_69 = arith.constant 0 : index
    %51 = vector.load %arg9[%c0_68, %c0_69] : memref<256x128xf32, #tpu.memory_space<vmem>>, vector<256x128xf32>
    %52 = vector.shape_cast %51 : vector<256x128xf32> to vector<1x16x16x128xf32>
    %53 = arith.truncf %52 : vector<1x16x16x128xf32> to vector<1x16x16x128xbf16>
    %c0_70 = arith.constant 0 : index
    %c0_71 = arith.constant 0 : index
    %c0_72 = arith.constant 0 : index
    %c0_73 = arith.constant 0 : index
    %54 = vector.load %arg5[%c0_70, %c0_71, %c0_72, %c0_73] : memref<1x16x16x128xbf16, #tpu.memory_space<vmem>>, vector<1x16x16x128xbf16>
    tpu.vector_store %arg5[%c0_70, %c0_71, %c0_72, %c0_73], %53 {strides = array<i32>} : memref<1x16x16x128xbf16, #tpu.memory_space<vmem>>, vector<1x16x16x128xbf16>,
    %cst_74 = arith.constant dense<0.000000e+00> : vector<128xf32>
    %55 = vector.multi_reduction <add>, %51, %cst_74 [0] : vector<256x128xf32> to vector<128xf32>
    %56 = vector.shape_cast %55 : vector<128xf32> to vector<1x128xf32>
    %cst_75 = arith.constant 2.560000e+02 : f32
    %57 = vector.broadcast %cst_75 : f32 to vector<1x128xf32>
    %58 = arith.divf %56, %57 : vector<1x128xf32>
    %59 = vector.broadcast %58 : vector<1x128xf32> to vector<256x128xf32>
    %60 = arith.subf %51, %59 : vector<256x128xf32>
    %cst_76 = arith.constant dense<0.000000e+00> : vector<128xf32>
    %61 = vector.multi_reduction <add>, %51, %cst_76 [0] : vector<256x128xf32> to vector<128xf32>
    %62 = vector.shape_cast %61 : vector<128xf32> to vector<1x128xf32>
    %c0_77 = arith.constant 0 : index
    %c0_78 = arith.constant 0 : index
    %c0_79 = arith.constant 0 : index
    %63 = vector.load %arg6[%c0_77, %c0_78, %c0_79] : memref<1x2x128xf32, #tpu.memory_space<vmem>>, vector<1x1x128xf32>
    %64 = vector.shape_cast %63 : vector<1x1x128xf32> to vector<1x128xf32>
    %65 = vector.shape_cast %62 : vector<1x128xf32> to vector<1x1x128xf32>
    tpu.vector_store %arg6[%c0_77, %c0_78, %c0_79], %65 {strides = array<i32>} : memref<1x2x128xf32, #tpu.memory_space<vmem>>, vector<1x1x128xf32>,
    %66 = arith.mulf %60, %60 : vector<256x128xf32>
    %cst_80 = arith.constant dense<0.000000e+00> : vector<128xf32>
    %67 = vector.multi_reduction <add>, %66, %cst_80 [0] : vector<256x128xf32> to vector<128xf32>
    %68 = vector.shape_cast %67 : vector<128xf32> to vector<1x128xf32>
    %c0_81 = arith.constant 0 : index
    %c1_82 = arith.constant 1 : index
    %c0_83 = arith.constant 0 : index
    %69 = vector.load %arg6[%c0_81, %c1_82, %c0_83] : memref<1x2x128xf32, #tpu.memory_space<vmem>>, vector<1x1x128xf32>
    %70 = vector.shape_cast %69 : vector<1x1x128xf32> to vector<1x128xf32>
    %71 = vector.shape_cast %68 : vector<1x128xf32> to vector<1x1x128xf32>
    tpu.vector_store %arg6[%c0_81, %c1_82, %c0_83], %71 {strides = array<i32>} : memref<1x2x128xf32, #tpu.memory_space<vmem>>, vector<1x1x128xf32>,
    return
  }
  func.func @transform_0(%arg0: i32) -> (i32, i32, i32, i32) {
    %c0_i32 = arith.constant 0 : i32
    %c0_i32_0 = arith.constant 0 : i32
    %c0_i32_1 = arith.constant 0 : i32
    %c0_i32_2 = arith.constant 0 : i32
    return %arg0, %c0_i32, %c0_i32_0, %c0_i32_1 : i32, i32, i32, i32
  }
  func.func @transform_1(%arg0: i32) -> (i32, i32, i32) {
    %c0_i32 = arith.constant 0 : i32
    %c0_i32_0 = arith.constant 0 : i32
    %c0_i32_1 = arith.constant 0 : i32
    %c0_i32_2 = arith.constant 0 : i32
    return %c0_i32, %c0_i32_0, %c0_i32_1 : i32, i32, i32
  }
  func.func @transform_2(%arg0: i32) -> (i32, i32) {
    %c0_i32 = arith.constant 0 : i32
    %c0_i32_0 = arith.constant 0 : i32
    %c0_i32_1 = arith.constant 0 : i32
    return %c0_i32, %c0_i32_0 : i32, i32
  }
  func.func @transform_3(%arg0: i32) -> (i32, i32) {
    %c0_i32 = arith.constant 0 : i32
    %c0_i32_0 = arith.constant 0 : i32
    %c0_i32_1 = arith.constant 0 : i32
    return %c0_i32, %c0_i32_0 : i32, i32
  }
  func.func @transform_4(%arg0: i32) -> (i32, i32, i32, i32) {
    %c0_i32 = arith.constant 0 : i32
    %c0_i32_0 = arith.constant 0 : i32
    %c0_i32_1 = arith.constant 0 : i32
    %c0_i32_2 = arith.constant 0 : i32
    return %arg0, %c0_i32, %c0_i32_0, %c0_i32_1 : i32, i32, i32, i32
  }
  func.func @transform_5(%arg0: i32) -> (i32, i32, i32) {
    %c0_i32 = arith.constant 0 : i32
    %c0_i32_0 = arith.constant 0 : i32
    %c0_i32_1 = arith.constant 0 : i32
    return %arg0, %c0_i32, %c0_i32_0 : i32, i32, i32
  }
}

module attributes {stable_mosaic.version = 11 : i64} {
  func.func @_k_conv3_stats(%arg0: i32, %arg1: memref<128x128xbf16, #tpu.memory_space<vmem>>, %arg2: memref<1x128xf32, #tpu.memory_space<vmem>>, %arg3: memref<1x128xf32, #tpu.memory_space<vmem>>, %arg4: memref<128x128xbf16, #tpu.memory_space<vmem>>, %arg5: memref<128x128xbf16, #tpu.memory_space<vmem>>, %arg6: memref<1x2x128xf32, #tpu.memory_space<vmem>>) attributes {dimension_semantics = [#tpu.dimension_semantics<parallel>], iteration_bounds = array<i64: 4>, scalar_prefetch = 0 : i64, scratch_operands = 0 : i64, tpu.core_type = #tpu.core_type<tc>, window_params = [{transform_indices = @transform_0, window_bounds = array<i64: 128, 128>}, {pipeline_mode = #tpu.pipeline_mode<synchronous>, transform_indices = @transform_1, window_bounds = array<i64: 1, 128>}, {pipeline_mode = #tpu.pipeline_mode<synchronous>, transform_indices = @transform_2, window_bounds = array<i64: 1, 128>}, {pipeline_mode = #tpu.pipeline_mode<synchronous>, transform_indices = @transform_3, window_bounds = array<i64: 128, 128>}, {transform_indices = @transform_4, window_bounds = array<i64: 128, 128>}, {transform_indices = @transform_5, window_bounds = array<i64: 1, 2, 128>}]} {
    %c0 = arith.constant 0 : index
    %c0_0 = arith.constant 0 : index
    %0 = vector.load %arg1[%c0, %c0_0] : memref<128x128xbf16, #tpu.memory_space<vmem>>, vector<128x128xbf16>
    %1 = arith.extf %0 : vector<128x128xbf16> to vector<128x128xf32>
    %c0_1 = arith.constant 0 : index
    %c0_2 = arith.constant 0 : index
    %2 = vector.load %arg2[%c0_1, %c0_2] : memref<1x128xf32, #tpu.memory_space<vmem>>, vector<1x128xf32>
    %3 = vector.broadcast %2 : vector<1x128xf32> to vector<128x128xf32>
    %4 = arith.mulf %1, %3 : vector<128x128xf32>
    %c0_3 = arith.constant 0 : index
    %c0_4 = arith.constant 0 : index
    %5 = vector.load %arg3[%c0_3, %c0_4] : memref<1x128xf32, #tpu.memory_space<vmem>>, vector<1x128xf32>
    %6 = vector.broadcast %5 : vector<1x128xf32> to vector<128x128xf32>
    %7 = arith.addf %4, %6 : vector<128x128xf32>
    %cst = arith.constant 0.000000e+00 : f32
    %8 = vector.broadcast %cst : f32 to vector<128x128xf32>
    %9 = arith.maximumf %7, %8 : vector<128x128xf32>
    %10 = arith.truncf %9 : vector<128x128xf32> to vector<128x128xbf16>
    %c0_5 = arith.constant 0 : index
    %c0_6 = arith.constant 0 : index
    %11 = vector.load %arg4[%c0_5, %c0_6] : memref<128x128xbf16, #tpu.memory_space<vmem>>, vector<128x128xbf16>
    %cst_7 = arith.constant dense<0.000000e+00> : vector<128x128xf32>
    %12 = tpu.matmul %10, %11, %cst_7 {dimension_numbers = #tpu.dot_dimension_numbers<[1], [0], [0], [1], [0, 0, 1, 1], [], []>} : vector<128x128xbf16>, vector<128x128xbf16>, vector<128x128xf32> -> vector<128x128xf32>
    %13 = arith.truncf %12 : vector<128x128xf32> to vector<128x128xbf16>
    %c0_8 = arith.constant 0 : index
    %c0_9 = arith.constant 0 : index
    %14 = vector.load %arg5[%c0_8, %c0_9] : memref<128x128xbf16, #tpu.memory_space<vmem>>, vector<128x128xbf16>
    tpu.vector_store %arg5[%c0_8, %c0_9], %13 {strides = array<i32>} : memref<128x128xbf16, #tpu.memory_space<vmem>>, vector<128x128xbf16>,
    %cst_10 = arith.constant dense<0.000000e+00> : vector<128xf32>
    %15 = vector.multi_reduction <add>, %12, %cst_10 [0] : vector<128x128xf32> to vector<128xf32>
    %16 = vector.shape_cast %15 : vector<128xf32> to vector<1x128xf32>
    %cst_11 = arith.constant 1.280000e+02 : f32
    %17 = vector.broadcast %cst_11 : f32 to vector<1x128xf32>
    %18 = arith.divf %16, %17 : vector<1x128xf32>
    %19 = vector.broadcast %18 : vector<1x128xf32> to vector<128x128xf32>
    %20 = arith.subf %12, %19 : vector<128x128xf32>
    %cst_12 = arith.constant dense<0.000000e+00> : vector<128xf32>
    %21 = vector.multi_reduction <add>, %12, %cst_12 [0] : vector<128x128xf32> to vector<128xf32>
    %22 = vector.shape_cast %21 : vector<128xf32> to vector<1x128xf32>
    %c0_13 = arith.constant 0 : index
    %c0_14 = arith.constant 0 : index
    %c0_15 = arith.constant 0 : index
    %23 = vector.load %arg6[%c0_13, %c0_14, %c0_15] : memref<1x2x128xf32, #tpu.memory_space<vmem>>, vector<1x1x128xf32>
    %24 = vector.shape_cast %23 : vector<1x1x128xf32> to vector<1x128xf32>
    %25 = vector.shape_cast %22 : vector<1x128xf32> to vector<1x1x128xf32>
    tpu.vector_store %arg6[%c0_13, %c0_14, %c0_15], %25 {strides = array<i32>} : memref<1x2x128xf32, #tpu.memory_space<vmem>>, vector<1x1x128xf32>,
    %26 = arith.mulf %20, %20 : vector<128x128xf32>
    %cst_16 = arith.constant dense<0.000000e+00> : vector<128xf32>
    %27 = vector.multi_reduction <add>, %26, %cst_16 [0] : vector<128x128xf32> to vector<128xf32>
    %28 = vector.shape_cast %27 : vector<128xf32> to vector<1x128xf32>
    %c0_17 = arith.constant 0 : index
    %c1 = arith.constant 1 : index
    %c0_18 = arith.constant 0 : index
    %29 = vector.load %arg6[%c0_17, %c1, %c0_18] : memref<1x2x128xf32, #tpu.memory_space<vmem>>, vector<1x1x128xf32>
    %30 = vector.shape_cast %29 : vector<1x1x128xf32> to vector<1x128xf32>
    %31 = vector.shape_cast %28 : vector<1x128xf32> to vector<1x1x128xf32>
    tpu.vector_store %arg6[%c0_17, %c1, %c0_18], %31 {strides = array<i32>} : memref<1x2x128xf32, #tpu.memory_space<vmem>>, vector<1x1x128xf32>,
    return
  }
  func.func @transform_0(%arg0: i32) -> (i32, i32) {
    %c0_i32 = arith.constant 0 : i32
    %c0_i32_0 = arith.constant 0 : i32
    return %arg0, %c0_i32 : i32, i32
  }
  func.func @transform_1(%arg0: i32) -> (i32, i32) {
    %c0_i32 = arith.constant 0 : i32
    %c0_i32_0 = arith.constant 0 : i32
    %c0_i32_1 = arith.constant 0 : i32
    return %c0_i32, %c0_i32_0 : i32, i32
  }
  func.func @transform_2(%arg0: i32) -> (i32, i32) {
    %c0_i32 = arith.constant 0 : i32
    %c0_i32_0 = arith.constant 0 : i32
    %c0_i32_1 = arith.constant 0 : i32
    return %c0_i32, %c0_i32_0 : i32, i32
  }
  func.func @transform_3(%arg0: i32) -> (i32, i32) {
    %c0_i32 = arith.constant 0 : i32
    %c0_i32_0 = arith.constant 0 : i32
    %c0_i32_1 = arith.constant 0 : i32
    return %c0_i32, %c0_i32_0 : i32, i32
  }
  func.func @transform_4(%arg0: i32) -> (i32, i32) {
    %c0_i32 = arith.constant 0 : i32
    %c0_i32_0 = arith.constant 0 : i32
    return %arg0, %c0_i32 : i32, i32
  }
  func.func @transform_5(%arg0: i32) -> (i32, i32, i32) {
    %c0_i32 = arith.constant 0 : i32
    %c0_i32_0 = arith.constant 0 : i32
    %c0_i32_1 = arith.constant 0 : i32
    return %arg0, %c0_i32, %c0_i32_0 : i32, i32, i32
  }
}

module attributes {stable_mosaic.version = 11 : i64} {
  func.func @_k_bn_add_relu(%arg0: i32, %arg1: memref<128x128xbf16, #tpu.memory_space<vmem>>, %arg2: memref<1x128xf32, #tpu.memory_space<vmem>>, %arg3: memref<1x128xf32, #tpu.memory_space<vmem>>, %arg4: memref<128x128xf32, #tpu.memory_space<vmem>>, %arg5: memref<128x128xf32, #tpu.memory_space<vmem>>) attributes {dimension_semantics = [#tpu.dimension_semantics<parallel>], iteration_bounds = array<i64: 4>, scalar_prefetch = 0 : i64, scratch_operands = 0 : i64, tpu.core_type = #tpu.core_type<tc>, window_params = [{transform_indices = @transform_0, window_bounds = array<i64: 128, 128>}, {pipeline_mode = #tpu.pipeline_mode<synchronous>, transform_indices = @transform_1, window_bounds = array<i64: 1, 128>}, {pipeline_mode = #tpu.pipeline_mode<synchronous>, transform_indices = @transform_2, window_bounds = array<i64: 1, 128>}, {transform_indices = @transform_3, window_bounds = array<i64: 128, 128>}, {transform_indices = @transform_4, window_bounds = array<i64: 128, 128>}]} {
    %c0 = arith.constant 0 : index
    %c0_0 = arith.constant 0 : index
    %0 = vector.load %arg1[%c0, %c0_0] : memref<128x128xbf16, #tpu.memory_space<vmem>>, vector<128x128xbf16>
    %1 = arith.extf %0 : vector<128x128xbf16> to vector<128x128xf32>
    %c0_1 = arith.constant 0 : index
    %c0_2 = arith.constant 0 : index
    %2 = vector.load %arg2[%c0_1, %c0_2] : memref<1x128xf32, #tpu.memory_space<vmem>>, vector<1x128xf32>
    %3 = vector.broadcast %2 : vector<1x128xf32> to vector<128x128xf32>
    %4 = arith.mulf %1, %3 : vector<128x128xf32>
    %c0_3 = arith.constant 0 : index
    %c0_4 = arith.constant 0 : index
    %5 = vector.load %arg3[%c0_3, %c0_4] : memref<1x128xf32, #tpu.memory_space<vmem>>, vector<1x128xf32>
    %6 = vector.broadcast %5 : vector<1x128xf32> to vector<128x128xf32>
    %7 = arith.addf %4, %6 : vector<128x128xf32>
    %c0_5 = arith.constant 0 : index
    %c0_6 = arith.constant 0 : index
    %8 = vector.load %arg4[%c0_5, %c0_6] : memref<128x128xf32, #tpu.memory_space<vmem>>, vector<128x128xf32>
    %9 = arith.addf %7, %8 : vector<128x128xf32>
    %cst = arith.constant 0.000000e+00 : f32
    %10 = vector.broadcast %cst : f32 to vector<128x128xf32>
    %11 = arith.maximumf %9, %10 : vector<128x128xf32>
    %c0_7 = arith.constant 0 : index
    %c0_8 = arith.constant 0 : index
    %12 = vector.load %arg5[%c0_7, %c0_8] : memref<128x128xf32, #tpu.memory_space<vmem>>, vector<128x128xf32>
    tpu.vector_store %arg5[%c0_7, %c0_8], %11 {strides = array<i32>} : memref<128x128xf32, #tpu.memory_space<vmem>>, vector<128x128xf32>,
    return
  }
  func.func @transform_0(%arg0: i32) -> (i32, i32) {
    %c0_i32 = arith.constant 0 : i32
    %c0_i32_0 = arith.constant 0 : i32
    return %arg0, %c0_i32 : i32, i32
  }
  func.func @transform_1(%arg0: i32) -> (i32, i32) {
    %c0_i32 = arith.constant 0 : i32
    %c0_i32_0 = arith.constant 0 : i32
    %c0_i32_1 = arith.constant 0 : i32
    return %c0_i32, %c0_i32_0 : i32, i32
  }
  func.func @transform_2(%arg0: i32) -> (i32, i32) {
    %c0_i32 = arith.constant 0 : i32
    %c0_i32_0 = arith.constant 0 : i32
    %c0_i32_1 = arith.constant 0 : i32
    return %c0_i32, %c0_i32_0 : i32, i32
  }
  func.func @transform_3(%arg0: i32) -> (i32, i32) {
    %c0_i32 = arith.constant 0 : i32
    %c0_i32_0 = arith.constant 0 : i32
    return %arg0, %c0_i32 : i32, i32
  }
  func.func @transform_4(%arg0: i32) -> (i32, i32) {
    %c0_i32 = arith.constant 0 : i32
    %c0_i32_0 = arith.constant 0 : i32
    return %arg0, %c0_i32 : i32, i32
  }
}

</mosaic_0001>

<bundles_post_ra>
// kernel: bottleneck_forward.4
= control target key start
LH: loop header
LB: loop body
LE: loop exit
PB: predicated region body
PF: predicated region fallthrough
CT: control target
= control target key end

     0   :  { %s823_s12 = smov 0   ;;  %s923_s0 = inlined_call_operand.vmem [shape: f32[512,128], index: 0, kind: input, shape index: {}]   ;;  %s924_s1 = inlined_call_operand.vmem [shape: bf16[128,128], index: 1, kind: input, shape index: {}]   ;;  %s925_s2 = inlined_call_operand.vmem [shape: bf16[512,128], index: 2, kind: output, shape index: {0}]   ;;  %s926_s3 = inlined_call_operand.vmem [shape: f32[4,2,128], index: 3, kind: output, shape index: {1}]  }
   0x1 LB: > { %s829_s13 = sadd.s32 4294967295, %s801_s12   ;;  %p620_p0 = scmp.ge.s32.totalorder %s801_s12, 1  ;;  %s801_s12 = sphi %s823_s12, %s14_s12  }
   0x2   : > { %p141_p1 = scmp.lt.s32.totalorder %s801_s12, 5 }
   0x4   : > { %p142_p2 = pnand %p620_p0, %p141_p1 }
   0x5   : > { %v787_v0 = vld [vmem:[%s924_s1] sm:$0xff] (!%p142_p2)   ;;  %s621_s16 = sshll.u32 (!%p142_p2), %s829_s13, 4  ;;  %v788_v1 = vld [vmem:[%s924_s1 + $0x8] sm:$0xff] (!%p142_p2)   ;;  %v789_v2 = vld [vmem:[%s924_s1 + $0x10] sm:$0xff] (!%p142_p2)   ;;  %p181_p4 = scmp.lt.s32.totalorder (!%p142_p2), %s829_s13, 3 }
   0x6   : > { %145 = sbr.rel (%p142_p2) target bundleno = 346 (0x15a), region = 28  ;;  %p170_p3 = scmp.lt.s32.totalorder (!%p142_p2), %s621_s16, 63  ;;  %731 = vmatprep.subr.bf16.mxu0 (!%p142_p2), %v787_v0  ;;  %763 = vmatprep.subr.bf16.mxu1 (!%p142_p2), %v787_v0  ;;  %v790_v3 = vld [vmem:[%s924_s1 + $0x18] sm:$0xff] (!%p142_p2)   ;;  %v791_v9 = vld [vmem:[%s924_s1 + $0x20] sm:$0xff] (!%p142_p2)   ;;  %v792_v11 = vld [vmem:[%s924_s1 + $0x28] sm:$0xff] (!%p142_p2)  }
   0x7   : > { %732 = vmatpush3.bf16.msra.mxu0 (!%p142_p2), %v787_v0  ;;  %771 = vmatpush3.bf16.msra.mxu1 (!%p142_p2), %v787_v0  ;;  %v793_v12 = vld [vmem:[%s924_s1 + $0x30] sm:$0xff] (!%p142_p2)   ;;  %v794_v13 = vld [vmem:[%s924_s1 + $0x38] sm:$0xff] (!%p142_p2)  }
   0x8   : > { %733 = vmatprep.subr.bf16.mxu0 (!%p142_p2), %v788_v1  ;;  %764 = vmatprep.subr.bf16.mxu1 (!%p142_p2), %v788_v1 }
   0xb   : > { %734 = vmatpush3.bf16.msra.mxu0 (!%p142_p2), %v788_v1  ;;  %772 = vmatpush3.bf16.msra.mxu1 (!%p142_p2), %v788_v1 }
   0xc   : > { %735 = vmatprep.subr.bf16.mxu0 (!%p142_p2), %v789_v2  ;;  %765 = vmatprep.subr.bf16.mxu1 (!%p142_p2), %v789_v2 }
   0xd   : > { %s928_s16 = smov (!%p170_p3, %s621_s16), 63  ;;  %s930_s13 = smov (!%p181_p4, %s829_s13), 3 }
   0xe   : > { %s622_s21 = sshll.u32 %s928_s16, 3  ;;  %s624_s8 = sshll.u32 %s928_s16, 2 }
   0xf   : > { %s849_s24 = scalar_lea.vmem %s923_s0, %s622_s21  ;;  %736 = vmatpush3.bf16.msra.mxu0 %v789_v2  ;;  %773 = vmatpush3.bf16.msra.mxu1 %v789_v2  ;;  %s890_s11 = scalar_lea.vmem %s925_s2, %s624_s8 }
  0x10   : > { %v186_v4 = vld [vmem:[%s849_s24] sm:$0xff]  ;;  %v187_v5 = vld [vmem:[%s849_s24 + $0x8] sm:$0xff]  ;;  %737 = vmatprep.subr.bf16.mxu0 %v790_v3  ;;  %766 = vmatprep.subr.bf16.mxu1 %v790_v3  ;;  %v188_v14 = vld [vmem:[%s849_s24 + $0x10] sm:$0xff]  ;;  %s625_s14 = sshll.u32 %s930_s13, 1 }
  0x11   : > { %v202_v6 = vpack.c.bf16 %v187_v5, %v186_v4  ;;  %v194_v7 = vld [vmem:[%s849_s24 + $0x40] sm:$0xff]  ;;  %v195_v8 = vld [vmem:[%s849_s24 + $0x48] sm:$0xff]  ;;  %v189_v15 = vld [vmem:[%s849_s24 + $0x18] sm:$0xff]  ;;  %s913_s17 = scalar_lea.vmem %s926_s3, %s625_s14 }
  0x12   : > { %v206_v10 = vpack.c.bf16 %v195_v8, %v194_v7  ;;  %v190_v16 = vld [vmem:[%s849_s24 + $0x20] sm:$0xff]  ;;  %v196_v17 = vld [vmem:[%s849_s24 + $0x50] sm:$0xff]  ;;  %v197_v18 = vld [vmem:[%s849_s24 + $0x58] sm:$0xff]  ;;  %v203_v22 = vpack.c.bf16 %v189_v15, %v188_v14 }
  0x13   : > { %747 = vmatprep.mubr.bf16.mxu0 %v202_v6  ;;  %738 = vmatpush3.bf16.msra.mxu0 %v790_v3  ;;  %v191_v19 = vld [vmem:[%s849_s24 + $0x28] sm:$0xff]  ;;  %v198_v20 = vld [vmem:[%s849_s24 + $0x60] sm:$0xff]  ;;  %v207_v23 = vpack.c.bf16 %v197_v18, %v196_v17  ;;  %v192_v26 = vld [vmem:[%s849_s24 + $0x30] sm:$0xff] }
  0x14   : > { %755 = vmatprep.mubr.bf16.mxu1 %v206_v10  ;;  %774 = vmatpush3.bf16.msra.mxu1 %v790_v3  ;;  %v199_v21 = vld [vmem:[%s849_s24 + $0x68] sm:$0xff]  ;;  %v204_v24 = vpack.c.bf16 %v191_v19, %v190_v16  ;;  %v193_v27 = vld [vmem:[%s849_s24 + $0x38] sm:$0xff]  ;;  %v200_v28 = vld [vmem:[%s849_s24 + $0x70] sm:$0xff] }
  0x15   : > { %739 = vmatprep.subr.bf16.mxu0 %v791_v9  ;;  %767 = vmatprep.subr.bf16.mxu1 %v791_v9  ;;  %v208_v25 = vpack.c.bf16 %v199_v21, %v198_v20  ;;  %v201_v29 = vld [vmem:[%s849_s24 + $0x78] sm:$0xff]  ;;  %v205_v30 = vpack.c.bf16 %v193_v27, %v192_v26 }
  0x16   : > { %v209_v31 = vpack.c.bf16 %v201_v29, %v200_v28 }
  0x17   : > { %740 = vmatpush3.bf16.msra.mxu0 %v791_v9 }
  0x18   : > { %775 = vmatpush3.bf16.msra.mxu1 %v791_v9  ;;  %741 = vmatprep.subr.bf16.mxu0 %v792_v11 }
  0x19   : > { %768 = vmatprep.subr.bf16.mxu1 %v792_v11 }
  0x1b   : > { %742 = vmatpush3.bf16.msra.mxu0 %v792_v11 }
  0x1c   : > { %776 = vmatpush3.bf16.msra.mxu1 %v792_v11  ;;  %743 = vmatprep.subr.bf16.mxu0 %v793_v12 }
  0x1d   : > { %769 = vmatprep.subr.bf16.mxu1 %v793_v12 }
  0x1f   : > { %744 = vmatpush3.bf16.msra.mxu0 %v793_v12 }
  0x20   : > { %777 = vmatpush3.bf16.msra.mxu1 %v793_v12  ;;  %745 = vmatprep.subr.bf16.mxu0 %v794_v13 }
  0x21   : > { %770 = vmatprep.subr.bf16.mxu1 %v794_v13 }
  0x23   : > { %746 = vmatpush3.bf16.msra.mxu0 %v794_v13 }
  0x24   : > { %778 = vmatpush3.bf16.msra.mxu1 %v794_v13 }
  0x26   : > { %748 = vmatmul.mubr.bf16.vlgmr.msra.gmra.mrb[0].mxu0 %v203_v22 }
  0x27   : > { %756 = vmatmul.mubr.bf16.vlgmr.msra.gmra.mrb[0].mxu1 %v207_v23  ;;  %751 = vmatprep.mubr.bf16.mxu0 %v204_v24 }
  0x28   : > { %759 = vmatprep.mubr.bf16.mxu1 %v208_v25 }
  0x2e   : > { %752 = vmatmul.mubr.bf16.gmra.mrb[4].mxu0 %v205_v30 }
  0x2f   : > { %760 = vmatmul.mubr.bf16.gmra.mrb[4].mxu1 %v209_v31 }
  0xf9   : > { %v749_v32 = vpop.f32.mrb[0].mxu0 }
  0xfa   : > { %v883_v33 = vpop.f32.mrb[0].mxu1  ;;  %v308_v34 = vpop.f32.mrb[1].mxu0 }
  0xfb   : > { %v885_v35 = vpop.f32.mrb[1].mxu1  ;;  %v750_v36 = vpop.f32.mrb[2].mxu0 }
  0xfc   : > { %v892_v37 = vpop.f32.mrb[2].mxu1  ;;  %v676_v38 = vpack.c.bf16 %v750_v36, %v749_v32  ;;  %v311_v39 = vpop.f32.mrb[3].mxu0 }
  0xfd   : > { %v696_v40 = vpack.c.bf16 %v892_v37, %v883_v33  ;;  %v343_v41 = vpop.f32.mrb[3].mxu1  ;;  %v671_v42 = vpack.c.bf16 %v311_v39, %v308_v34  ;;  %v451_v43 = vadd.f32 %v311_v39, %v308_v34 }
  0xfe   : > { %v691_v44 = vpack.c.bf16 %v343_v41, %v885_v35  ;;  %708 = vst [vmem:[%s890_s11 + $0x8] sm:$0xff] %v676_v38  }
  0xff   : > { %712 = vst [vmem:[%s890_s11 + $0x28] sm:$0xff] %v696_v40   ;;  %672 = vst [vmem:[%s890_s11] sm:$0xff] %v671_v42   ;;  %v452_v45 = vadd.f32 %v749_v32, %v451_v43 }
 0x100   : > { %711 = vst [vmem:[%s890_s11 + $0x20] sm:$0xff] %v691_v44  }
 0x101   : > { %v753_v46 = vpop.f32.mrb[4].mxu0  ;;  %v453_v47 = vadd.f32 %v750_v36, %v452_v45 }
 0x102   : > { %v761_v48 = vpop.f32.mrb[4].mxu1  ;;  %v324_v49 = vpop.f32.mrb[5].mxu0 }
 0x103   : > { %v356_v50 = vpop.f32.mrb[5].mxu1  ;;  %v454_v51 = vadd.f32 %v453_v47, %v324_v49  ;;  %v754_v52 = vpop.f32.mrb[6].mxu0 }
 0x104   : > { %v762_v53 = vpop.f32.mrb[6].mxu1  ;;  %v686_v54 = vpack.c.bf16 %v754_v52, %v753_v46  ;;  %v327_v55 = vpop.f32.mrb[7].mxu0 }
 0x105   : > { %v706_v56 = vpack.c.bf16 %v762_v53, %v761_v48  ;;  %v359_v57 = vpop.f32.mrb[7].mxu1  ;;  %v681_v58 = vpack.c.bf16 %v327_v55, %v324_v49  ;;  %v455_v59 = vadd.f32 %v454_v51, %v327_v55 }
 0x106   : > { %v701_v60 = vpack.c.bf16 %v359_v57, %v356_v50  ;;  %710 = vst [vmem:[%s890_s11 + $0x18] sm:$0xff] %v686_v54  }
 0x107   : > { %714 = vst [vmem:[%s890_s11 + $0x38] sm:$0xff] %v706_v56   ;;  %709 = vst [vmem:[%s890_s11 + $0x10] sm:$0xff] %v681_v58   ;;  %v456_v61 = vadd.f32 %v753_v46, %v455_v59 }
 0x108   : > { %713 = vst [vmem:[%s890_s11 + $0x30] sm:$0xff] %v701_v60  }
 0x109   : > { %v457_v62 = vadd.f32 %v754_v52, %v456_v61 }
 0x10b   : > { %v458_v63 = vadd.f32 %v457_v62, %v885_v35 }
 0x10d   : > { %v459_v0 = vadd.f32 %v458_v63, %v343_v41 }
 0x10f   : > { %v460_v1 = vadd.f32 %v883_v33, %v459_v0 }
 0x111   : > { %v461_v2 = vadd.f32 %v892_v37, %v460_v1 }
 0x113   : > { %v462_v3 = vadd.f32 %v461_v2, %v356_v50 }
 0x115   : > { %v463_v4 = vadd.f32 %v462_v3, %v359_v57 }
 0x117   : > { %v464_v5 = vadd.f32 %v761_v48, %v463_v4 }
 0x119   : > { %v465_v6 = vadd.f32 %v762_v53, %v464_v5 }
 0x11b   : > { %v466_v7 = vrot.slane %v465_v6, 4 }
 0x11d   : > { %v467_v8 = vadd.f32 %v466_v7, %v465_v6 }
 0x11f   : > { %v468_v9 = vrot.slane %v467_v8, 2 }
 0x121   : > { %v469_v10 = vadd.f32 %v468_v9, %v467_v8 }
 0x123   : > { %v470_v11 = vrot.slane %v469_v10, 1 }
 0x125   : > { %v471_v12 = vadd.f32 %v470_v11, %v469_v10 }
 0x127   : > { %v473_v13 = vmul.f32 0.0078125, %v471_v12  ;;  %490 = vst [vmem:[%s913_s17] sm:$0x1] %v471_v12 }
 0x129   : > { %v474_v14 = vsub.f32 %v308_v34, %v473_v13  ;;  %v475_v15 = vsub.f32 %v311_v39, %v473_v13  ;;  %v476_v16 = vsub.f32 %v749_v32, %v473_v13  ;;  %v477_v17 = vsub.f32 %v750_v36, %v473_v13 }
 0x12a   : > { %v478_v18 = vsub.f32 %v324_v49, %v473_v13  ;;  %v479_v19 = vsub.f32 %v327_v55, %v473_v13  ;;  %v480_v20 = vsub.f32 %v753_v46, %v473_v13  ;;  %v481_v21 = vsub.f32 %v754_v52, %v473_v13 }
 0x12b   : > { %v482_v22 = vsub.f32 %v885_v35, %v473_v13  ;;  %v483_v23 = vsub.f32 %v343_v41, %v473_v13  ;;  %v484_v24 = vsub.f32 %v883_v33, %v473_v13  ;;  %v485_v25 = vsub.f32 %v892_v37, %v473_v13 }
 0x12c   : > { %v486_v26 = vsub.f32 %v356_v50, %v473_v13  ;;  %v487_v27 = vsub.f32 %v359_v57, %v473_v13  ;;  %v488_v28 = vsub.f32 %v761_v48, %v473_v13  ;;  %v489_v29 = vsub.f32 %v762_v53, %v473_v13 }
 0x12d   : > { %v491_v30 = vmul.f32 %v474_v14, %v474_v14  ;;  %v492_v31 = vmul.f32 %v475_v15, %v475_v15  ;;  %v493_v34 = vmul.f32 %v476_v16, %v476_v16  ;;  %v494_v36 = vmul.f32 %v477_v17, %v477_v17 }
 0x12e   : > { %v495_v39 = vmul.f32 %v478_v18, %v478_v18  ;;  %v496_v42 = vmul.f32 %v479_v19, %v479_v19  ;;  %v497_v35 = vmul.f32 %v480_v20, %v480_v20  ;;  %v498_v44 = vmul.f32 %v481_v21, %v481_v21 }
 0x12f   : > { %v507_v32 = vadd.f32 %v492_v31, %v491_v30  ;;  %v499_v45 = vmul.f32 %v482_v22, %v482_v22  ;;  %v500_v46 = vmul.f32 %v483_v23, %v483_v23  ;;  %v501_v48 = vmul.f32 %v484_v24, %v484_v24 }
 0x130   : > { %v502_v50 = vmul.f32 %v485_v25, %v485_v25  ;;  %v503_v52 = vmul.f32 %v486_v26, %v486_v26  ;;  %v504_v54 = vmul.f32 %v487_v27, %v487_v27  ;;  %v505_v56 = vmul.f32 %v488_v28, %v488_v28 }
 0x131   : > { %v508_v38 = vadd.f32 %v507_v32, %v493_v34  ;;  %v506_v58 = vmul.f32 %v489_v29, %v489_v29 }
 0x133   : > { %v509_v40 = vadd.f32 %v508_v38, %v494_v36 }
 0x135   : > { %v510_v43 = vadd.f32 %v509_v40, %v495_v39 }
 0x137   : > { %v511_v41 = vadd.f32 %v510_v43, %v496_v42 }
 0x139   : > { %v512_v33 = vadd.f32 %v511_v41, %v497_v35 }
 0x13b   : > { %v513_v37 = vadd.f32 %v512_v33, %v498_v44 }
 0x13d   : > { %v514_v47 = vadd.f32 %v513_v37, %v499_v45 }
 0x13f   : > { %v515_v49 = vadd.f32 %v514_v47, %v500_v46 }
 0x141   : > { %v516_v51 = vadd.f32 %v515_v49, %v501_v48 }
 0x143   : > { %v517_v53 = vadd.f32 %v516_v51, %v502_v50 }
 0x145   : > { %v518_v55 = vadd.f32 %v517_v53, %v503_v52 }
 0x147   : > { %v519_v57 = vadd.f32 %v518_v55, %v504_v54 }
 0x149   : > { %v520_v59 = vadd.f32 %v519_v57, %v505_v56 }
 0x14b   : > { %v521_v60 = vadd.f32 %v520_v59, %v506_v58 }
 0x14d   : > { %v522_v61 = vrot.slane %v521_v60, 4 }
 0x14f   : > { %v523_v62 = vadd.f32 %v522_v61, %v521_v60 }
 0x151   : > { %v524_v63 = vrot.slane %v523_v62, 2 }
 0x153   : > { %v525_v0 = vadd.f32 %v524_v63, %v523_v62 }
 0x155   : > { %v526_v1 = vrot.slane %v525_v0, 1 }
 0x157   : > { %v527_v2 = vadd.f32 %v526_v1, %v525_v0 }
 0x159   : > { %528 = vst [vmem:[%s913_s17 + $0x1] sm:$0x1] %v527_v2 }
 0x15a PF: > { %s14_s12 = sadd.s32 1, %s801_s12  }
 0x15b   : > { %p11_p5 = scmp.ge.s32.totalorder %s14_s12, 6  }
 0x15d   :  { %13 = sbr.rel (!%p11_p5) target bundleno = 1 (0x1), region = 70 }

// kernel: bottleneck_forward.7
= control target key start
LH: loop header
LB: loop body
LE: loop exit
PB: predicated region body
PF: predicated region fallthrough
CT: control target
= control target key end

     0   :  { %s528_s15 = smov 0   ;;  %s598_s0 = inlined_call_operand.vmem [shape: bf16[512,128], index: 0, kind: input, shape index: {}]   ;;  %s599_s1 = inlined_call_operand.vmem [shape: f32[1,128], index: 1, kind: input, shape index: {}]   ;;  %s600_s2 = inlined_call_operand.vmem [shape: f32[1,128], index: 2, kind: input, shape index: {}]   ;;  %s601_s3 = inlined_call_operand.vmem [shape: f32[512,128], index: 3, kind: input, shape index: {}, may-alias: {3,4}]   ;;  %s602_s4 = inlined_call_operand.vmem [shape: f32[512,128], index: 4, kind: output, shape index: {}, may-alias: {3,4}]  }
   0x1 LB: > { %s433_s16 = sadd.s32 4294967295, %s501_s15   ;;  %p437_p0 = scmp.ge.s32.totalorder %s501_s15, 1  ;;  %s501_s15 = sphi %s528_s15, %s14_s15  }
   0x2   : > { %p174_p1 = scmp.lt.s32.totalorder %s501_s15, 5 }
   0x4   : > { %p175_p2 = pnand %p437_p0, %p174_p1 }
   0x5   : > { %s438_s17 = sshll.u32 (!%p175_p2), %s433_s16, 4  ;;  %v444_v16 = vld [vmem:[%s599_s1] ss:$0 sm:$0xff] (!%p175_p2) }
   0x6   : > { %178 = sbr.rel (%p175_p2) target bundleno = 43 (0x2b), region = 36  ;;  %p206_p3 = scmp.lt.s32.totalorder (!%p175_p2), %s438_s17, 63  ;;  %v445_v33 = vld [vmem:[%s600_s2] ss:$0 sm:$0xff] (!%p175_p2) }
   0xd   : > { %s604_s17 = smov (!%p206_p3, %s438_s17), 63 }
   0xe   : > { %s439_s18 = sshll.u32 %s604_s17, 2  ;;  %s441_s22 = sshll.u32 %s604_s17, 3 }
   0xf   : > { %s209_s21 = scalar_lea.vmem %s598_s0, %s439_s18  ;;  %s551_s27 = scalar_lea.vmem %s601_s3, %s441_s22 }
  0x10   : > { %v449_v0 = vld [vmem:[%s209_s21] sm:$0xff]   ;;  %v480_v1 = vld [vmem:[%s209_s21 + $0x8] sm:$0xff]   ;;  %v481_v2 = vld [vmem:[%s209_s21 + $0x10] sm:$0xff]   ;;  %s577_s6 = scalar_lea.vmem %s602_s4, %s441_s22 }
  0x11   : > { %v450_v3 = vunpack.c.l.bf16 %v449_v0  ;;  %v451_v4 = vunpack.c.h.bf16 %v449_v0  ;;  %v454_v5 = vunpack.c.l.bf16 %v480_v1  ;;  %v455_v6 = vunpack.c.h.bf16 %v480_v1  ;;  %v482_v7 = vld [vmem:[%s209_s21 + $0x18] sm:$0xff]   ;;  %v483_v8 = vld [vmem:[%s209_s21 + $0x20] sm:$0xff]   ;;  %v484_v9 = vld [vmem:[%s209_s21 + $0x28] sm:$0xff]  }
  0x12   : > { %v458_v10 = vunpack.c.l.bf16 %v481_v2  ;;  %v459_v11 = vunpack.c.h.bf16 %v481_v2  ;;  %v462_v12 = vunpack.c.l.bf16 %v482_v7  ;;  %v463_v13 = vunpack.c.h.bf16 %v482_v7  ;;  %v485_v14 = vld [vmem:[%s209_s21 + $0x30] sm:$0xff]   ;;  %v486_v15 = vld [vmem:[%s209_s21 + $0x38] sm:$0xff]   ;;  %v301_v42 = vld [vmem:[%s551_s27] sm:$0xff] }
  0x13   : > { %v466_v17 = vunpack.c.l.bf16 %v483_v8  ;;  %v467_v18 = vunpack.c.h.bf16 %v483_v8  ;;  %v470_v19 = vunpack.c.l.bf16 %v484_v9  ;;  %v471_v20 = vunpack.c.h.bf16 %v484_v9  ;;  %v302_v47 = vld [vmem:[%s551_s27 + $0x8] sm:$0xff]  ;;  %v303_v48 = vld [vmem:[%s551_s27 + $0x10] sm:$0xff]  ;;  %v304_v49 = vld [vmem:[%s551_s27 + $0x18] sm:$0xff] }
  0x14   : > { %v474_v21 = vunpack.c.l.bf16 %v485_v14  ;;  %v475_v22 = vunpack.c.h.bf16 %v485_v14  ;;  %v478_v23 = vunpack.c.l.bf16 %v486_v15  ;;  %v479_v24 = vunpack.c.h.bf16 %v486_v15  ;;  %v305_v54 = vld [vmem:[%s551_s27 + $0x20] sm:$0xff]  ;;  %v306_v55 = vld [vmem:[%s551_s27 + $0x28] sm:$0xff]  ;;  %v307_v56 = vld [vmem:[%s551_s27 + $0x30] sm:$0xff] }
  0x15   : > { %v262_v25 = vmul.f32 %v450_v3, %v444_v16  ;;  %v263_v26 = vmul.f32 %v451_v4, %v444_v16  ;;  %v264_v27 = vmul.f32 %v454_v5, %v444_v16  ;;  %v265_v28 = vmul.f32 %v455_v6, %v444_v16  ;;  %v308_v61 = vld [vmem:[%s551_s27 + $0x38] sm:$0xff]  ;;  %v309_v62 = vld [vmem:[%s551_s27 + $0x40] sm:$0xff]  ;;  %v310_v63 = vld [vmem:[%s551_s27 + $0x48] sm:$0xff] }
  0x16   : > { %v266_v29 = vmul.f32 %v458_v10, %v444_v16  ;;  %v267_v30 = vmul.f32 %v459_v11, %v444_v16  ;;  %v268_v31 = vmul.f32 %v462_v12, %v444_v16  ;;  %v269_v32 = vmul.f32 %v463_v13, %v444_v16  ;;  %v311_v4 = vld [vmem:[%s551_s27 + $0x50] sm:$0xff]  ;;  %v312_v5 = vld [vmem:[%s551_s27 + $0x58] sm:$0xff]  ;;  %v313_v6 = vld [vmem:[%s551_s27 + $0x60] sm:$0xff] }
  0x17   : > { %v270_v34 = vmul.f32 %v466_v17, %v444_v16  ;;  %v271_v35 = vmul.f32 %v467_v18, %v444_v16  ;;  %v272_v36 = vmul.f32 %v470_v19, %v444_v16  ;;  %v273_v37 = vmul.f32 %v471_v20, %v444_v16  ;;  %v314_v7 = vld [vmem:[%s551_s27 + $0x68] sm:$0xff]  ;;  %v315_v8 = vld [vmem:[%s551_s27 + $0x70] sm:$0xff]  ;;  %v316_v9 = vld [vmem:[%s551_s27 + $0x78] sm:$0xff] }
  0x18   : > { %v274_v38 = vmul.f32 %v474_v21, %v444_v16  ;;  %v275_v39 = vmul.f32 %v475_v22, %v444_v16  ;;  %v276_v40 = vmul.f32 %v478_v23, %v444_v16  ;;  %v277_v41 = vmul.f32 %v479_v24, %v444_v16 }
  0x19   : > { %v285_v43 = vadd.f32 %v445_v33, %v262_v25  ;;  %v286_v44 = vadd.f32 %v445_v33, %v263_v26  ;;  %v287_v45 = vadd.f32 %v445_v33, %v264_v27  ;;  %v288_v46 = vadd.f32 %v445_v33, %v265_v28 }
  0x1a   : > { %v289_v50 = vadd.f32 %v445_v33, %v266_v29  ;;  %v290_v51 = vadd.f32 %v445_v33, %v267_v30  ;;  %v291_v52 = vadd.f32 %v445_v33, %v268_v31  ;;  %v292_v53 = vadd.f32 %v445_v33, %v269_v32 }
  0x1b   : > { %v293_v57 = vadd.f32 %v445_v33, %v270_v34  ;;  %v294_v58 = vadd.f32 %v445_v33, %v271_v35  ;;  %v295_v59 = vadd.f32 %v445_v33, %v272_v36  ;;  %v296_v60 = vadd.f32 %v445_v33, %v273_v37 }
  0x1c   : > { %v297_v0 = vadd.f32 %v445_v33, %v274_v38  ;;  %v298_v1 = vadd.f32 %v445_v33, %v275_v39  ;;  %v299_v2 = vadd.f32 %v445_v33, %v276_v40  ;;  %v300_v3 = vadd.f32 %v445_v33, %v277_v41 }
  0x1d   : > { %v317_v10 = vadd.f32 %v301_v42, %v285_v43  ;;  %v318_v11 = vadd.f32 %v302_v47, %v286_v44  ;;  %v319_v12 = vadd.f32 %v303_v48, %v287_v45  ;;  %v320_v13 = vadd.f32 %v304_v49, %v288_v46 }
  0x1e   : > { %v321_v14 = vadd.f32 %v305_v54, %v289_v50  ;;  %v322_v15 = vadd.f32 %v306_v55, %v290_v51  ;;  %v323_v16 = vadd.f32 %v307_v56, %v291_v52  ;;  %v324_v17 = vadd.f32 %v308_v61, %v292_v53 }
  0x1f   : > { %v325_v18 = vadd.f32 %v309_v62, %v293_v57  ;;  %v326_v19 = vadd.f32 %v310_v63, %v294_v58  ;;  %v327_v20 = vadd.f32 %v311_v4, %v295_v59  ;;  %v328_v21 = vadd.f32 %v312_v5, %v296_v60 }
  0x20   : > { %v329_v22 = vadd.f32 %v313_v6, %v297_v0  ;;  %v330_v23 = vadd.f32 %v314_v7, %v298_v1  ;;  %v331_v24 = vadd.f32 %v315_v8, %v299_v2  ;;  %v332_v25 = vadd.f32 %v316_v9, %v300_v3 }
  0x21   : > { %v333_v26 = vmax.f32 %v317_v10, 0.0  ;;  %v334_v27 = vmax.f32 %v318_v11, 0.0  ;;  %v335_v28 = vmax.f32 %v319_v12, 0.0  ;;  %v336_v29 = vmax.f32 %v320_v13, 0.0 }
  0x22   : > { %v337_v30 = vmax.f32 %v321_v14, 0.0  ;;  %v338_v31 = vmax.f32 %v322_v15, 0.0  ;;  %v339_v32 = vmax.f32 %v323_v16, 0.0  ;;  %v340_v33 = vmax.f32 %v324_v17, 0.0 }
  0x23   : > { %v341_v34 = vmax.f32 %v325_v18, 0.0  ;;  %v342_v35 = vmax.f32 %v326_v19, 0.0  ;;  %v343_v36 = vmax.f32 %v327_v20, 0.0  ;;  %v344_v37 = vmax.f32 %v328_v21, 0.0  ;;  %349 = vst [vmem:[%s577_s6] sm:$0xff] %v333_v26  ;;  %350 = vst [vmem:[%s577_s6 + $0x8] sm:$0xff] %v334_v27 }
  0x24   : > { %351 = vst [vmem:[%s577_s6 + $0x10] sm:$0xff] %v335_v28  ;;  %352 = vst [vmem:[%s577_s6 + $0x18] sm:$0xff] %v336_v29  ;;  %v345_v38 = vmax.f32 %v329_v22, 0.0  ;;  %v346_v39 = vmax.f32 %v330_v23, 0.0  ;;  %v347_v40 = vmax.f32 %v331_v24, 0.0  ;;  %v348_v41 = vmax.f32 %v332_v25, 0.0 }
  0x25   : > { %353 = vst [vmem:[%s577_s6 + $0x20] sm:$0xff] %v337_v30  ;;  %354 = vst [vmem:[%s577_s6 + $0x28] sm:$0xff] %v338_v31 }
  0x26   : > { %355 = vst [vmem:[%s577_s6 + $0x30] sm:$0xff] %v339_v32  ;;  %356 = vst [vmem:[%s577_s6 + $0x38] sm:$0xff] %v340_v33 }
  0x27   : > { %357 = vst [vmem:[%s577_s6 + $0x40] sm:$0xff] %v341_v34  ;;  %358 = vst [vmem:[%s577_s6 + $0x48] sm:$0xff] %v342_v35 }
  0x28   : > { %359 = vst [vmem:[%s577_s6 + $0x50] sm:$0xff] %v343_v36  ;;  %360 = vst [vmem:[%s577_s6 + $0x58] sm:$0xff] %v344_v37 }
  0x29   : > { %361 = vst [vmem:[%s577_s6 + $0x60] sm:$0xff] %v345_v38  ;;  %362 = vst [vmem:[%s577_s6 + $0x68] sm:$0xff] %v346_v39 }
  0x2a   : > { %363 = vst [vmem:[%s577_s6 + $0x70] sm:$0xff] %v347_v40  ;;  %364 = vst [vmem:[%s577_s6 + $0x78] sm:$0xff] %v348_v41 }
  0x2b PF: > { %s14_s15 = sadd.s32 1, %s501_s15  }
  0x2c   : > { %p11_p4 = scmp.ge.s32.totalorder %s14_s15, 6  }
  0x2e   :  { %13 = sbr.rel (!%p11_p4) target bundleno = 1 (0x1), region = 69 }

// kernel: bottleneck_forward.6
= control target key start
LH: loop header
LB: loop body
LE: loop exit
PB: predicated region body
PF: predicated region fallthrough
CT: control target
= control target key end

     0   :  { %s1006_s18 = smov 0   ;;  %s1143_s0 = inlined_call_operand.vmem [shape: bf16[512,128], index: 0, kind: input, shape index: {}]   ;;  %s1144_s1 = inlined_call_operand.vmem [shape: f32[1,128], index: 1, kind: input, shape index: {}]   ;;  %s1145_s2 = inlined_call_operand.vmem [shape: f32[1,128], index: 2, kind: input, shape index: {}]   ;;  %s1146_s3 = inlined_call_operand.vmem [shape: bf16[128,128], index: 3, kind: input, shape index: {}]   ;;  %s1147_s4 = inlined_call_operand.vmem [shape: bf16[512,128], index: 4, kind: output, shape index: {0}]   ;;  %s1148_s5 = inlined_call_operand.vmem [shape: f32[4,2,128], index: 5, kind: output, shape index: {1}]  }
   0x1 LB: > { %s1012_s19 = sadd.s32 4294967295, %s974_s18   ;;  %p752_p0 = scmp.ge.s32.totalorder %s974_s18, 1  ;;  %s974_s18 = sphi %s1006_s18, %s16_s18  }
   0x2   : > { %p191_p1 = scmp.lt.s32.totalorder %s974_s18, 5 }
   0x4   : > { %p192_p2 = pnand %p752_p0, %p191_p1 }
   0x5   : > { %v960_v0 = vld [vmem:[%s1146_s3] sm:$0xff] (!%p192_p2)   ;;  %s753_s22 = sshll.u32 (!%p192_p2), %s1012_s19, 4  ;;  %v961_v1 = vld [vmem:[%s1146_s3 + $0x8] sm:$0xff] (!%p192_p2)   ;;  %v962_v2 = vld [vmem:[%s1146_s3 + $0x10] sm:$0xff] (!%p192_p2)   ;;  %p235_p4 = scmp.lt.s32.totalorder (!%p192_p2), %s1012_s19, 3 }
   0x6   : > { %195 = sbr.rel (%p192_p2) target bundleno = 346 (0x15a), region = 36  ;;  %p224_p3 = scmp.lt.s32.totalorder (!%p192_p2), %s753_s22, 63  ;;  %904 = vmatprep.subr.bf16.mxu0 (!%p192_p2), %v960_v0  ;;  %936 = vmatprep.subr.bf16.mxu1 (!%p192_p2), %v960_v0  ;;  %v963_v3 = vld [vmem:[%s1146_s3 + $0x18] sm:$0xff] (!%p192_p2)   ;;  %v1043_v5 = vld [vmem:[%s1144_s1] ss:$0 sm:$0xff] (!%p192_p2)  ;;  %v965_v28 = vld [vmem:[%s1146_s3 + $0x28] sm:$0xff] (!%p192_p2)  }
   0x7   : > { %905 = vmatpush3.bf16.msra.mxu0 (!%p192_p2), %v960_v0  ;;  %944 = vmatpush3.bf16.msra.mxu1 (!%p192_p2), %v960_v0  ;;  %v1050_v10 = vld [vmem:[%s1145_s2] ss:$0 sm:$0xff] (!%p192_p2)  ;;  %v966_v44 = vld [vmem:[%s1146_s3 + $0x30] sm:$0xff] (!%p192_p2)   ;;  %v967_v61 = vld [vmem:[%s1146_s3 + $0x38] sm:$0xff] (!%p192_p2)  }
   0x8   : > { %906 = vmatprep.subr.bf16.mxu0 (!%p192_p2), %v961_v1  ;;  %937 = vmatprep.subr.bf16.mxu1 (!%p192_p2), %v961_v1  ;;  %v964_v16 = vld [vmem:[%s1146_s3 + $0x20] sm:$0xff] (!%p192_p2)  }
   0xb   : > { %907 = vmatpush3.bf16.msra.mxu0 (!%p192_p2), %v961_v1  ;;  %945 = vmatpush3.bf16.msra.mxu1 (!%p192_p2), %v961_v1 }
   0xc   : > { %908 = vmatprep.subr.bf16.mxu0 (!%p192_p2), %v962_v2  ;;  %938 = vmatprep.subr.bf16.mxu1 (!%p192_p2), %v962_v2 }
   0xd   : > { %s1150_s22 = smov (!%p224_p3, %s753_s22), 63  ;;  %s1152_s19 = smov (!%p235_p4, %s1012_s19), 3 }
   0xe   : > { %s754_s27 = sshll.u32 %s1150_s22, 2  ;;  %s757_s22 = sshll.u32 %s1152_s19, 1 }
   0xf   : > { %s1034_s30 = scalar_lea.vmem %s1143_s0, %s754_s27  ;;  %909 = vmatpush3.bf16.msra.mxu0 %v962_v2  ;;  %946 = vmatpush3.bf16.msra.mxu1 %v962_v2  ;;  %s1110_s25 = scalar_lea.vmem %s1147_s4, %s754_s27 }
  0x10   : > { %v803_v4 = vld [vmem:[%s1034_s30] sm:$0xff]   ;;  %v874_v8 = vld [vmem:[%s1034_s30 + $0x8] sm:$0xff]   ;;  %v875_v9 = vld [vmem:[%s1034_s30 + $0x10] sm:$0xff]   ;;  %910 = vmatprep.subr.bf16.mxu0 %v963_v3  ;;  %939 = vmatprep.subr.bf16.mxu1 %v963_v3  ;;  %s1133_s28 = scalar_lea.vmem %s1148_s5, %s757_s22 }
  0x11   : > { %v804_v6 = vunpack.c.l.bf16 %v803_v4  ;;  %v805_v7 = vunpack.c.h.bf16 %v803_v4  ;;  %v808_v11 = vunpack.c.l.bf16 %v874_v8  ;;  %v809_v14 = vunpack.c.h.bf16 %v874_v8  ;;  %v877_v15 = vld [vmem:[%s1034_s30 + $0x20] sm:$0xff]   ;;  %v876_v22 = vld [vmem:[%s1034_s30 + $0x18] sm:$0xff]   ;;  %v878_v27 = vld [vmem:[%s1034_s30 + $0x28] sm:$0xff]  }
  0x12   : > { %v812_v17 = vunpack.c.l.bf16 %v875_v9  ;;  %v813_v21 = vunpack.c.h.bf16 %v875_v9  ;;  %v820_v23 = vunpack.c.l.bf16 %v877_v15  ;;  %v879_v30 = vld [vmem:[%s1034_s30 + $0x30] sm:$0xff]   ;;  %v816_v32 = vunpack.c.l.bf16 %v876_v22  ;;  %v880_v39 = vld [vmem:[%s1034_s30 + $0x38] sm:$0xff]  }
  0x13   : > { %v279_v12 = vmul.f32 %v804_v6, %v1043_v5  ;;  %v280_v13 = vmul.f32 %v805_v7, %v1043_v5  ;;  %v281_v20 = vmul.f32 %v808_v11, %v1043_v5  ;;  %911 = vmatpush3.bf16.msra.mxu0 %v963_v3  ;;  %947 = vmatpush3.bf16.msra.mxu1 %v963_v3  ;;  %v817_v33 = vunpack.c.h.bf16 %v876_v22 }
  0x14   : > { %v282_v26 = vmul.f32 %v809_v14, %v1043_v5  ;;  %912 = vmatprep.subr.bf16.mxu0 %v964_v16  ;;  %940 = vmatprep.subr.bf16.mxu1 %v964_v16  ;;  %v283_v29 = vmul.f32 %v812_v17, %v1043_v5  ;;  %v821_v34 = vunpack.c.h.bf16 %v877_v15  ;;  %v284_v36 = vmul.f32 %v813_v21, %v1043_v5 }
  0x15   : > { %v302_v18 = vadd.f32 %v1050_v10, %v279_v12  ;;  %v303_v19 = vadd.f32 %v1050_v10, %v280_v13  ;;  %v304_v35 = vadd.f32 %v1050_v10, %v281_v20  ;;  %v287_v37 = vmul.f32 %v820_v23, %v1043_v5 }
  0x16   : > { %v824_v38 = vunpack.c.l.bf16 %v878_v27  ;;  %v305_v40 = vadd.f32 %v1050_v10, %v282_v26  ;;  %v288_v41 = vmul.f32 %v821_v34, %v1043_v5  ;;  %v825_v42 = vunpack.c.h.bf16 %v878_v27 }
  0x17   : > { %v318_v24 = vmax.f32 %v302_v18, 0.0  ;;  %v319_v25 = vmax.f32 %v303_v19, 0.0  ;;  %913 = vmatpush3.bf16.msra.mxu0 %v964_v16  ;;  %948 = vmatpush3.bf16.msra.mxu1 %v964_v16  ;;  %v828_v43 = vunpack.c.l.bf16 %v879_v30  ;;  %v306_v45 = vadd.f32 %v1050_v10, %v283_v29 }
  0x18   : > { %914 = vmatprep.subr.bf16.mxu0 %v965_v28  ;;  %v310_v46 = vadd.f32 %v1050_v10, %v287_v37  ;;  %v289_v47 = vmul.f32 %v824_v38, %v1043_v5  ;;  %v829_v48 = vunpack.c.h.bf16 %v879_v30  ;;  %941 = vmatprep.subr.bf16.mxu1 %v965_v28  ;;  %v311_v49 = vadd.f32 %v1050_v10, %v288_v41 }
  0x19   : > { %v334_v31 = vpack.c.bf16 %v319_v25, %v318_v24  ;;  %v290_v50 = vmul.f32 %v825_v42, %v1043_v5  ;;  %v291_v51 = vmul.f32 %v828_v43, %v1043_v5  ;;  %v832_v52 = vunpack.c.l.bf16 %v880_v39 }
  0x1a   : > { %v326_v53 = vmax.f32 %v310_v46, 0.0  ;;  %v312_v54 = vadd.f32 %v1050_v10, %v289_v47  ;;  %v292_v55 = vmul.f32 %v829_v48, %v1043_v5  ;;  %v833_v56 = vunpack.c.h.bf16 %v880_v39 }
  0x1b   : > { %920 = vmatprep.mubr.bf16.mxu0 %v334_v31  ;;  %915 = vmatpush3.bf16.msra.mxu0 %v965_v28  ;;  %v307_v57 = vadd.f32 %v1050_v10, %v284_v36  ;;  %v327_v58 = vmax.f32 %v311_v49, 0.0  ;;  %v313_v59 = vadd.f32 %v1050_v10, %v290_v50  ;;  %v314_v60 = vadd.f32 %v1050_v10, %v291_v51 }
  0x1c   : > { %949 = vmatpush3.bf16.msra.mxu1 %v965_v28  ;;  %916 = vmatprep.subr.bf16.mxu0 %v966_v44  ;;  %v285_v62 = vmul.f32 %v816_v32, %v1043_v5  ;;  %v315_v63 = vadd.f32 %v1050_v10, %v292_v55  ;;  %v320_v0 = vmax.f32 %v304_v35, 0.0  ;;  %v321_v1 = vmax.f32 %v305_v40, 0.0 }
  0x1d   : > { %942 = vmatprep.subr.bf16.mxu1 %v966_v44  ;;  %v286_v2 = vmul.f32 %v817_v33, %v1043_v5  ;;  %v338_v3 = vpack.c.bf16 %v327_v58, %v326_v53  ;;  %v328_v4 = vmax.f32 %v312_v54, 0.0  ;;  %v329_v6 = vmax.f32 %v313_v59, 0.0 }
  0x1e   : > { %v293_v7 = vmul.f32 %v832_v52, %v1043_v5  ;;  %v294_v8 = vmul.f32 %v833_v56, %v1043_v5  ;;  %v322_v9 = vmax.f32 %v306_v45, 0.0  ;;  %v323_v11 = vmax.f32 %v307_v57, 0.0 }
  0x1f   : > { %917 = vmatpush3.bf16.msra.mxu0 %v966_v44  ;;  %v330_v12 = vmax.f32 %v314_v60, 0.0  ;;  %v331_v13 = vmax.f32 %v315_v63, 0.0  ;;  %v308_v14 = vadd.f32 %v1050_v10, %v285_v62  ;;  %v309_v15 = vadd.f32 %v1050_v10, %v286_v2  ;;  %928 = vmatprep.mubr.bf16.mxu1 %v338_v3 }
  0x20   : > { %950 = vmatpush3.bf16.msra.mxu1 %v966_v44  ;;  %918 = vmatprep.subr.bf16.mxu0 %v967_v61  ;;  %v335_v16 = vpack.c.bf16 %v321_v1, %v320_v0  ;;  %v339_v17 = vpack.c.bf16 %v329_v6, %v328_v4  ;;  %v316_v18 = vadd.f32 %v1050_v10, %v293_v7 }
  0x21   : > { %943 = vmatprep.subr.bf16.mxu1 %v967_v61  ;;  %v317_v19 = vadd.f32 %v1050_v10, %v294_v8  ;;  %v336_v5 = vpack.c.bf16 %v323_v11, %v322_v9  ;;  %v340_v20 = vpack.c.bf16 %v331_v13, %v330_v12  ;;  %v324_v21 = vmax.f32 %v308_v14, 0.0 }
  0x22   : > { %v325_v22 = vmax.f32 %v309_v15, 0.0  ;;  %v332_v23 = vmax.f32 %v316_v18, 0.0 }
  0x23   : > { %919 = vmatpush3.bf16.msra.mxu0 %v967_v61  ;;  %v333_v24 = vmax.f32 %v317_v19, 0.0 }
  0x24   : > { %951 = vmatpush3.bf16.msra.mxu1 %v967_v61  ;;  %v337_v25 = vpack.c.bf16 %v325_v22, %v324_v21 }
  0x25   : > { %v341_v26 = vpack.c.bf16 %v333_v24, %v332_v23 }
  0x26   : > { %921 = vmatmul.mubr.bf16.vlgmr.msra.gmra.mrb[0].mxu0 %v335_v16 }
  0x27   : > { %929 = vmatmul.mubr.bf16.vlgmr.msra.gmra.mrb[0].mxu1 %v339_v17  ;;  %924 = vmatprep.mubr.bf16.mxu0 %v336_v5 }
  0x28   : > { %932 = vmatprep.mubr.bf16.mxu1 %v340_v20 }
  0x2e   : > { %925 = vmatmul.mubr.bf16.gmra.mrb[4].mxu0 %v337_v25 }
  0x2f   : > { %933 = vmatmul.mubr.bf16.gmra.mrb[4].mxu1 %v341_v26 }
  0xf9   : > { %v922_v27 = vpop.f32.mrb[0].mxu0 }
  0xfa   : > { %v1101_v28 = vpop.f32.mrb[0].mxu1  ;;  %v440_v10 = vpop.f32.mrb[1].mxu0 }
  0xfb   : > { %v1103_v29 = vpop.f32.mrb[1].mxu1  ;;  %v923_v30 = vpop.f32.mrb[2].mxu0 }
  0xfc   : > { %v1112_v31 = vpop.f32.mrb[2].mxu1  ;;  %v842_v32 = vpack.c.bf16 %v923_v30, %v922_v27  ;;  %v443_v33 = vpop.f32.mrb[3].mxu0 }
  0xfd   : > { %v862_v34 = vpack.c.bf16 %v1112_v31, %v1101_v28  ;;  %v475_v35 = vpop.f32.mrb[3].mxu1  ;;  %v837_v36 = vpack.c.bf16 %v443_v33, %v440_v10  ;;  %v583_v37 = vadd.f32 %v443_v33, %v440_v10 }
  0xfe   : > { %v857_v38 = vpack.c.bf16 %v475_v35, %v1103_v29  ;;  %881 = vst [vmem:[%s1110_s25 + $0x8] sm:$0xff] %v842_v32  }
  0xff   : > { %885 = vst [vmem:[%s1110_s25 + $0x28] sm:$0xff] %v862_v34   ;;  %838 = vst [vmem:[%s1110_s25] sm:$0xff] %v837_v36   ;;  %v584_v39 = vadd.f32 %v922_v27, %v583_v37 }
 0x100   : > { %884 = vst [vmem:[%s1110_s25 + $0x20] sm:$0xff] %v857_v38  }
 0x101   : > { %v926_v40 = vpop.f32.mrb[4].mxu0  ;;  %v585_v41 = vadd.f32 %v923_v30, %v584_v39 }
 0x102   : > { %v934_v42 = vpop.f32.mrb[4].mxu1  ;;  %v456_v43 = vpop.f32.mrb[5].mxu0 }
 0x103   : > { %v488_v44 = vpop.f32.mrb[5].mxu1  ;;  %v586_v45 = vadd.f32 %v585_v41, %v456_v43  ;;  %v927_v46 = vpop.f32.mrb[6].mxu0 }
 0x104   : > { %v935_v47 = vpop.f32.mrb[6].mxu1  ;;  %v852_v48 = vpack.c.bf16 %v927_v46, %v926_v40  ;;  %v459_v49 = vpop.f32.mrb[7].mxu0 }
 0x105   : > { %v872_v50 = vpack.c.bf16 %v935_v47, %v934_v42  ;;  %v491_v51 = vpop.f32.mrb[7].mxu1  ;;  %v847_v52 = vpack.c.bf16 %v459_v49, %v456_v43  ;;  %v587_v53 = vadd.f32 %v586_v45, %v459_v49 }
 0x106   : > { %v867_v54 = vpack.c.bf16 %v491_v51, %v488_v44  ;;  %883 = vst [vmem:[%s1110_s25 + $0x18] sm:$0xff] %v852_v48  }
 0x107   : > { %887 = vst [vmem:[%s1110_s25 + $0x38] sm:$0xff] %v872_v50   ;;  %882 = vst [vmem:[%s1110_s25 + $0x10] sm:$0xff] %v847_v52   ;;  %v588_v55 = vadd.f32 %v926_v40, %v587_v53 }
 0x108   : > { %886 = vst [vmem:[%s1110_s25 + $0x30] sm:$0xff] %v867_v54  }
 0x109   : > { %v589_v56 = vadd.f32 %v927_v46, %v588_v55 }
 0x10b   : > { %v590_v57 = vadd.f32 %v589_v56, %v1103_v29 }
 0x10d   : > { %v591_v58 = vadd.f32 %v590_v57, %v475_v35 }
 0x10f   : > { %v592_v59 = vadd.f32 %v1101_v28, %v591_v58 }
 0x111   : > { %v593_v60 = vadd.f32 %v1112_v31, %v592_v59 }
 0x113   : > { %v594_v61 = vadd.f32 %v593_v60, %v488_v44 }
 0x115   : > { %v595_v62 = vadd.f32 %v594_v61, %v491_v51 }
 0x117   : > { %v596_v63 = vadd.f32 %v934_v42, %v595_v62 }
 0x119   : > { %v597_v0 = vadd.f32 %v935_v47, %v596_v63 }
 0x11b   : > { %v598_v1 = vrot.slane %v597_v0, 4 }
 0x11d   : > { %v599_v2 = vadd.f32 %v598_v1, %v597_v0 }
 0x11f   : > { %v600_v3 = vrot.slane %v599_v2, 2 }
 0x121   : > { %v601_v4 = vadd.f32 %v600_v3, %v599_v2 }
 0x123   : > { %v602_v6 = vrot.slane %v601_v4, 1 }
 0x125   : > { %v603_v7 = vadd.f32 %v602_v6, %v601_v4 }
 0x127   : > { %v605_v8 = vmul.f32 0.0078125, %v603_v7  ;;  %622 = vst [vmem:[%s1133_s28] sm:$0x1] %v603_v7 }
 0x129   : > { %v606_v9 = vsub.f32 %v440_v10, %v605_v8  ;;  %v607_v11 = vsub.f32 %v443_v33, %v605_v8  ;;  %v608_v12 = vsub.f32 %v922_v27, %v605_v8  ;;  %v609_v13 = vsub.f32 %v923_v30, %v605_v8 }
 0x12a   : > { %v610_v14 = vsub.f32 %v456_v43, %v605_v8  ;;  %v611_v15 = vsub.f32 %v459_v49, %v605_v8  ;;  %v612_v16 = vsub.f32 %v926_v40, %v605_v8  ;;  %v613_v17 = vsub.f32 %v927_v46, %v605_v8 }
 0x12b   : > { %v614_v18 = vsub.f32 %v1103_v29, %v605_v8  ;;  %v615_v19 = vsub.f32 %v475_v35, %v605_v8  ;;  %v616_v5 = vsub.f32 %v1101_v28, %v605_v8  ;;  %v617_v20 = vsub.f32 %v1112_v31, %v605_v8 }
 0x12c   : > { %v618_v21 = vsub.f32 %v488_v44, %v605_v8  ;;  %v619_v22 = vsub.f32 %v491_v51, %v605_v8  ;;  %v620_v23 = vsub.f32 %v934_v42, %v605_v8  ;;  %v621_v24 = vsub.f32 %v935_v47, %v605_v8 }
 0x12d   : > { %v623_v25 = vmul.f32 %v606_v9, %v606_v9  ;;  %v624_v26 = vmul.f32 %v607_v11, %v607_v11  ;;  %v625_v10 = vmul.f32 %v608_v12, %v608_v12  ;;  %v626_v30 = vmul.f32 %v609_v13, %v609_v13 }
 0x12e   : > { %v627_v33 = vmul.f32 %v610_v14, %v610_v14  ;;  %v628_v36 = vmul.f32 %v611_v15, %v611_v15  ;;  %v629_v29 = vmul.f32 %v612_v16, %v612_v16  ;;  %v630_v38 = vmul.f32 %v613_v17, %v613_v17 }
 0x12f   : > { %v639_v27 = vadd.f32 %v624_v26, %v623_v25  ;;  %v631_v39 = vmul.f32 %v614_v18, %v614_v18  ;;  %v632_v40 = vmul.f32 %v615_v19, %v615_v19  ;;  %v633_v42 = vmul.f32 %v616_v5, %v616_v5 }
 0x130   : > { %v634_v44 = vmul.f32 %v617_v20, %v617_v20  ;;  %v635_v46 = vmul.f32 %v618_v21, %v618_v21  ;;  %v636_v48 = vmul.f32 %v619_v22, %v619_v22  ;;  %v637_v50 = vmul.f32 %v620_v23, %v620_v23 }
 0x131   : > { %v640_v32 = vadd.f32 %v639_v27, %v625_v10  ;;  %v638_v52 = vmul.f32 %v621_v24, %v621_v24 }
 0x133   : > { %v641_v34 = vadd.f32 %v640_v32, %v626_v30 }
 0x135   : > { %v642_v37 = vadd.f32 %v641_v34, %v627_v33 }
 0x137   : > { %v643_v35 = vadd.f32 %v642_v37, %v628_v36 }
 0x139   : > { %v644_v28 = vadd.f32 %v643_v35, %v629_v29 }
 0x13b   : > { %v645_v31 = vadd.f32 %v644_v28, %v630_v38 }
 0x13d   : > { %v646_v41 = vadd.f32 %v645_v31, %v631_v39 }
 0x13f   : > { %v647_v43 = vadd.f32 %v646_v41, %v632_v40 }
 0x141   : > { %v648_v45 = vadd.f32 %v647_v43, %v633_v42 }
 0x143   : > { %v649_v47 = vadd.f32 %v648_v45, %v634_v44 }
 0x145   : > { %v650_v49 = vadd.f32 %v649_v47, %v635_v46 }
 0x147   : > { %v651_v51 = vadd.f32 %v650_v49, %v636_v48 }
 0x149   : > { %v652_v53 = vadd.f32 %v651_v51, %v637_v50 }
 0x14b   : > { %v653_v54 = vadd.f32 %v652_v53, %v638_v52 }
 0x14d   : > { %v654_v55 = vrot.slane %v653_v54, 4 }
 0x14f   : > { %v655_v56 = vadd.f32 %v654_v55, %v653_v54 }
 0x151   : > { %v656_v57 = vrot.slane %v655_v56, 2 }
 0x153   : > { %v657_v58 = vadd.f32 %v656_v57, %v655_v56 }
 0x155   : > { %v658_v59 = vrot.slane %v657_v58, 1 }
 0x157   : > { %v659_v60 = vadd.f32 %v658_v59, %v657_v58 }
 0x159   : > { %660 = vst [vmem:[%s1133_s28 + $0x1] sm:$0x1] %v659_v60 }
 0x15a PF: > { %s16_s18 = sadd.s32 1, %s974_s18  }
 0x15b   : > { %p13_p5 = scmp.ge.s32.totalorder %s16_s18, 6  }
 0x15d   :  { %15 = sbr.rel (!%p13_p5) target bundleno = 1 (0x1), region = 78 }

// kernel: bottleneck_forward.5
= control target key start
LH: loop header
LB: loop body
LE: loop exit
PB: predicated region body
PF: predicated region fallthrough
CT: control target
= control target key end

     0   :  { %s5726_s18 = smov 0   ;;  %s7244_s0 = inlined_call_operand.vmem [shape: bf16[2,16,16,128], index: 0, kind: input, shape index: {}]   ;;  %s7245_s1 = inlined_call_operand.vmem [shape: bf16[3,384,128], index: 1, kind: input, shape index: {}]   ;;  %s7246_s2 = inlined_call_operand.vmem [shape: f32[1,128], index: 2, kind: input, shape index: {}]   ;;  %s7247_s3 = inlined_call_operand.vmem [shape: f32[1,128], index: 3, kind: input, shape index: {}]   ;;  %s7248_s4 = inlined_call_operand.vmem [shape: bf16[2,16,16,128], index: 4, kind: output, shape index: {0}]   ;;  %s7249_s5 = inlined_call_operand.vmem [shape: f32[2,2,128], index: 5, kind: output, shape index: {1}]  }
   0x1 LB: > { %s4454_s19 = sadd.s32 4294967295, %s5693_s18   ;;  %p4458_p0 = scmp.ge.s32.totalorder %s5693_s18, 1  ;;  %s5693_s18 = sphi %s5726_s18, %s16_s18  }
   0x2   : > { %p190_p1 = scmp.lt.s32.totalorder %s5693_s18, 3 }
   0x4   : > { %p191_p2 = pnand %p4458_p0, %p190_p1 }
   0x6   : > { %194 = sbr.rel (%p191_p2) target bundleno = 651 (0x28b), region = 36 }
   0xd   : > { %v5613_v0 = vld [vmem:[%s7245_s1 + $0x40] sm:$0xff]   ;;  %v5695_v3 = vmov 0.0   ;;  %v5616_v4 = vld [vmem:[%s7245_s1 + $0x48] sm:$0xff]   ;;  %v5619_v7 = vld [vmem:[%s7245_s1 + $0x50] sm:$0xff]   ;;  %p222_p3 = scmp.lt.s32.totalorder %s4454_s19, 1  ;;  %vm1786_vm0 = vcmask 1046528  }
   0xe   : > { %v5740_v1 = vld [vmem:[%s7245_s1 + $0x80] sm:$0xff]   ;;  %4876 = vmatprep.subr.bf16.mxu0 %v5613_v0  ;;  %419 = vst [vmem:[#allocation2 + $0x18] sm:$0x1] %v5695_v3  ;;  %411 = vst [vmem:[#allocation2] sm:$0xff] %v5695_v3  ;;  %v5794_v5 = vld [vmem:[%s7245_s1 + $0x88] sm:$0xff]   ;;  %vm3070_vm1 = vcmask 1045504  }
   0xf   : > { %v5615_v2 = vld [vmem:[%s7245_s1] sm:$0xff]   ;;  %412 = vst [vmem:[#allocation2 + $0x8] sm:$0xff] %v5695_v3  ;;  %413 = vst [vmem:[#allocation2 + $0x10] sm:$0x3] %v5695_v3  ;;  %5428 = vmatprep.subr.bf16.mxu1 %v5740_v1  ;;  %v5618_v6 = vld [vmem:[%s7245_s1 + $0x8] sm:$0xff]   ;;  %s7253_s19 = smov (!%p222_p3, %s4454_s19), 1 }
  0x10   : > { %415 = vst [vmem:[#allocation2 + $0x198] sm:$0xff] %v5695_v3  ;;  %417 = vst [vmem:[#allocation2 + $0x1a8] sm:$0x3] %v5695_v3  ;;  %4877 = vmatpush3.bf16.msra.mxu0 %v5615_v2  ;;  %5436 = vmatpush3.bf16.msra.mxu1 %v5740_v1  ;;  %v5806_v8 = vld [vmem:[%s7245_s1 + $0x90] sm:$0xff]   ;;  %v5622_v10 = vld [vmem:[%s7245_s1 + $0x58] sm:$0xff]   ;;  %s4668_s6 = sshll.u32 %s7253_s19, 7 }
  0x11   : > { %420 = vst [vmem:[#allocation2 + $0x30] sm:$0x1] %v5695_v3  ;;  %421 = vst [vmem:[#allocation2 + $0x48] sm:$0x1] %v5695_v3  ;;  %4878 = vmatprep.subr.bf16.mxu0 %v5616_v4  ;;  %5429 = vmatprep.subr.bf16.mxu1 %v5794_v5  ;;  %v5621_v9 = vld [vmem:[%s7245_s1 + $0x10] sm:$0xff]   ;;  %v5819_v11 = vld [vmem:[%s7245_s1 + $0x98] sm:$0xff]   ;;  %s5872_s15 = scalar_lea.vmem %s7244_s0, %s4668_s6  ;;  %s7018_s17 = scalar_lea.vmem %s7248_s4, %s4668_s6 }
  0x12   : > { %422 = vst [vmem:[#allocation2 + $0x60] sm:$0x1] %v5695_v3  ;;  %423 = vst [vmem:[#allocation2 + $0x78] sm:$0x1] %v5695_v3  ;;  %v5624_v12 = vld [vmem:[%s7245_s1 + $0x18] sm:$0xff]   ;;  %v5625_v13 = vld [vmem:[%s7245_s1 + $0x60] sm:$0xff]  }
  0x13   : > { %424 = vst [vmem:[#allocation2 + $0x90] sm:$0x1] %v5695_v3  ;;  %425 = vst [vmem:[#allocation2 + $0xa8] sm:$0x1] %v5695_v3  ;;  %v5834_v14 = vld [vmem:[%s7245_s1 + $0xa0] sm:$0xff]   ;;  %v5628_v16 = vld [vmem:[%s7245_s1 + $0x68] sm:$0xff]  }
  0x14   : > { %426 = vst [vmem:[#allocation2 + $0xc0] sm:$0x1] %v5695_v3  ;;  %427 = vst [vmem:[#allocation2 + $0xd8] sm:$0x1] %v5695_v3  ;;  %4879 = vmatpush3.bf16.msra.mxu0 %v5618_v6  ;;  %5437 = vmatpush3.bf16.msra.mxu1 %v5794_v5  ;;  %v5627_v15 = vld [vmem:[%s7245_s1 + $0x20] sm:$0xff]   ;;  %v5851_v17 = vld [vmem:[%s7245_s1 + $0xa8] sm:$0xff]  }
  0x15   : > { %428 = vst [vmem:[#allocation2 + $0xf0] sm:$0x1] %v5695_v3  ;;  %429 = vst [vmem:[#allocation2 + $0x108] sm:$0x1] %v5695_v3  ;;  %4880 = vmatprep.subr.bf16.mxu0 %v5619_v7  ;;  %5430 = vmatprep.subr.bf16.mxu1 %v5806_v8  ;;  %v5630_v18 = vld [vmem:[%s7245_s1 + $0x28] sm:$0xff]   ;;  %v5631_v19 = vld [vmem:[%s7245_s1 + $0x70] sm:$0xff]  }
  0x16   : > { %430 = vst [vmem:[#allocation2 + $0x120] sm:$0x1] %v5695_v3  ;;  %431 = vst [vmem:[#allocation2 + $0x138] sm:$0x1] %v5695_v3  ;;  %v5865_v20 = vld [vmem:[%s7245_s1 + $0xb0] sm:$0xff]   ;;  %v5634_v22 = vld [vmem:[%s7245_s1 + $0x78] sm:$0xff]  }
  0x17   : > { %432 = vst [vmem:[#allocation2 + $0x150] sm:$0x1] %v5695_v3  ;;  %433 = vst [vmem:[#allocation2 + $0x168] sm:$0x1] %v5695_v3  ;;  %v5633_v21 = vld [vmem:[%s7245_s1 + $0x30] sm:$0xff]   ;;  %v5884_v23 = vld [vmem:[%s7245_s1 + $0xb8] sm:$0xff]  }
  0x18   : > { %434 = vst [vmem:[#allocation2 + $0x180] sm:$0x1] %v5695_v3  ;;  %437 = vst [vmem:[#allocation2 + $0x29] sm:$0x1] %v5695_v3  ;;  %4881 = vmatpush3.bf16.msra.mxu0 %v5621_v9  ;;  %5438 = vmatpush3.bf16.msra.mxu1 %v5806_v8  ;;  %v4703_v24 = vld [vmem:[%s5872_s15] sm:$0xff]   ;;  %v4854_v28 = vld [vmem:[%s5872_s15 + $0x48] sm:$0xff]  }
  0x19   : > { %438 = vst [vmem:[#allocation2 + $0x41] sm:$0x1] %v5695_v3  ;;  %439 = vst [vmem:[#allocation2 + $0x59] sm:$0x1] %v5695_v3  ;;  %4882 = vmatprep.subr.bf16.mxu0 %v5622_v10  ;;  %5431 = vmatprep.subr.bf16.mxu1 %v5819_v11  ;;  %v5890_v25 = vld [vmem:[%s7246_s2] ss:$0 sm:$0xff]  ;;  %v4704_v26 = vunpack.c.l.bf16 %v4703_v24  ;;  %v4705_v27 = vunpack.c.h.bf16 %v4703_v24  ;;  %v4740_v32 = vunpack.c.l.bf16 %v4854_v28  ;;  %v4741_v33 = vunpack.c.h.bf16 %v4854_v28 }
  0x1a   : > { %440 = vst [vmem:[#allocation2 + $0x71] sm:$0x1] %v5695_v3  ;;  %441 = vst [vmem:[#allocation2 + $0x89] sm:$0x1] %v5695_v3  ;;  %v4855_v30 = vld [vmem:[%s5872_s15 + $0x50] sm:$0xff]   ;;  %v5636_v38 = vld [vmem:[%s7245_s1 + $0x38] sm:$0xff]  }
  0x1b   : > { %442 = vst [vmem:[#allocation2 + $0xa1] sm:$0x1] %v5695_v3  ;;  %443 = vst [vmem:[#allocation2 + $0xb9] sm:$0x1] %v5695_v3  ;;  %v5898_v31 = vld [vmem:[%s7247_s3] ss:$0 sm:$0xff]  ;;  %v4744_v34 = vunpack.c.l.bf16 %v4855_v30  ;;  %v308_v35 = vmul.f32 %v4704_v26, %v5890_v25  ;;  %v309_v36 = vmul.f32 %v4705_v27, %v5890_v25  ;;  %v4745_v37 = vunpack.c.h.bf16 %v4855_v30 }
  0x1c   : > { %444 = vst [vmem:[#allocation2 + $0xd1] sm:$0x1] %v5695_v3  ;;  %445 = vst [vmem:[#allocation2 + $0xe9] sm:$0x1] %v5695_v3  ;;  %4883 = vmatpush3.bf16.msra.mxu0 %v5624_v12  ;;  %5439 = vmatpush3.bf16.msra.mxu1 %v5819_v11  ;;  %v326_v39 = vmul.f32 %v4740_v32, %v5890_v25  ;;  %v327_v40 = vmul.f32 %v4741_v33, %v5890_v25  ;;  %v5637_v45 = vld [vmem:[%s7245_s1 + $0x100] sm:$0xff]   ;;  %v4846_v49 = vld [vmem:[%s5872_s15 + $0x8] sm:$0xff]  }
  0x1d   : > { %446 = vst [vmem:[#allocation2 + $0x101] sm:$0x1] %v5695_v3  ;;  %447 = vst [vmem:[#allocation2 + $0x119] sm:$0x1] %v5695_v3  ;;  %4884 = vmatprep.subr.bf16.mxu0 %v5625_v13  ;;  %5432 = vmatprep.subr.bf16.mxu1 %v5834_v14  ;;  %v328_v41 = vmul.f32 %v4744_v34, %v5890_v25  ;;  %v347_v42 = vadd.f32 %v5898_v31, %v308_v35  ;;  %v4856_v50 = vld [vmem:[%s5872_s15 + $0x58] sm:$0xff]   ;;  %v4857_v51 = vld [vmem:[%s5872_s15 + $0x60] sm:$0xff]   ;;  %v4708_v55 = vunpack.c.l.bf16 %v4846_v49 }
  0x1e   : > { %448 = vst [vmem:[#allocation2 + $0x131] sm:$0x1] %v5695_v3  ;;  %449 = vst [vmem:[#allocation2 + $0x149] sm:$0x1] %v5695_v3  ;;  %v348_v43 = vadd.f32 %v5898_v31, %v309_v36  ;;  %v329_v44 = vmul.f32 %v4745_v37, %v5890_v25  ;;  %v365_v46 = vadd.f32 %v5898_v31, %v326_v39  ;;  %v4709_v59 = vunpack.c.h.bf16 %v4846_v49  ;;  %v4847_v12 = vld [vmem:[%s5872_s15 + $0x10] sm:$0xff]   ;;  %v5638_v39 = vld [vmem:[%s7245_s1 + $0xc0] sm:$0xff]  }
  0x1f   : > { %450 = vst [vmem:[#allocation2 + $0x161] sm:$0x1] %v5695_v3  ;;  %451 = vst [vmem:[#allocation2 + $0x179] sm:$0x1] %v5695_v3  ;;  %v366_v47 = vadd.f32 %v5898_v31, %v327_v40  ;;  %v367_v48 = vadd.f32 %v5898_v31, %v328_v41  ;;  %v379_v52 = vmax.f32 %v347_v42, 0.0  ;;  %v310_v61 = vmul.f32 %v4708_v55, %v5890_v25  ;;  %v4859_v32 = vld [vmem:[%s5872_s15 + $0x70] sm:$0xff]  }
  0x20   : > { %452 = vst [vmem:[#allocation2 + $0x191] sm:$0x1] %v5695_v3  ;;  %418 = vst [vmem:[#allocation2] sm:$0x1] %v5695_v3  ;;  %4885 = vmatpush3.bf16.msra.mxu0 %v5627_v15  ;;  %5440 = vmatpush3.bf16.msra.mxu1 %v5834_v14  ;;  %v380_v53 = vmax.f32 %v348_v43, 0.0  ;;  %v368_v54 = vadd.f32 %v5898_v31, %v329_v44  ;;  %v397_v56 = vmax.f32 %v365_v46, 0.0  ;;  %v4748_v62 = vunpack.c.l.bf16 %v4856_v50 }
  0x21   : > { %435 = vst [vmem:[#allocation2 + $0x198] sm:$0x1] %v5695_v3  ;;  %436 = vst [vmem:[#allocation2 + $0x11] sm:$0x1] %v5695_v3  ;;  %4886 = vmatprep.subr.bf16.mxu0 %v5628_v16  ;;  %5433 = vmatprep.subr.bf16.mxu1 %v5851_v17  ;;  %v398_v57 = vmax.f32 %v366_v47, 0.0  ;;  %v399_v58 = vmax.f32 %v367_v48, 0.0  ;;  %v4749_v63 = vunpack.c.h.bf16 %v4856_v50  ;;  %v311_v0 = vmul.f32 %v4709_v59, %v5890_v25 }
  0x22   : > { %453 = vst [vmem:[#allocation2 + $0x1a9] sm:$0x1] %v5695_v3  ;;  %455 = vst [vmem:[#allocation2 + $0x19] sm:$0xff] %v379_v52  ;;  %v400_v60 = vmax.f32 %v368_v54, 0.0  ;;  %v4752_v2 = vunpack.c.l.bf16 %v4857_v51  ;;  %v4753_v4 = vunpack.c.h.bf16 %v4857_v51  ;;  %v349_v7 = vadd.f32 %v5898_v31, %v310_v61  ;;  %v5639_v48 = vld [vmem:[%s7245_s1 + $0x108] sm:$0xff]   ;;  %s4463_s6 = sshll.u32 %s7253_s19, 1 }
  0x23   : > { %456 = vst [vmem:[#allocation2 + $0x21] sm:$0xff] %v380_v53  ;;  %473 = vst [vmem:[#allocation2 + $0xf1] sm:$0xff] %v397_v56  ;;  %v330_v9 = vmul.f32 %v4748_v62, %v5890_v25  ;;  %v331_v10 = vmul.f32 %v4749_v63, %v5890_v25  ;;  %v350_v13 = vadd.f32 %v5898_v31, %v311_v0  ;;  %v4713_v26 = vunpack.c.h.bf16 %v4847_v12  ;;  %v4860_v62 = vld [vmem:[%s5872_s15 + $0x78] sm:$0xff]   ;;  %s7182_s22 = scalar_lea.vmem %s7249_s5, %s4463_s6 }
  0x24   : > { %4887 = vmatpush3.bf16.msra.mxu0 %v5630_v18  ;;  %5441 = vmatpush3.bf16.msra.mxu1 %v5851_v17  ;;  %474 = vst [vmem:[#allocation2 + $0xf9] sm:$0xff] %v398_v57  ;;  %475 = vst [vmem:[#allocation2 + $0x109] sm:$0xff] %v399_v58  ;;  %v332_v15 = vmul.f32 %v4752_v2, %v5890_v25  ;;  %v333_v16 = vmul.f32 %v4753_v4, %v5890_v25  ;;  %v4712_v18 = vunpack.c.l.bf16 %v4847_v12  ;;  %v4848_v57 = vld [vmem:[%s5872_s15 + $0x18] sm:$0xff]  }
  0x25   : > { %4888 = vmatprep.subr.bf16.mxu0 %v5631_v19  ;;  %5434 = vmatprep.subr.bf16.mxu1 %v5865_v20  ;;  %476 = vst [vmem:[#allocation2 + $0x111] sm:$0xff] %v400_v60  ;;  %v4858_v19 = vld [vmem:[%s5872_s15 + $0x68] sm:$0xff]   ;;  %v370_v24 = vadd.f32 %v5898_v31, %v331_v10  ;;  %v382_v27 = vmax.f32 %v350_v13, 0.0  ;;  %v313_v35 = vmul.f32 %v4713_v26, %v5890_v25  ;;  %v4760_v51 = vunpack.c.l.bf16 %v4859_v32 }
  0x26   : > { %v371_v28 = vadd.f32 %v5898_v31, %v332_v15  ;;  %v312_v30 = vmul.f32 %v4712_v18, %v5890_v25  ;;  %v4756_v36 = vunpack.c.l.bf16 %v4858_v19  ;;  %v4757_v43 = vunpack.c.h.bf16 %v4858_v19 }
  0x27   : > { %v487_v29 = vld [vmem:[#allocation2] sm:$0xff]  ;;  %v402_v34 = vmax.f32 %v370_v24, 0.0  ;;  %458 = vst [vmem:[#allocation2 + $0x39] sm:$0xff] %v382_v27  ;;  %v352_v49 = vadd.f32 %v5898_v31, %v313_v35  ;;  %v4761_v56 = vunpack.c.h.bf16 %v4859_v32  ;;  %v336_v61 = vmul.f32 %v4760_v51, %v5890_v25 }
  0x28   : > { %535 = vst [vmem:[#allocation3] sm:$0xff] %v487_v29  ;;  %4889 = vmatpush3.bf16.msra.mxu0 %v5633_v21  ;;  %5442 = vmatpush3.bf16.msra.mxu1 %v5865_v20  ;;  %v5928_v6 = vpack.c.bf16 %v5695_v3, %v487_v29  ;;  %v381_v21 = vmax.f32 %v349_v7, 0.0  ;;  %v372_v29 = vadd.f32 %v5898_v31, %v333_v16  ;;  %v403_v40 = vmax.f32 %v371_v28, 0.0  ;;  %v5967_v63 = vld [vmem:[#allocation2 + $0x198] sm:$0xff]  ;;  %v5641_v16 = vld [vmem:[%s7245_s1 + $0x110] sm:$0xff]  }
  0x29   : > { %4890 = vmatprep.subr.bf16.mxu0 %v5634_v22  ;;  %5435 = vmatprep.subr.bf16.mxu1 %v5884_v23  ;;  %v369_v22 = vadd.f32 %v5898_v31, %v330_v9  ;;  %v583_v37 = vld [vmem:[#allocation2 + $0x18] sm:$0xff]  ;;  %v351_v42 = vadd.f32 %v5898_v31, %v312_v30  ;;  %478 = vst [vmem:[#allocation2 + $0x129] sm:$0xff] %v402_v34  ;;  %v384_v59 = vmax.f32 %v352_v49, 0.0  ;;  %v4716_v4 = vunpack.c.l.bf16 %v4848_v57  ;;  %v5640_v9 = vld [vmem:[%s7245_s1 + $0xc8] sm:$0xff]  }
  0x2a   : > { %457 = vst [vmem:[#allocation2 + $0x31] sm:$0xff] %v381_v21  ;;  %v404_v41 = vmax.f32 %v372_v29, 0.0  ;;  %631 = vst [vmem:[#allocation3 + $0x8] sm:$0xff] %v583_v37  ;;  %v334_v50 = vmul.f32 %v4756_v36, %v5890_v25  ;;  %v335_v55 = vmul.f32 %v4757_v43, %v5890_v25  ;;  %v337_v2 = vmul.f32 %v4761_v56, %v5890_v25  ;;  %v5642_v43 = vld [vmem:[%s7245_s1 + $0xd0] sm:$0xff]   ;;  %v5644_v56 = vld [vmem:[%s7245_s1 + $0xd8] sm:$0xff]  }
  0x2b   : > { %v401_v33 = vmax.f32 %v369_v22, 0.0  ;;  %v705_v46 = vld [vmem:[#allocation2 + $0xf8] sm:$0xff]  ;;  %v707_v47 = vld [vmem:[#allocation2 + $0x108] sm:$0xff]  ;;  %538 = vst [vmem:[#allocation3 + $0x48] sm:$0xff] %v583_v37  ;;  %479 = vst [vmem:[#allocation2 + $0x139] sm:$0xff] %v403_v40  ;;  %v383_v54 = vmax.f32 %v351_v42, 0.0  ;;  %v4717_v7 = vunpack.c.h.bf16 %v4848_v57  ;;  %v4764_v12 = vunpack.c.l.bf16 %v4860_v62 }
  0x2c   : > { %4891 = vmatpush3.bf16.msra.mxu0 %v5636_v38  ;;  %5443 = vmatpush3.bf16.msra.mxu1 %v5884_v23  ;;  %v5945_v38 = vld [vmem:[#allocation2 + $0x20] sm:$0xff]  ;;  %753 = vst [vmem:[#allocation3 + $0x268] sm:$0xff] %v705_v46  ;;  %v708_v53 = vld [vmem:[#allocation2 + $0x110] sm:$0xff]  ;;  %755 = vst [vmem:[#allocation3 + $0x298] sm:$0xff] %v707_v47  ;;  %v373_v60 = vadd.f32 %v5898_v31, %v334_v50  ;;  %v374_v0 = vadd.f32 %v5898_v31, %v335_v55  ;;  %v4765_v13 = vunpack.c.h.bf16 %v4860_v62 }
  0x2d   : > { %5284 = vmatprep.subr.bf16.mxu0 %v5740_v1  ;;  %5012 = vmatprep.subr.bf16.mxu1 %v5637_v45  ;;  %632 = vst [vmem:[#allocation3 + $0x20] sm:$0xff] %v5945_v38  ;;  %v5953_v44 = vpack.c.bf16 %v5945_v38, %v583_v37  ;;  %v704_v45 = vld [vmem:[#allocation2 + $0xf0] sm:$0xff]  ;;  %477 = vst [vmem:[#allocation2 + $0x121] sm:$0xff] %v401_v33  ;;  %v901_v58 = vpack.c.bf16 %v708_v53, %v707_v47 }
  0x2e   : > { %539 = vst [vmem:[#allocation3 + $0x60] sm:$0xff] %v5945_v38  ;;  %752 = vst [vmem:[#allocation3 + $0x250] sm:$0xff] %v704_v45  ;;  %v898_v52 = vpack.c.bf16 %v705_v46, %v704_v45  ;;  %v405_v10 = vmax.f32 %v373_v60, 0.0  ;;  %v406_v18 = vmax.f32 %v374_v0, 0.0  ;;  %v314_v19 = vmul.f32 %v4716_v4, %v5890_v25  ;;  %v5645_v60 = vld [vmem:[%s7245_s1 + $0x120] sm:$0xff]  }
  0x2f   : > { %480 = vst [vmem:[#allocation2 + $0x141] sm:$0xff] %v404_v41  ;;  %1144 = vmatprep.mubr.bf16.mxu0 %v5953_v44  ;;  %756 = vst [vmem:[#allocation3 + $0x2b0] sm:$0xff] %v708_v53  ;;  %v315_v21 = vmul.f32 %v4717_v7, %v5890_v25  ;;  %v338_v26 = vmul.f32 %v4764_v12, %v5890_v25  ;;  %v339_v27 = vmul.f32 %v4765_v13, %v5890_v25  ;;  %v4849_v41 = vld [vmem:[%s5872_s15 + $0x20] sm:$0xff]   ;;  %v489_v53 = vld [vmem:[#allocation2 + $0x10] sm:$0x3] }
  0x30   : > { %5316 = vmatprep.mubr.bf16.mxu1 %v898_v52  ;;  %1145 = vmatmul.mubr.bf16.vlgmr.msra.gmra.mrb[0].mxu0 %v5928_v6  ;;  %459 = vst [vmem:[#allocation2 + $0x49] sm:$0xff] %v383_v54  ;;  %773 = vst [vmem:[#allocation3 + $0x448] sm:$0xff] %v5967_v63  ;;  %v375_v6 = vadd.f32 %v5898_v31, %v336_v61  ;;  %v353_v33 = vadd.f32 %v5898_v31, %v314_v19  ;;  %v4720_v47 = vunpack.c.l.bf16 %v4849_v41 }
  0x31   : > { %5317 = vmatmul.mubr.bf16.vlgmr.msra.gmra.mrb[0].mxu1 %v901_v58  ;;  %5285 = vmatpush3.bf16.msra.mxu0 %v5740_v1  ;;  %460 = vst [vmem:[#allocation2 + $0x51] sm:$0xff] %v384_v59  ;;  %v586_v15 = vld [vmem:[#allocation2 + $0x30] sm:$0xff]  ;;  %v376_v1 = vadd.f32 %v5898_v31, %v337_v2  ;;  %v5985_v22 = vld [vmem:[#allocation2 + $0x38] sm:$0xff]  ;;  %481 = vst [vmem:[#allocation2 + $0x151] sm:$0xff] %v405_v10  ;;  %v354_v34 = vadd.f32 %v5898_v31, %v315_v21  ;;  %v4721_v52 = vunpack.c.h.bf16 %v4849_v41 }
  0x32   : > { %5013 = vmatpush3.bf16.msra.mxu1 %v5638_v39  ;;  %5286 = vmatprep.subr.bf16.mxu0 %v5794_v5  ;;  %634 = vst [vmem:[#allocation3 + $0x50] sm:$0xff] %v586_v15  ;;  %541 = vst [vmem:[#allocation3 + $0x90] sm:$0xff] %v586_v15  ;;  %v407_v24 = vmax.f32 %v375_v6, 0.0  ;;  %v5991_v28 = vpack.c.bf16 %v5985_v22, %v586_v15  ;;  %v713_v36 = vld [vmem:[#allocation2 + $0x138] sm:$0xff]  ;;  %v377_v39 = vadd.f32 %v5898_v31, %v338_v26  ;;  %v4850_v58 = vld [vmem:[%s5872_s15 + $0x28] sm:$0xff]  }
  0x33   : > { %5014 = vmatprep.subr.bf16.mxu1 %v5639_v48  ;;  %635 = vst [vmem:[#allocation3 + $0x68] sm:$0xff] %v5985_v22  ;;  %482 = vst [vmem:[#allocation2 + $0x159] sm:$0xff] %v406_v18  ;;  %v408_v32 = vmax.f32 %v376_v1, 0.0  ;;  %v378_v40 = vadd.f32 %v5898_v31, %v339_v27  ;;  %v385_v45 = vmax.f32 %v353_v33, 0.0  ;;  %v386_v46 = vmax.f32 %v354_v34, 0.0  ;;  %v5643_v48 = vld [vmem:[%s7245_s1 + $0x118] sm:$0xff]  }
  0x34   : > { %v710_v29 = vld [vmem:[#allocation2 + $0x120] sm:$0xff]  ;;  %v711_v30 = vld [vmem:[#allocation2 + $0x128] sm:$0xff]  ;;  %542 = vst [vmem:[#allocation3 + $0xa8] sm:$0xff] %v5985_v22  ;;  %483 = vst [vmem:[#allocation2 + $0x169] sm:$0xff] %v407_v24  ;;  %1152 = vmatprep.mubr.bf16.mxu0 %v5991_v28  ;;  %v409_v50 = vmax.f32 %v377_v39, 0.0  ;;  %v316_v55 = vmul.f32 %v4720_v47, %v5890_v25  ;;  %v317_v57 = vmul.f32 %v4721_v52, %v5890_v25  ;;  %v4724_v62 = vunpack.c.l.bf16 %v4850_v58 }
  0x35   : > { %758 = vst [vmem:[#allocation3 + $0x2e0] sm:$0xff] %v710_v29  ;;  %759 = vst [vmem:[#allocation3 + $0x2f8] sm:$0xff] %v711_v30  ;;  %v904_v35 = vpack.c.bf16 %v711_v30, %v710_v29  ;;  %5287 = vmatpush3.bf16.msra.mxu0 %v5794_v5  ;;  %v585_v5 = vld [vmem:[#allocation2 + $0x28] sm:$0x3]  ;;  %v410_v51 = vmax.f32 %v378_v40, 0.0  ;;  %v4725_v0 = vunpack.c.h.bf16 %v4850_v58  ;;  %v5646_v27 = vld [vmem:[%s7245_s1 + $0xe0] sm:$0xff]  }
  0x36   : > { %v714_v37 = vld [vmem:[#allocation2 + $0x140] sm:$0xff]  ;;  %5015 = vmatpush3.bf16.msra.mxu1 %v5640_v9  ;;  %761 = vst [vmem:[#allocation3 + $0x328] sm:$0xff] %v713_v36  ;;  %484 = vst [vmem:[#allocation2 + $0x171] sm:$0xff] %v408_v32  ;;  %5288 = vmatprep.subr.bf16.mxu0 %v5806_v8  ;;  %v355_v61 = vadd.f32 %v5898_v31, %v316_v55  ;;  %v6030_v7 = vld [vmem:[#allocation3 + $0x8] sm:$0xfe]  ;;  %v318_v13 = vmul.f32 %v4724_v62, %v5890_v25 }
  0x37   : > { %762 = vst [vmem:[#allocation3 + $0x340] sm:$0xff] %v714_v37  ;;  %v907_v42 = vpack.c.bf16 %v714_v37, %v713_v36  ;;  %5320 = vmatprep.mubr.bf16.mxu1 %v904_v35  ;;  %5016 = vmatprep.subr.bf16.mxu1 %v5641_v16  ;;  %v589_v49 = vld [vmem:[#allocation2 + $0x48] sm:$0xff]  ;;  %633 = vst [vmem:[#allocation3 + $0x38] sm:$0x3] %v585_v5  ;;  %v588_v2 = vld [vmem:[#allocation2 + $0x40] sm:$0x3]  ;;  %v319_v15 = vmul.f32 %v4725_v0, %v5890_v25 }
  0x38   : > { %1153 = vmatmul.mubr.bf16.gmra.mrb[4].mxu0 %v5953_v44  ;;  %v6008_v54 = vld [vmem:[#allocation2 + $0x50] sm:$0xff]  ;;  %637 = vst [vmem:[#allocation3 + $0x98] sm:$0xff] %v589_v49  ;;  %461 = vst [vmem:[#allocation2 + $0x61] sm:$0xff] %v385_v45  ;;  %v492_v9 = vld [vmem:[#allocation2 + $0x28] sm:$0x3]  ;;  %v387_v12 = vmax.f32 %v355_v61, 0.0  ;;  %v357_v30 = vadd.f32 %v5898_v31, %v318_v13 }
  0x39   : > { %462 = vst [vmem:[#allocation2 + $0x69] sm:$0xff] %v386_v46  ;;  %544 = vst [vmem:[#allocation3 + $0xd8] sm:$0xff] %v589_v49  ;;  %5321 = vmatmul.mubr.bf16.gmra.mrb[4].mxu1 %v907_v42  ;;  %v6017_v44 = vpack.c.bf16 %v6008_v54, %v589_v49  ;;  %5289 = vmatpush3.bf16.msra.mxu0 %v5806_v8  ;;  %v716_v59 = vld [vmem:[#allocation2 + $0x150] sm:$0xff]  ;;  %v356_v8 = vadd.f32 %v5898_v31, %v317_v57  ;;  %v591_v18 = vld [vmem:[#allocation2 + $0x58] sm:$0x3]  ;;  %v1790_v36 = vrot.slane %v6030_v7, 1 }
  0x3a   : > { %537 = vst [vmem:[#allocation3 + $0x30] sm:$0x3] %v489_v53  ;;  %638 = vst [vmem:[#allocation3 + $0xb0] sm:$0xff] %v6008_v54  ;;  %5017 = vmatpush3.bf16.msra.mxu1 %v5642_v43  ;;  %5290 = vmatprep.subr.bf16.mxu0 %v5819_v11  ;;  %v717_v4 = vld [vmem:[#allocation2 + $0x158] sm:$0xff]  ;;  %v4851_v16 = vld [vmem:[%s5872_s15 + $0x30] sm:$0xff]   ;;  %v358_v32 = vadd.f32 %v5898_v31, %v319_v15  ;;  %v6048_v37 = vrot.slane %v5945_v38, 1 }
  0x3b   : > { %485 = vst [vmem:[#allocation2 + $0x181] sm:$0xff] %v409_v50  ;;  %486 = vst [vmem:[#allocation2 + $0x189] sm:$0xff] %v410_v51  ;;  %5018 = vmatprep.subr.bf16.mxu1 %v5643_v48  ;;  %1160 = vmatprep.mubr.bf16.mxu0 %v6017_v44  ;;  %v910_v10 = vpack.c.bf16 %v717_v4, %v716_v59  ;;  %v719_v6 = vld [vmem:[#allocation2 + $0x168] sm:$0xff]  ;;  %v388_v19 = vmax.f32 %v356_v8, 0.0  ;;  %v4728_v21 = vunpack.c.l.bf16 %v4851_v16  ;;  %v495_v24 = vld [vmem:[#allocation2 + $0x40] sm:$0x3]  ;;  %v4729_v33 = vunpack.c.h.bf16 %v4851_v16 }
  0x3c   : > { %545 = vst [vmem:[#allocation3 + $0xf0] sm:$0xff] %v6008_v54  ;;  %764 = vst [vmem:[#allocation3 + $0x370] sm:$0xff] %v716_v59  ;;  %v389_v38 = vmax.f32 %v357_v30, 0.0  ;;  %v390_v45 = vmax.f32 %v358_v32, 0.0  ;;  %v4852_v5 = vld [vmem:[%s5872_s15 + $0x38] sm:$0xff]   ;;  %v5648_v49 = vld [vmem:[%s7245_s1 + $0xe8] sm:$0xff]   ;;  %v1792_v55 = vsel %vm1786_vm0, %v1790_v36, %v6048_v37 }
  0x3d   : > { %636 = vst [vmem:[#allocation3 + $0x80] sm:$0x3] %v588_v2  ;;  %765 = vst [vmem:[#allocation3 + $0x388] sm:$0xff] %v717_v4  ;;  %v720_v1 = vld [vmem:[#allocation2 + $0x170] sm:$0xff]  ;;  %5291 = vmatpush3.bf16.msra.mxu0 %v5819_v11  ;;  %5324 = vmatprep.mubr.bf16.mxu1 %v910_v10  ;;  %v5647_v11 = vld [vmem:[%s7245_s1 + $0x128] sm:$0xff]   ;;  %v320_v40 = vmul.f32 %v4728_v21, %v5890_v25  ;;  %v6068_v51 = vrot.slane %v5695_v3, 1  ;;  %v4732_v62 = vunpack.c.l.bf16 %v4852_v5  ;;  %v4733_v0 = vunpack.c.h.bf16 %v4852_v5 }
  0x3e   : > { %540 = vst [vmem:[#allocation3 + $0x78] sm:$0x3] %v492_v9  ;;  %767 = vst [vmem:[#allocation3 + $0x3b8] sm:$0xff] %v719_v6  ;;  %5019 = vmatpush3.bf16.msra.mxu1 %v5644_v56  ;;  %v913_v26 = vpack.c.bf16 %v720_v1, %v719_v6  ;;  %v1505_v29 = vld [vmem:[#allocation3 + $0x38] sm:$0x1]  ;;  %5292 = vmatprep.subr.bf16.mxu0 %v5834_v14  ;;  %v5649_v53 = vld [vmem:[%s7245_s1 + $0x130] sm:$0xff]   ;;  %v919_v4 = vpack.c.bf16 %v5695_v3, %v5967_v63 }
  0x3f   : > { %639 = vst [vmem:[#allocation3 + $0xc8] sm:$0x3] %v591_v18  ;;  %768 = vst [vmem:[#allocation3 + $0x3d0] sm:$0xff] %v720_v1  ;;  %5020 = vmatprep.subr.bf16.mxu1 %v5645_v60  ;;  %v592_v34 = vld [vmem:[#allocation2 + $0x60] sm:$0xff]  ;;  %v1798_v39 = vrot.slane %v1505_v29, 1  ;;  %v359_v47 = vadd.f32 %v5898_v31, %v320_v40  ;;  %v5650_v8 = vld [vmem:[%s7245_s1 + $0xf0] sm:$0xff]   ;;  %v322_v13 = vmul.f32 %v4732_v62, %v5890_v25 }
  0x40   : > { %463 = vst [vmem:[#allocation2 + $0x79] sm:$0xff] %v387_v12  ;;  %543 = vst [vmem:[#allocation3 + $0xc0] sm:$0x3] %v495_v24  ;;  %v6044_v35 = vld [vmem:[#allocation2 + $0x68] sm:$0xff]  ;;  %1161 = vmatmul.mubr.bf16.gmra.mrb[8].mxu0 %v5991_v28  ;;  %v321_v28 = vmul.f32 %v4729_v33, %v5890_v25  ;;  %v594_v48 = vld [vmem:[#allocation2 + $0x70] sm:$0x3] }
  0x41   : > { %464 = vst [vmem:[#allocation2 + $0x81] sm:$0xff] %v388_v19  ;;  %640 = vst [vmem:[#allocation3 + $0xe0] sm:$0xff] %v592_v34  ;;  %v6055_v41 = vpack.c.bf16 %v6044_v35, %v592_v34  ;;  %5325 = vmatmul.mubr.bf16.gmra.mrb[8].mxu1 %v913_v26  ;;  %v6065_v50 = vld [vmem:[#allocation3] sm:$0xfe]  ;;  %v498_v52 = vld [vmem:[#allocation2 + $0x58] sm:$0x3]  ;;  %v1799_v56 = vsel %vm1786_vm0, %v6048_v37, %v1798_v39  ;;  %5293 = vmatpush3.bf16.msra.mxu0 %v5834_v14 }
  0x42   : > { %641 = vst [vmem:[#allocation3 + $0xf8] sm:$0xff] %v6044_v35  ;;  %v722_v42 = vld [vmem:[#allocation2 + $0x180] sm:$0xff]  ;;  %v723_v43 = vld [vmem:[#allocation2 + $0x188] sm:$0xff]  ;;  %547 = vst [vmem:[#allocation3 + $0x120] sm:$0xff] %v592_v34  ;;  %5021 = vmatpush3.bf16.msra.mxu1 %v5646_v27  ;;  %v360_v58 = vadd.f32 %v5898_v31, %v321_v28  ;;  %v391_v59 = vmax.f32 %v359_v47, 0.0  ;;  %v1787_v9 = vrot.slane %v6065_v50, 1  ;;  %5294 = vmatprep.subr.bf16.mxu0 %v5851_v17 }
  0x43   : > { %548 = vst [vmem:[#allocation3 + $0x138] sm:$0xff] %v6044_v35  ;;  %770 = vst [vmem:[#allocation3 + $0x400] sm:$0xff] %v722_v42  ;;  %v916_v46 = vpack.c.bf16 %v723_v43, %v722_v42  ;;  %1168 = vmatprep.mubr.bf16.mxu0 %v6055_v41  ;;  %5022 = vmatprep.subr.bf16.mxu1 %v5647_v11  ;;  %v1504_v57 = vld [vmem:[#allocation3 + $0x30] sm:$0x1]  ;;  %v6078_v60 = vld [vmem:[#allocation3 + $0x50] sm:$0xfe]  ;;  %v2124_v3 = vpack.c.bf16 %v1799_v56, %v1792_v55 }
  0x44   : > { %771 = vst [vmem:[#allocation3 + $0x418] sm:$0xff] %v723_v43  ;;  %465 = vst [vmem:[#allocation2 + $0x91] sm:$0xff] %v389_v38  ;;  %v6080_v61 = vld [vmem:[#allocation3 + $0x80] sm:$0x1]  ;;  %v6090_v10 = vrot.slane %v5985_v22, 1  ;;  %v392_v6 = vmax.f32 %v360_v58, 0.0  ;;  %v323_v19 = vmul.f32 %v4733_v0, %v5890_v25  ;;  %v361_v26 = vadd.f32 %v5898_v31, %v322_v13 }
  0x45   : > { %466 = vst [vmem:[#allocation2 + $0x99] sm:$0xff] %v390_v45  ;;  %642 = vst [vmem:[#allocation3 + $0x110] sm:$0x3] %v594_v48  ;;  %5328 = vmatprep.mubr.bf16.mxu1 %v916_v46  ;;  %v501_v2 = vld [vmem:[#allocation2 + $0x70] sm:$0x3]  ;;  %v6093_v12 = vld [vmem:[%s5872_s15 + $0x40] sm:$0xff]   ;;  %v6134_v36 = vsel %vm1786_vm0, %v1787_v9, %v6068_v51  ;;  %5295 = vmatpush3.bf16.msra.mxu0 %v5851_v17 }
  0x46   : > { %546 = vst [vmem:[#allocation3 + $0x108] sm:$0x3] %v498_v52  ;;  %467 = vst [vmem:[#allocation2 + $0xa9] sm:$0xff] %v391_v59  ;;  %5023 = vmatpush3.bf16.msra.mxu1 %v5648_v49  ;;  %v1796_v63 = vrot.slane %v1504_v57, 1  ;;  %v5651_v22 = vld [vmem:[%s7245_s1 + $0x138] sm:$0xff]   ;;  %v1805_v18 = vrot.slane %v6078_v60, 1  ;;  %v362_v11 = vadd.f32 %v5898_v31, %v323_v19  ;;  %v4736_v34 = vunpack.c.l.bf16 %v6093_v12  ;;  %5296 = vmatprep.subr.bf16.mxu0 %v5865_v20 }
  0x47   : > { %v595_v7 = vld [vmem:[#allocation2 + $0x78] sm:$0xff]  ;;  %549 = vst [vmem:[#allocation3 + $0x150] sm:$0x3] %v501_v2  ;;  %5024 = vmatprep.subr.bf16.mxu1 %v5649_v53  ;;  %v1813_v1 = vrot.slane %v6080_v61, 1  ;;  %468 = vst [vmem:[#allocation2 + $0xb1] sm:$0xff] %v392_v6  ;;  %v6117_v27 = vld [vmem:[#allocation2 + $0xf0] sm:$0xff]  ;;  %v4737_v47 = vunpack.c.h.bf16 %v6093_v12 }
  0x48   : > { %v6096_v14 = vld [vmem:[#allocation2 + $0x80] sm:$0xff]  ;;  %643 = vst [vmem:[#allocation3 + $0x128] sm:$0xff] %v595_v7  ;;  %550 = vst [vmem:[#allocation3 + $0x168] sm:$0xff] %v595_v7  ;;  %v597_v15 = vld [vmem:[#allocation2 + $0x88] sm:$0x3]  ;;  %1169 = vmatmul.mubr.bf16.gmra.mrb[12].mxu0 %v6017_v44  ;;  %v6138_v39 = vsel %vm1786_vm0, %v6068_v51, %v1796_v63  ;;  %v393_v43 = vmax.f32 %v361_v26, 0.0  ;;  %v1807_v45 = vsel %vm1786_vm0, %v1805_v18, %v6090_v10 }
  0x49   : > { %644 = vst [vmem:[#allocation3 + $0x140] sm:$0xff] %v6096_v14  ;;  %v6104_v16 = vpack.c.bf16 %v6096_v14, %v595_v7  ;;  %551 = vst [vmem:[#allocation3 + $0x180] sm:$0xff] %v6096_v14  ;;  %v5652_v21 = vld [vmem:[%s7245_s1 + $0xf8] sm:$0xff]   ;;  %v504_v30 = vld [vmem:[#allocation2 + $0x88] sm:$0x3]  ;;  %5329 = vmatmul.mubr.bf16.gmra.mrb[12].mxu1 %v919_v4  ;;  %v1814_v46 = vsel %vm1786_vm0, %v6090_v10, %v1813_v1  ;;  %v394_v28 = vmax.f32 %v362_v11, 0.0  ;;  %5297 = vmatpush3.bf16.msra.mxu0 %v5865_v20 }
  0x4a   : > { %645 = vst [vmem:[#allocation3 + $0x158] sm:$0x3] %v597_v15  ;;  %v6114_v24 = vld [vmem:[#allocation3 + $0x48] sm:$0xfe]  ;;  %v6124_v44 = vld [vmem:[#allocation3 + $0x98] sm:$0xfe]  ;;  %5025 = vmatpush3.bf16.msra.mxu1 %v5650_v8  ;;  %2396 = vmatprep.mubr.bf16.mxu1 %v2124_v3  ;;  %v324_v53 = vmul.f32 %v4736_v34, %v5890_v25  ;;  %v2123_v17 = vpack.c.bf16 %v6138_v39, %v6134_v36 }
  0x4b   : > { %v6119_v29 = vld [vmem:[#allocation2 + $0xf8] sm:$0xff]  ;;  %1176 = vmatprep.mubr.bf16.mxu0 %v6104_v16  ;;  %v598_v32 = vld [vmem:[#allocation2 + $0x90] sm:$0xff]  ;;  %658 = vst [vmem:[#allocation3 + $0x290] sm:$0xff] %v6117_v27  ;;  %552 = vst [vmem:[#allocation3 + $0x198] sm:$0x3] %v504_v30  ;;  %5026 = vmatprep.subr.bf16.mxu1 %v5651_v22  ;;  %v6162_v52 = vrot.slane %v6008_v54, 1  ;;  %v325_v56 = vmul.f32 %v4737_v47, %v5890_v25  ;;  %v2127_v58 = vpack.c.bf16 %v1814_v46, %v1807_v45 }
  0x4c   : > { %v6122_v33 = vld [vmem:[#allocation2 + $0x98] sm:$0xff]  ;;  %659 = vst [vmem:[#allocation3 + $0x2a8] sm:$0xff] %v6119_v29  ;;  %565 = vst [vmem:[#allocation3 + $0x2d0] sm:$0xff] %v6117_v27  ;;  %v6143_v40 = vld [vmem:[%s7245_s1 + $0x140] sm:$0xff]   ;;  %v1802_v55 = vrot.slane %v6114_v24, 1  ;;  %v1820_v61 = vrot.slane %v6124_v44, 1  ;;  %v363_v0 = vadd.f32 %v5898_v31, %v324_v53  ;;  %5298 = vmatprep.subr.bf16.mxu0 %v5884_v23 }
  0x4d   : > { %566 = vst [vmem:[#allocation3 + $0x2e8] sm:$0xff] %v6119_v29  ;;  %646 = vst [vmem:[#allocation3 + $0x170] sm:$0xff] %v598_v32  ;;  %v6146_v42 = vld [vmem:[#allocation3 + $0x78] sm:$0x1]  ;;  %v600_v38 = vld [vmem:[#allocation2 + $0xa0] sm:$0x3]  ;;  %v6173_v54 = vpack.c.bf16 %v6122_v33, %v598_v32  ;;  %v364_v4 = vadd.f32 %v5898_v31, %v325_v56  ;;  %5299 = vmatpush3.bf16.msra.mxu0 %v5884_v23 }
  0x4e   : > { %647 = vst [vmem:[#allocation3 + $0x188] sm:$0xff] %v6122_v33  ;;  %553 = vst [vmem:[#allocation3 + $0x1b0] sm:$0xff] %v598_v32  ;;  %v6154_v5 = vld [vmem:[#allocation2 + $0x108] sm:$0xff]  ;;  %v6156_v48 = vld [vmem:[#allocation2 + $0x110] sm:$0xff]  ;;  %5027 = vmatpush3.bf16.msra.mxu1 %v5652_v21  ;;  %v1811_v59 = vrot.slane %v6146_v42, 1  ;;  %v395_v7 = vmax.f32 %v363_v0, 0.0  ;;  %v1804_v20 = vsel %vm1786_vm0, %v1802_v55, %v6048_v37  ;;  %v1822_v13 = vsel %vm1786_vm0, %v1820_v61, %v6162_v52 }
  0x4f   : > { %554 = vst [vmem:[#allocation3 + $0x1c8] sm:$0xff] %v6122_v33  ;;  %648 = vst [vmem:[#allocation3 + $0x1a0] sm:$0x3] %v600_v38  ;;  %v507_v49 = vld [vmem:[#allocation2 + $0xa0] sm:$0x3]  ;;  %v6159_v50 = vld [vmem:[#allocation2 + $0xa8] sm:$0xff]  ;;  %5332 = vmatprep.subr.bf16.mxu1 %v6143_v40 }
  0x50   : > { %v1523_v51 = vld [vmem:[#allocation3 + $0xc8] sm:$0x1]  ;;  %469 = vst [vmem:[#allocation2 + $0xc1] sm:$0xff] %v393_v43  ;;  %661 = vst [vmem:[#allocation3 + $0x2d8] sm:$0xff] %v6154_v5  ;;  %v6179_v57 = vld [vmem:[#allocation2 + $0x120] sm:$0xff]  ;;  %1177 = vmatmul.mubr.bf16.gmra.mrb[16].mxu0 %v6055_v41  ;;  %v396_v31 = vmax.f32 %v364_v4, 0.0  ;;  %v1812_v41 = vsel %vm1786_vm0, %v6048_v37, %v1811_v59 }
  0x51   : > { %662 = vst [vmem:[#allocation3 + $0x2f0] sm:$0xff] %v6156_v48  ;;  %555 = vst [vmem:[#allocation3 + $0x1e0] sm:$0x3] %v507_v49  ;;  %v6182_v60 = vld [vmem:[#allocation2 + $0xb0] sm:$0xff]  ;;  %v5654_v62 = vld [vmem:[%s7245_s1 + $0x148] sm:$0xff]   ;;  %v1828_v25 = vrot.slane %v1523_v51, 1  ;;  %2397 = vmatmul.mubr.bf16.vlgmr.msra.gmra.mrb[16].mxu1 %v2123_v17  ;;  %1184 = vmatprep.mubr.bf16.mxu0 %v6173_v54  ;;  %v2126_v24 = vpack.c.bf16 %v1812_v41, %v1804_v20 }
  0x52   : > { %568 = vst [vmem:[#allocation3 + $0x318] sm:$0xff] %v6154_v5  ;;  %569 = vst [vmem:[#allocation3 + $0x330] sm:$0xff] %v6156_v48  ;;  %v603_v2 = vld [vmem:[#allocation2 + $0xb8] sm:$0x3]  ;;  %v6195_v8 = vld [vmem:[#allocation2 + $0x128] sm:$0xff]  ;;  %5333 = vmatpush3.bf16.msra.mxu1 %v6143_v40  ;;  %2404 = vmatprep.mubr.bf16.mxu1 %v2127_v58  ;;  %v6232_v26 = vpack.c.bf16 %v6182_v60, %v6159_v50  ;;  %v6237_v11 = vrot.slane %v6044_v35, 1 }
  0x53   : > { %649 = vst [vmem:[#allocation3 + $0x1b8] sm:$0xff] %v6159_v50  ;;  %470 = vst [vmem:[#allocation2 + $0xc9] sm:$0xff] %v394_v28  ;;  %v510_v9 = vld [vmem:[#allocation2 + $0xb8] sm:$0x3]  ;;  %v6205_v12 = vld [vmem:[#allocation2 + $0x140] sm:$0xff]  ;;  %v1829_v15 = vsel %vm1786_vm0, %v6162_v52, %v1828_v25  ;;  %5334 = vmatprep.subr.bf16.mxu1 %v5654_v62  ;;  %v6284_v4 = vrot.slane %v6096_v14, 1 }
  0x54   : > { %556 = vst [vmem:[#allocation3 + $0x1f8] sm:$0xff] %v6159_v50  ;;  %664 = vst [vmem:[#allocation3 + $0x320] sm:$0xff] %v6179_v57  ;;  %v6200_v6 = vld [vmem:[#allocation2 + $0x138] sm:$0xff]  ;;  %v1516_v3 = vld [vmem:[#allocation3 + $0x90] sm:$0xfe]  ;;  %v2130_v32 = vpack.c.bf16 %v1829_v15, %v1822_v13 }
  0x55   : > { %571 = vst [vmem:[#allocation3 + $0x360] sm:$0xff] %v6179_v57  ;;  %650 = vst [vmem:[#allocation3 + $0x1d0] sm:$0xff] %v6182_v60  ;;  %v5655_v63 = vld [vmem:[%s7245_s1 + $0x150] sm:$0xff]   ;;  %v1532_v19 = vld [vmem:[#allocation3 + $0x110] sm:$0x1]  ;;  %v1817_v30 = vrot.slane %v1516_v3, 1 }
  0x56   : > { %557 = vst [vmem:[#allocation3 + $0x210] sm:$0xff] %v6182_v60  ;;  %651 = vst [vmem:[#allocation3 + $0x1e8] sm:$0x3] %v603_v2  ;;  %v1522_v22 = vld [vmem:[#allocation3 + $0xc0] sm:$0x1]  ;;  %5335 = vmatpush3.bf16.msra.mxu1 %v5654_v62  ;;  %v5656_v34 = vld [vmem:[%s7245_s1 + $0x158] sm:$0xff]  }
  0x57   : > { %665 = vst [vmem:[#allocation3 + $0x338] sm:$0xff] %v6195_v8  ;;  %572 = vst [vmem:[#allocation3 + $0x378] sm:$0xff] %v6195_v8  ;;  %v6223_v18 = vld [vmem:[#allocation2 + $0xc0] sm:$0xff]  ;;  %v1526_v37 = vld [vmem:[#allocation3 + $0xe0] sm:$0xfe]  ;;  %v1826_v44 = vrot.slane %v1522_v22, 1  ;;  %5336 = vmatprep.subr.bf16.mxu1 %v5655_v63 }
  0x58   : > { %558 = vst [vmem:[#allocation3 + $0x228] sm:$0x3] %v510_v9  ;;  %667 = vst [vmem:[#allocation3 + $0x368] sm:$0xff] %v6200_v6  ;;  %v6242_v36 = vld [vmem:[#allocation2 + $0x150] sm:$0xff]  ;;  %v1835_v39 = vrot.slane %v1526_v37, 1  ;;  %v1843_v40 = vrot.slane %v1532_v19, 1  ;;  %1185 = vmatmul.mubr.bf16.gmra.mrb[20].mxu0 %v6104_v16  ;;  %v1819_v16 = vsel %vm1786_vm0, %v1817_v30, %v6090_v10 }
  0x59   : > { %574 = vst [vmem:[#allocation3 + $0x3a8] sm:$0xff] %v6200_v6  ;;  %471 = vst [vmem:[#allocation2 + $0xd9] sm:$0xff] %v395_v7  ;;  %v6244_v42 = vld [vmem:[#allocation2 + $0x158] sm:$0xff]  ;;  %v6247_v43 = vld [vmem:[#allocation2 + $0x168] sm:$0xff]  ;;  %2405 = vmatmul.mubr.bf16.gmra.mrb[20].mxu1 %v2126_v24  ;;  %1192 = vmatprep.mubr.bf16.mxu0 %v6232_v26  ;;  %v1827_v28 = vsel %vm1786_vm0, %v6090_v10, %v1826_v44 }
  0x5a   : > { %668 = vst [vmem:[#allocation3 + $0x380] sm:$0xff] %v6205_v12  ;;  %575 = vst [vmem:[#allocation3 + $0x3c0] sm:$0xff] %v6205_v12  ;;  %v6226_v1 = vld [vmem:[#allocation2 + $0xc8] sm:$0xff]  ;;  %v606_v21 = vld [vmem:[#allocation2 + $0xd0] sm:$0x3]  ;;  %2412 = vmatprep.mubr.bf16.mxu1 %v2130_v32  ;;  %5337 = vmatpush3.bf16.msra.mxu1 %v5655_v63  ;;  %v1837_v51 = vsel %vm1786_vm0, %v1835_v39, %v6237_v11  ;;  %v1844_v10 = vsel %vm1786_vm0, %v6237_v11, %v1843_v40 }
  0x5b   : > { %472 = vst [vmem:[#allocation2 + $0xe1] sm:$0xff] %v396_v31  ;;  %652 = vst [vmem:[#allocation3 + $0x200] sm:$0xff] %v6223_v18  ;;  %v513_v23 = vld [vmem:[#allocation2 + $0xd0] sm:$0x3]  ;;  %v612_v35 = vld [vmem:[#allocation2 + $0x100] sm:$0x3]  ;;  %5338 = vmatprep.subr.bf16.mxu1 %v5656_v34  ;;  %v2129_v59 = vpack.c.bf16 %v1827_v28, %v1819_v16  ;;  %v6281_v61 = vpack.c.bf16 %v6226_v1, %v6223_v18  ;;  %v2133_v0 = vpack.c.bf16 %v1844_v10, %v1837_v51 }
  0x5c   : > { %559 = vst [vmem:[#allocation3 + $0x240] sm:$0xff] %v6223_v18  ;;  %653 = vst [vmem:[#allocation3 + $0x218] sm:$0xff] %v6226_v1  ;;  %v6258_v45 = vld [vmem:[#allocation2 + $0x170] sm:$0xff]  ;;  %v615_v46 = vld [vmem:[#allocation2 + $0x118] sm:$0x3]  ;;  %v6323_v16 = vrot.slane %v6122_v33, 1 }
  0x5d   : > { %560 = vst [vmem:[#allocation3 + $0x258] sm:$0xff] %v6226_v1  ;;  %654 = vst [vmem:[#allocation3 + $0x230] sm:$0x3] %v606_v21  ;;  %v1525_v53 = vld [vmem:[#allocation3 + $0xd8] sm:$0xfe]  ;;  %v5657_v55 = vld [vmem:[%s7245_s1 + $0x160] sm:$0xff]  }
  0x5e   : > { %561 = vst [vmem:[#allocation3 + $0x270] sm:$0x3] %v513_v23  ;;  %670 = vst [vmem:[#allocation3 + $0x3b0] sm:$0xff] %v6242_v36  ;;  %v1531_v17 = vld [vmem:[#allocation3 + $0x108] sm:$0x1]  ;;  %v1832_v2 = vrot.slane %v1525_v53, 1  ;;  %5339 = vmatpush3.bf16.msra.mxu1 %v5656_v34 }
  0x5f   : > { %577 = vst [vmem:[#allocation3 + $0x3f0] sm:$0xff] %v6242_v36  ;;  %671 = vst [vmem:[#allocation3 + $0x3c8] sm:$0xff] %v6244_v42  ;;  %v1535_v56 = vld [vmem:[#allocation3 + $0x128] sm:$0xfe]  ;;  %v1541_v58 = vld [vmem:[#allocation3 + $0x158] sm:$0x1]  ;;  %5340 = vmatprep.subr.bf16.mxu1 %v5657_v55 }
  0x60   : > { %673 = vst [vmem:[#allocation3 + $0x3f8] sm:$0xff] %v6247_v43  ;;  %578 = vst [vmem:[#allocation3 + $0x408] sm:$0xff] %v6244_v42  ;;  %v6256_v38 = vld [vmem:[#allocation2 + $0xd8] sm:$0xff]  ;;  %v519_v62 = vld [vmem:[#allocation2 + $0x100] sm:$0x3]  ;;  %v1841_v25 = vrot.slane %v1531_v17, 1  ;;  %1193 = vmatmul.mubr.bf16.gmra.mrb[24].mxu0 %v6173_v54  ;;  %v1834_v3 = vsel %vm1786_vm0, %v1832_v2, %v6162_v52 }
  0x61   : > { %580 = vst [vmem:[#allocation3 + $0x438] sm:$0xff] %v6247_v43  ;;  %660 = vst [vmem:[#allocation3 + $0x2c0] sm:$0x3] %v612_v35  ;;  %v5658_v7 = vld [vmem:[%s7245_s1 + $0x168] sm:$0xff]   ;;  %v1850_v9 = vrot.slane %v1535_v56, 1  ;;  %v1858_v31 = vrot.slane %v1541_v58, 1  ;;  %2413 = vmatmul.mubr.bf16.gmra.mrb[24].mxu1 %v2129_v59  ;;  %1200 = vmatprep.mubr.bf16.mxu0 %v6281_v61 }
  0x62   : > { %v6264_v47 = vld [vmem:[#allocation2 + $0xe0] sm:$0xff]  ;;  %655 = vst [vmem:[#allocation3 + $0x248] sm:$0xff] %v6256_v38  ;;  %562 = vst [vmem:[#allocation3 + $0x288] sm:$0xff] %v6256_v38  ;;  %v609_v49 = vld [vmem:[#allocation2 + $0xe8] sm:$0x3]  ;;  %2420 = vmatprep.mubr.bf16.mxu1 %v2133_v0  ;;  %v1842_v63 = vsel %vm1786_vm0, %v6162_v52, %v1841_v25  ;;  %5341 = vmatpush3.bf16.msra.mxu1 %v5657_v55 }
  0x63   : > { %v516_v50 = vld [vmem:[#allocation2 + $0xe8] sm:$0x3]  ;;  %674 = vst [vmem:[#allocation3 + $0x410] sm:$0xff] %v6258_v45  ;;  %663 = vst [vmem:[#allocation3 + $0x308] sm:$0x3] %v615_v46  ;;  %v6289_v20 = vld [vmem:[#allocation2 + $0x180] sm:$0xff]  ;;  %v1852_v54 = vsel %vm1786_vm0, %v1850_v9, %v6284_v4  ;;  %v1859_v15 = vsel %vm1786_vm0, %v6284_v4, %v1858_v31  ;;  %5342 = vmatprep.subr.bf16.mxu1 %v5658_v7  ;;  %v2132_v30 = vpack.c.bf16 %v1842_v63, %v1834_v3 }
  0x64   : > { %581 = vst [vmem:[#allocation3 + $0x450] sm:$0xff] %v6258_v45  ;;  %656 = vst [vmem:[#allocation3 + $0x260] sm:$0xff] %v6264_v47  ;;  %v6291_v41 = vld [vmem:[#allocation2 + $0x188] sm:$0xff]  ;;  %v618_v14 = vld [vmem:[#allocation2 + $0x130] sm:$0x3]  ;;  %v6311_v52 = vpack.c.bf16 %v6264_v47, %v6256_v38  ;;  %v2136_v34 = vpack.c.bf16 %v1859_v15, %v1852_v54 }
  0x65   : > { %563 = vst [vmem:[#allocation3 + $0x2a0] sm:$0xff] %v6264_v47  ;;  %657 = vst [vmem:[#allocation3 + $0x278] sm:$0x3] %v609_v49  ;;  %v1534_v13 = vld [vmem:[#allocation3 + $0x120] sm:$0xfe]  ;;  %v6307_v24 = vld [vmem:[#allocation2 + $0x38] sm:$0xff] }
  0x66   : > { %564 = vst [vmem:[#allocation3 + $0x2b8] sm:$0x3] %v516_v50  ;;  %567 = vst [vmem:[#allocation3 + $0x300] sm:$0x3] %v519_v62  ;;  %v1540_v22 = vld [vmem:[#allocation3 + $0x150] sm:$0x1]  ;;  %5343 = vmatpush3.bf16.msra.mxu1 %v5658_v7  ;;  %v6346_v62 = vpack.c.bf16 %v6119_v29, %v6117_v27 }
  0x67   : > { %676 = vst [vmem:[#allocation3 + $0x440] sm:$0xff] %v6289_v20  ;;  %677 = vst [vmem:[#allocation3 + $0x458] sm:$0xff] %v6291_v41  ;;  %v1544_v18 = vld [vmem:[#allocation3 + $0x170] sm:$0xfe]  ;;  %v522_v37 = vld [vmem:[#allocation2 + $0x118] sm:$0x3] }
  0x68   : > { %666 = vst [vmem:[#allocation3 + $0x350] sm:$0x3] %v618_v14  ;;  %v1550_v19 = vld [vmem:[#allocation3 + $0x1a0] sm:$0x1]  ;;  %570 = vst [vmem:[#allocation3 + $0x348] sm:$0x3] %v522_v37  ;;  %1201 = vmatmul.mubr.bf16.gmra.mrb[28].mxu0 %v6232_v26 }
  0x69   : > { %v6305_v21 = vld [vmem:[#allocation2 + $0x30] sm:$0xff]  ;;  %729 = vst [vmem:[#allocation3 + $0x28] sm:$0xff] %v6307_v24  ;;  %v621_v32 = vld [vmem:[#allocation2 + $0x148] sm:$0x3]  ;;  %v1847_v39 = vrot.slane %v1534_v13, 1  ;;  %v1856_v40 = vrot.slane %v1540_v22, 1  ;;  %2421 = vmatmul.mubr.bf16.gmra.mrb[28].mxu1 %v2132_v30  ;;  %1208 = vmatprep.mubr.bf16.mxu0 %v6311_v52 }
  0x6a   : > { %728 = vst [vmem:[#allocation3 + $0x10] sm:$0xff] %v6305_v21  ;;  %v874_v23 = vpack.c.bf16 %v6307_v24, %v6305_v21  ;;  %v6317_v44 = vld [vmem:[#allocation2 + $0x48] sm:$0xff]  ;;  %669 = vst [vmem:[#allocation3 + $0x398] sm:$0x3] %v621_v32  ;;  %v6319_v35 = vld [vmem:[#allocation2 + $0x50] sm:$0xff]  ;;  %v1865_v46 = vrot.slane %v1544_v18, 1  ;;  %2428 = vmatprep.mubr.bf16.mxu1 %v2136_v34 }
  0x6b   : > { %731 = vst [vmem:[#allocation3 + $0x58] sm:$0xff] %v6317_v44  ;;  %v525_v38 = vld [vmem:[#allocation2 + $0x130] sm:$0x3]  ;;  %v1873_v28 = vrot.slane %v1550_v19, 1  ;;  %732 = vst [vmem:[#allocation3 + $0x70] sm:$0xff] %v6319_v35  ;;  %v877_v49 = vpack.c.bf16 %v6319_v35, %v6317_v44  ;;  %v5660_v33 = vld [vmem:[%s7245_s1 + $0x1c0] sm:$0xff]   ;;  %v1849_v10 = vsel %vm1786_vm0, %v1847_v39, %v6237_v11  ;;  %v1857_v26 = vsel %vm1786_vm0, %v6237_v11, %v1856_v40 }
  0x6c   : > { %573 = vst [vmem:[#allocation3 + $0x390] sm:$0x3] %v525_v38  ;;  %v5659_v50 = vld [vmem:[%s7245_s1 + $0x170] sm:$0xff]   ;;  %v1543_v51 = vld [vmem:[#allocation3 + $0x168] sm:$0xfe]  ;;  %v1867_v17 = vsel %vm1786_vm0, %v1865_v46, %v6323_v16  ;;  %5148 = vmatprep.subr.bf16.mxu0 %v5660_v33  ;;  %v2135_v59 = vpack.c.bf16 %v1857_v26, %v1849_v10  ;;  %v6348_v0 = vld [vmem:[#allocation2 + $0x60] sm:$0xff]  ;;  %v6381_v40 = vpack.c.bf16 %v6156_v48, %v6154_v5 }
  0x6d   : > { %v1549_v53 = vld [vmem:[#allocation3 + $0x198] sm:$0x1]  ;;  %5344 = vmatprep.subr.bf16.mxu1 %v5659_v50  ;;  %v1874_v55 = vsel %vm1786_vm0, %v6323_v16, %v1873_v28  ;;  %v1553_v56 = vld [vmem:[#allocation3 + $0x1b8] sm:$0xfe]  ;;  %v1559_v58 = vld [vmem:[#allocation3 + $0x1e8] sm:$0x1] }
  0x6e   : > { %5345 = vmatpush3.bf16.msra.mxu1 %v5659_v50  ;;  %v2139_v11 = vpack.c.bf16 %v1874_v55, %v1867_v17  ;;  %v1862_v2 = vrot.slane %v1543_v51, 1  ;;  %v1871_v25 = vrot.slane %v1549_v53, 1  ;;  %v6350_v7 = vld [vmem:[#allocation2 + $0x68] sm:$0xff]  ;;  %734 = vst [vmem:[#allocation3 + $0xa0] sm:$0xff] %v6348_v0  ;;  %v624_v9 = vld [vmem:[#allocation2 + $0x160] sm:$0x3] }
  0x6f   : > { %v1880_v31 = vrot.slane %v1553_v56, 1  ;;  %v6354_v14 = vrot.slane %v6182_v60, 1  ;;  %v1888_v3 = vrot.slane %v1559_v58, 1  ;;  %735 = vst [vmem:[#allocation3 + $0xb8] sm:$0xff] %v6350_v7  ;;  %v880_v27 = vpack.c.bf16 %v6350_v7, %v6348_v0  ;;  %672 = vst [vmem:[#allocation3 + $0x3e0] sm:$0x3] %v624_v9 }
  0x70   : > { %v6359_v63 = vld [vmem:[#allocation2 + $0x78] sm:$0xff]  ;;  %v6361_v13 = vld [vmem:[#allocation2 + $0x80] sm:$0xff]  ;;  %1209 = vmatmul.mubr.bf16.gmra.mrb[32].mxu0 %v6281_v61  ;;  %v528_v54 = vld [vmem:[#allocation2 + $0x148] sm:$0x3]  ;;  %v1864_v18 = vsel %vm1786_vm0, %v1862_v2, %v6284_v4  ;;  %v1872_v61 = vsel %vm1786_vm0, %v6284_v4, %v1871_v25  ;;  %v6394_v26 = vrot.slane %v6226_v1, 1 }
  0x71   : > { %737 = vst [vmem:[#allocation3 + $0xe8] sm:$0xff] %v6359_v63  ;;  %738 = vst [vmem:[#allocation3 + $0x100] sm:$0xff] %v6361_v13  ;;  %v883_v60 = vpack.c.bf16 %v6361_v13, %v6359_v63  ;;  %2429 = vmatmul.mubr.bf16.gmra.mrb[32].mxu1 %v2135_v59  ;;  %1216 = vmatprep.mubr.bf16.mxu0 %v6346_v62  ;;  %v1552_v15 = vld [vmem:[#allocation3 + $0x1b0] sm:$0xfe]  ;;  %v1558_v22 = vld [vmem:[#allocation3 + $0x1e0] sm:$0x1]  ;;  %v1882_v37 = vsel %vm1786_vm0, %v1880_v31, %v6354_v14 }
  0x72   : > { %576 = vst [vmem:[#allocation3 + $0x3d8] sm:$0x3] %v528_v54  ;;  %2436 = vmatprep.mubr.bf16.mxu1 %v2139_v11  ;;  %v1889_v19 = vsel %vm1786_vm0, %v6354_v14, %v1888_v3  ;;  %v1562_v30 = vld [vmem:[#allocation3 + $0x200] sm:$0xfe]  ;;  %v1568_v32 = vld [vmem:[#allocation3 + $0x230] sm:$0x1]  ;;  %v2138_v39 = vpack.c.bf16 %v1872_v61, %v1864_v18  ;;  %v6415_v3 = vpack.c.bf16 %v6195_v8, %v6179_v57 }
  0x73   : > { %v6377_v34 = vld [vmem:[#allocation2 + $0x90] sm:$0xff]  ;;  %v6383_v38 = vld [vmem:[#allocation2 + $0x98] sm:$0xff]  ;;  %v2142_v46 = vpack.c.bf16 %v1889_v19, %v1882_v37  ;;  %v1877_v28 = vrot.slane %v1552_v15, 1  ;;  %v1886_v50 = vrot.slane %v1558_v22, 1  ;;  %v6389_v33 = vld [vmem:[#allocation2 + $0xa8] sm:$0xff]  ;;  %v1895_v5 = vrot.slane %v1562_v30, 1 }
  0x74   : > { %740 = vst [vmem:[#allocation3 + $0x130] sm:$0xff] %v6377_v34  ;;  %v627_v4 = vld [vmem:[#allocation2 + $0x178] sm:$0x3]  ;;  %741 = vst [vmem:[#allocation3 + $0x148] sm:$0xff] %v6383_v38  ;;  %v886_v51 = vpack.c.bf16 %v6383_v38, %v6377_v34  ;;  %v6391_v10 = vld [vmem:[#allocation2 + $0xb0] sm:$0xff]  ;;  %v1903_v53 = vrot.slane %v1568_v32, 1 }
  0x75   : > { %675 = vst [vmem:[#allocation3 + $0x428] sm:$0x3] %v627_v4  ;;  %743 = vst [vmem:[#allocation3 + $0x178] sm:$0xff] %v6389_v33  ;;  %v889_v17 = vpack.c.bf16 %v6391_v10, %v6389_v33  ;;  %v531_v55 = vld [vmem:[#allocation2 + $0x160] sm:$0x3]  ;;  %v5668_v56 = vld [vmem:[%s7245_s1 + $0x178] sm:$0xff]   ;;  %v1879_v59 = vsel %vm1786_vm0, %v1877_v28, %v6323_v16  ;;  %v1887_v11 = vsel %vm1786_vm0, %v6323_v16, %v1886_v50 }
  0x76   : > { %744 = vst [vmem:[#allocation3 + $0x190] sm:$0xff] %v6391_v10  ;;  %579 = vst [vmem:[#allocation3 + $0x420] sm:$0x3] %v531_v55  ;;  %v1561_v1 = vld [vmem:[#allocation3 + $0x1f8] sm:$0xfe]  ;;  %5346 = vmatprep.subr.bf16.mxu1 %v5668_v56  ;;  %v1897_v2 = vsel %vm1786_vm0, %v1895_v5, %v6394_v26  ;;  %v2141_v31 = vpack.c.bf16 %v1887_v11, %v1879_v59  ;;  %v6417_v54 = vld [vmem:[#allocation2 + $0xc0] sm:$0xff]  ;;  %v909_v59 = vpack.c.bf16 %v6205_v12, %v6200_v6 }
  0x77   : > { %v1567_v58 = vld [vmem:[#allocation3 + $0x228] sm:$0x1]  ;;  %v1571_v25 = vld [vmem:[#allocation3 + $0x248] sm:$0xfe]  ;;  %5347 = vmatpush3.bf16.msra.mxu1 %v5668_v56  ;;  %v1577_v9 = vld [vmem:[#allocation3 + $0x278] sm:$0x1] }
  0x78   : > { %1217 = vmatmul.mubr.bf16.gmra.mrb[36].mxu0 %v6311_v52  ;;  %v1904_v52 = vsel %vm1786_vm0, %v6394_v26, %v1903_v53  ;;  %v6419_v15 = vld [vmem:[#allocation2 + $0xc8] sm:$0xff]  ;;  %v1892_v22 = vrot.slane %v1561_v1, 1  ;;  %v1901_v18 = vrot.slane %v1567_v58, 1  ;;  %746 = vst [vmem:[#allocation3 + $0x1c0] sm:$0xff] %v6417_v54  ;;  %v630_v37 = vld [vmem:[#allocation2 + $0x190] sm:$0x3] }
  0x79   : > { %2437 = vmatmul.mubr.bf16.gmra.mrb[36].mxu1 %v2138_v39  ;;  %1224 = vmatprep.mubr.bf16.mxu0 %v6381_v40  ;;  %v2145_v16 = vpack.c.bf16 %v1904_v52, %v1897_v2  ;;  %747 = vst [vmem:[#allocation3 + $0x1d8] sm:$0xff] %v6419_v15  ;;  %v892_v61 = vpack.c.bf16 %v6419_v15, %v6417_v54  ;;  %v6425_v19 = vld [vmem:[#allocation2 + $0xd8] sm:$0xff]  ;;  %v1910_v30 = vrot.slane %v1571_v25, 1  ;;  %v6428_v57 = vrot.slane %v6264_v47, 1  ;;  %v6430_v39 = vld [vmem:[#allocation2 + $0xe0] sm:$0xff] }
  0x7a   : > { %2444 = vmatprep.mubr.bf16.mxu1 %v2142_v46  ;;  %v1918_v32 = vrot.slane %v1577_v9, 1  ;;  %678 = vst [vmem:[#allocation3 + $0x470] sm:$0x3] %v630_v37  ;;  %749 = vst [vmem:[#allocation3 + $0x208] sm:$0xff] %v6425_v19  ;;  %v534_v4 = vld [vmem:[#allocation2 + $0x178] sm:$0x3]  ;;  %v895_v46 = vpack.c.bf16 %v6430_v39, %v6425_v19  ;;  %v1894_v28 = vsel %vm1786_vm0, %v1892_v22, %v6354_v14 }
  0x7b   : > { %750 = vst [vmem:[#allocation3 + $0x220] sm:$0xff] %v6430_v39  ;;  %582 = vst [vmem:[#allocation3 + $0x468] sm:$0x3] %v534_v4  ;;  %v1570_v47 = vld [vmem:[#allocation3 + $0x240] sm:$0xfe]  ;;  %v1902_v50 = vsel %vm1786_vm0, %v6354_v14, %v1901_v18  ;;  %v6451_v14 = vld [vmem:[%s7245_s1 + $0x200] sm:$0xff]  }
  0x7c   : > { %v1919_v5 = vsel %vm1786_vm0, %v6428_v57, %v1918_v32  ;;  %v1576_v53 = vld [vmem:[#allocation3 + $0x270] sm:$0x1]  ;;  %v1580_v55 = vld [vmem:[#allocation3 + $0x290] sm:$0xfe]  ;;  %v1586_v56 = vld [vmem:[#allocation3 + $0x2c0] sm:$0x1]  ;;  %v2144_v58 = vpack.c.bf16 %v1902_v50, %v1894_v28  ;;  %5380 = vmatprep.subr.bf16.mxu1 %v6451_v14  ;;  %v912_v28 = vpack.c.bf16 %v6244_v42, %v6242_v36 }
  0x7d   : > { %v682_v1 = vld [vmem:[#allocation2 + $0x40] sm:$0x3]  ;;  %v1907_v2 = vrot.slane %v1570_v47, 1  ;;  %v1916_v52 = vrot.slane %v1576_v53, 1  ;;  %v1925_v25 = vrot.slane %v1580_v55, 1  ;;  %v6454_v9 = vrot.slane %v6119_v29, 1 }
  0x7e   : > { %730 = vst [vmem:[#allocation3 + $0x40] sm:$0x3] %v682_v1  ;;  %v688_v18 = vld [vmem:[#allocation2 + $0x70] sm:$0x3]  ;;  %v1589_v32 = vld [vmem:[#allocation3 + $0x2d8] sm:$0xfe] }
  0x7f   : > { %v1909_v6 = vsel %vm1786_vm0, %v1907_v2, %v6394_v26  ;;  %v1917_v22 = vsel %vm1786_vm0, %v6394_v26, %v1916_v52  ;;  %v1927_v29 = vsel %vm1786_vm0, %v1925_v25, %v6454_v9  ;;  %736 = vst [vmem:[#allocation3 + $0xd0] sm:$0x3] %v688_v18  ;;  %v1595_v4 = vld [vmem:[#allocation3 + $0x308] sm:$0x1]  ;;  %v691_v50 = vld [vmem:[#allocation2 + $0x88] sm:$0x3] }
  0x80   : > { %1225 = vmatmul.mubr.bf16.gmra.mrb[40].mxu0 %v6346_v62  ;;  %v1912_v62 = vsel %vm1786_vm0, %v1910_v30, %v6428_v57  ;;  %v1585_v30 = vld [vmem:[#allocation3 + $0x2b8] sm:$0x1]  ;;  %v2147_v47 = vpack.c.bf16 %v1917_v22, %v1909_v6  ;;  %739 = vst [vmem:[#allocation3 + $0x118] sm:$0x3] %v691_v50  ;;  %v1940_v53 = vrot.slane %v1589_v32, 1  ;;  %v1941_v55 = vrot.slane %v6156_v48, 1 }
  0x81   : > { %2445 = vmatmul.mubr.bf16.gmra.mrb[40].mxu1 %v2141_v31  ;;  %1232 = vmatprep.mubr.bf16.mxu0 %v6415_v3  ;;  %v2148_v11 = vpack.c.bf16 %v1919_v5, %v1912_v62  ;;  %v1933_v31 = vrot.slane %v1586_v56, 1  ;;  %v1931_v26 = vrot.slane %v1585_v30, 1  ;;  %v1948_v56 = vrot.slane %v1595_v4, 1  ;;  %v694_v1 = vld [vmem:[#allocation2 + $0xa0] sm:$0x3] }
  0x82   : > { %2452 = vmatprep.mubr.bf16.mxu1 %v2145_v16  ;;  %v685_v16 = vld [vmem:[#allocation2 + $0x58] sm:$0x3]  ;;  %742 = vst [vmem:[#allocation3 + $0x160] sm:$0x3] %v694_v1  ;;  %v1942_v2 = vsel %vm1786_vm0, %v1940_v53, %v1941_v55  ;;  %v1588_v48 = vld [vmem:[#allocation3 + $0x2d0] sm:$0xfe]  ;;  %v915_v6 = vpack.c.bf16 %v6258_v45, %v6247_v43 }
  0x83   : > { %733 = vst [vmem:[#allocation3 + $0x88] sm:$0x3] %v685_v16  ;;  %v1934_v37 = vsel %vm1786_vm0, %v6454_v9, %v1933_v31  ;;  %v1932_v36 = vsel %vm1786_vm0, %v6428_v57, %v1931_v26  ;;  %v1949_v52 = vsel %vm1786_vm0, %v1941_v55, %v1948_v56  ;;  %v1594_v25 = vld [vmem:[#allocation3 + $0x300] sm:$0x1]  ;;  %v1604_v31 = vld [vmem:[#allocation3 + $0x350] sm:$0x1]  ;;  %v918_v56 = vpack.c.bf16 %v6291_v41, %v6289_v20 }
  0x84   : > { %v2151_v62 = vpack.c.bf16 %v1934_v37, %v1927_v29  ;;  %v2154_v22 = vpack.c.bf16 %v1949_v52, %v1942_v2  ;;  %v1937_v18 = vrot.slane %v1588_v48, 1  ;;  %v1946_v29 = vrot.slane %v1594_v25, 1  ;;  %v700_v37 = vld [vmem:[#allocation2 + $0xd0] sm:$0x3]  ;;  %v703_v32 = vld [vmem:[#allocation2 + $0xe8] sm:$0x3] }
  0x85   : > { %v1963_v30 = vrot.slane %v1604_v31, 1  ;;  %748 = vst [vmem:[#allocation3 + $0x1f0] sm:$0x3] %v700_v37  ;;  %751 = vst [vmem:[#allocation3 + $0x238] sm:$0x3] %v703_v32 }
  0x86   : > { %v1939_v4 = vsel %vm1786_vm0, %v1937_v18, %v6454_v9  ;;  %v1947_v43 = vsel %vm1786_vm0, %v6454_v9, %v1946_v29  ;;  %v1613_v26 = vld [vmem:[#allocation3 + $0x398] sm:$0x1]  ;;  %v1971_v9 = vrot.slane %v6205_v12, 1  ;;  %v709_v52 = vld [vmem:[#allocation2 + $0x118] sm:$0x3] }
  0x87   : > { %v2153_v53 = vpack.c.bf16 %v1947_v43, %v1939_v4  ;;  %v1978_v2 = vrot.slane %v1613_v26, 1  ;;  %757 = vst [vmem:[#allocation3 + $0x2c8] sm:$0x3] %v709_v52  ;;  %v1616_v18 = vld [vmem:[#allocation3 + $0x3b0] sm:$0xfe] }
  0x88   : > { %1233 = vmatmul.mubr.bf16.gmra.mrb[44].mxu0 %v6381_v40  ;;  %v1579_v40 = vld [vmem:[#allocation3 + $0x288] sm:$0xfe]  ;;  %v1622_v29 = vld [vmem:[#allocation3 + $0x3e0] sm:$0x1]  ;;  %v1985_v32 = vrot.slane %v1616_v18, 1 }
  0x89   : > { %2453 = vmatmul.mubr.bf16.gmra.mrb[44].mxu1 %v2144_v58  ;;  %1240 = vmatprep.mubr.bf16.mxu0 %v909_v59  ;;  %v1922_v5 = vrot.slane %v1579_v40, 1  ;;  %v1979_v31 = vsel %vm1786_vm0, %v1971_v9, %v1978_v2  ;;  %v1993_v4 = vrot.slane %v1622_v29, 1  ;;  %v1631_v26 = vld [vmem:[#allocation3 + $0x428] sm:$0x1]  ;;  %v5663_v2 = vld [vmem:[%s7245_s1 + $0x188] sm:$0xff]  }
  0x8a   : > { %2460 = vmatprep.mubr.bf16.mxu1 %v2148_v11  ;;  %v697_v11 = vld [vmem:[#allocation2 + $0xb8] sm:$0x3]  ;;  %v724_v52 = vld [vmem:[#allocation2 + $0x190] sm:$0x3]  ;;  %v727_v0 = vld [vmem:[#allocation2 + $0x1a8] sm:$0x3] }
  0x8b   : > { %v1924_v58 = vsel %vm1786_vm0, %v1922_v5, %v6428_v57  ;;  %745 = vst [vmem:[#allocation3 + $0x1a8] sm:$0x3] %v697_v11  ;;  %v1956_v57 = vrot.slane %v6195_v8, 1  ;;  %v1603_v8 = vld [vmem:[#allocation3 + $0x348] sm:$0x1] }
  0x8c   : > { %v2150_v16 = vpack.c.bf16 %v1932_v36, %v1924_v58  ;;  %v1607_v5 = vld [vmem:[#allocation3 + $0x368] sm:$0xfe]  ;;  %v1961_v36 = vrot.slane %v1603_v8, 1  ;;  %v1621_v8 = vld [vmem:[#allocation3 + $0x3d8] sm:$0x1] }
  0x8d   : > { %v1970_v11 = vrot.slane %v1607_v5, 1  ;;  %v1625_v5 = vld [vmem:[#allocation3 + $0x3f8] sm:$0xfe]  ;;  %772 = vst [vmem:[#allocation3 + $0x430] sm:$0x3] %v724_v52 }
  0x8e   : > { %v1962_v25 = vsel %vm1786_vm0, %v1941_v55, %v1961_v36  ;;  %v6514_v36 = vrot.slane %v6258_v45, 1  ;;  %v5664_v45 = vld [vmem:[%s7245_s1 + $0x1d0] sm:$0xff]   ;;  %775 = vst [vmem:[#allocation3 + $0x478] sm:$0x3] %v727_v0  ;;  %v2788_v52 = vld [vmem:[#allocation3 + $0x30] sm:$0x3] }
  0x8f   : > { %v1972_v20 = vsel %vm1786_vm0, %v1970_v11, %v1971_v9  ;;  %v2008_v11 = vrot.slane %v1631_v26, 1 }
  0x90   : > { %1241 = vmatmul.mubr.bf16.gmra.mrb[48].mxu0 %v6415_v3  ;;  %v1598_v3 = vld [vmem:[#allocation3 + $0x320] sm:$0xfe] }
  0x91   : > { %2461 = vmatmul.mubr.bf16.gmra.mrb[48].mxu1 %v2147_v47  ;;  %1248 = vmatprep.mubr.bf16.mxu0 %v912_v28  ;;  %v1955_v40 = vrot.slane %v1598_v3, 1  ;;  %v1597_v47 = vld [vmem:[#allocation3 + $0x318] sm:$0xfe]  ;;  %v1606_v3 = vld [vmem:[#allocation3 + $0x360] sm:$0xfe] }
  0x92   : > { %2468 = vmatprep.mubr.bf16.mxu1 %v2151_v62  ;;  %v1964_v62 = vsel %vm1786_vm0, %v1956_v57, %v1963_v30  ;;  %v1952_v58 = vrot.slane %v1597_v47, 1  ;;  %v1967_v37 = vrot.slane %v1606_v3, 1  ;;  %v715_v30 = vld [vmem:[#allocation2 + $0x148] sm:$0x3] }
  0x93   : > { %v1957_v50 = vsel %vm1786_vm0, %v1955_v40, %v1956_v57  ;;  %763 = vst [vmem:[#allocation3 + $0x358] sm:$0x3] %v715_v30  ;;  %v5667_v30 = vld [vmem:[%s7245_s1 + $0x198] sm:$0xff]  }
  0x94   : > { %v2157_v1 = vpack.c.bf16 %v1964_v62, %v1957_v50  ;;  %v1954_v48 = vsel %vm1786_vm0, %v1952_v58, %v1941_v55  ;;  %v6493_v55 = vrot.slane %v6244_v42, 1  ;;  %v1969_v43 = vsel %vm1786_vm0, %v1967_v37, %v1956_v57  ;;  %v718_v50 = vld [vmem:[#allocation2 + $0x160] sm:$0x3]  ;;  %v1615_v62 = vld [vmem:[#allocation3 + $0x3a8] sm:$0xfe] }
  0x95   : > { %v2156_v12 = vpack.c.bf16 %v1962_v25, %v1954_v48  ;;  %766 = vst [vmem:[#allocation3 + $0x3a0] sm:$0x3] %v718_v50  ;;  %v5661_v42 = vld [vmem:[%s7245_s1 + $0x180] sm:$0xff]   ;;  %v2000_v58 = vrot.slane %v1625_v5, 1  ;;  %v1630_v25 = vld [vmem:[#allocation3 + $0x420] sm:$0x1] }
  0x96   : > { %v1994_v21 = vsel %vm1786_vm0, %v6493_v55, %v1993_v4  ;;  %v1624_v48 = vld [vmem:[#allocation3 + $0x3f0] sm:$0xfe]  ;;  %v2006_v18 = vrot.slane %v1630_v25, 1  ;;  %v2016_v37 = vrot.slane %v6291_v41, 1  ;;  %v1639_v4 = vld [vmem:[#allocation3 + $0x468] sm:$0x1] }
  0x97   : > { %v2002_v3 = vsel %vm1786_vm0, %v2000_v58, %v6514_v36  ;;  %v5669_v41 = vld [vmem:[%s7245_s1 + $0x1e0] sm:$0xff]   ;;  %v1506_v50 = vld [vmem:[#allocation3 + $0x40] sm:$0x1]  ;;  %v1509_v25 = vld [vmem:[#allocation3 + $0x58] sm:$0xfe] }
  0x98   : > { %1249 = vmatmul.mubr.bf16.gmra.mrb[52].mxu0 %v909_v59  ;;  %v706_v59 = vld [vmem:[#allocation2 + $0x100] sm:$0x3]  ;;  %v2007_v63 = vsel %vm1786_vm0, %v6493_v55, %v2006_v18 }
  0x99   : > { %2469 = vmatmul.mubr.bf16.gmra.mrb[52].mxu1 %v2150_v16  ;;  %1256 = vmatprep.mubr.bf16.mxu0 %v915_v6  ;;  %754 = vst [vmem:[#allocation3 + $0x280] sm:$0x3] %v706_v59  ;;  %v1612_v16 = vld [vmem:[#allocation3 + $0x390] sm:$0x1]  ;;  %v721_v59 = vld [vmem:[#allocation2 + $0x178] sm:$0x3] }
  0x9a   : > { %2476 = vmatprep.mubr.bf16.mxu1 %v2154_v22  ;;  %v712_v22 = vld [vmem:[#allocation2 + $0x130] sm:$0x3]  ;;  %v1976_v40 = vrot.slane %v1612_v16, 1  ;;  %769 = vst [vmem:[#allocation3 + $0x3e8] sm:$0x3] %v721_v59  ;;  %v1794_v59 = vrot.slane %v6307_v24, 1 }
  0x9b   : > { %760 = vst [vmem:[#allocation3 + $0x310] sm:$0x3] %v712_v22  ;;  %v1640_v16 = vld [vmem:[#allocation3 + $0x470] sm:$0x1]  ;;  %v5666_v22 = vld [vmem:[%s7245_s1 + $0x1d8] sm:$0xff]  }
  0x9c   : > { %v1977_v47 = vsel %vm1786_vm0, %v1956_v57, %v1976_v40  ;;  %v5662_v57 = vld [vmem:[%s7245_s1 + $0x1c8] sm:$0xff]   ;;  %v2023_v40 = vrot.slane %v1640_v16, 1  ;;  %v2782_v24 = vld [vmem:[#allocation3] sm:$0xfc] }
  0xa0   : > { %1257 = vmatmul.mubr.bf16.gmra.mrb[56].mxu0 %v912_v28  ;;  %v2160_v28 = vpack.c.bf16 %v1979_v31, %v1972_v20  ;;  %v2009_v20 = vsel %vm1786_vm0, %v6514_v36, %v2008_v11  ;;  %v1634_v31 = vld [vmem:[#allocation3 + $0x440] sm:$0xfe] }
  0xa1   : > { %2477 = vmatmul.mubr.bf16.gmra.mrb[56].mxu1 %v2153_v53  ;;  %1264 = vmatprep.mubr.bf16.mxu0 %v918_v56  ;;  %v1982_v53 = vrot.slane %v1615_v62, 1  ;;  %v1991_v56 = vrot.slane %v1621_v8, 1  ;;  %v2166_v29 = vpack.c.bf16 %v2009_v20, %v2002_v3  ;;  %v2786_v8 = vld [vmem:[#allocation3 + $0x20] sm:$0xff]  ;;  %v1515_v3 = vld [vmem:[#allocation3 + $0x88] sm:$0x1]  ;;  %v6581_v20 = vld [vmem:[#allocation2 + $0x8] sm:$0xff] }
  0xa2   : > { %2484 = vmatprep.mubr.bf16.mxu1 %v2157_v1  ;;  %v5673_v11 = vld [vmem:[%s7245_s1 + $0x1f0] sm:$0xff]   ;;  %v3072_v54 = vrot.slane %v6581_v20, 2 }
  0xa3   : > { %v1984_v44 = vsel %vm1786_vm0, %v1982_v53, %v1971_v9  ;;  %v5672_v53 = vld [vmem:[%s7245_s1 + $0x1a8] sm:$0xff]  }
  0xa8   : > { %1265 = vmatmul.mubr.bf16.gmra.mrb[60].mxu0 %v915_v6  ;;  %v1987_v6 = vsel %vm1786_vm0, %v1985_v32, %v6493_v55 }
  0xa9   : > { %2485 = vmatmul.mubr.bf16.gmra.mrb[60].mxu1 %v2156_v12  ;;  %5300 = vmatprep.mubr.bf16.mxu0 %v874_v23  ;;  %v2159_v23 = vpack.c.bf16 %v1977_v47, %v1969_v43  ;;  %v2163_v1 = vpack.c.bf16 %v1994_v21, %v1987_v6  ;;  %v1997_v12 = vrot.slane %v1624_v48, 1  ;;  %v5670_v43 = vld [vmem:[%s7245_s1 + $0x1a0] sm:$0xff]   ;;  %v5671_v6 = vld [vmem:[%s7245_s1 + $0x1e8] sm:$0xff]  }
  0xaa   : > { %2492 = vmatprep.mubr.bf16.mxu1 %v2160_v28  ;;  %v2015_v28 = vrot.slane %v1634_v31, 1  ;;  %v1500_v47 = vld [vmem:[#allocation3 + $0x10] sm:$0xfe] }
  0xab   : > { %v1999_v32 = vsel %vm1786_vm0, %v1997_v12, %v6493_v55  ;;  %v2783_v55 = vld [vmem:[#allocation3 + $0x8] sm:$0xfc]  ;;  %v1793_v26 = vrot.slane %v1500_v47, 1  ;;  %v3080_v12 = vrot.slane %v2788_v52, 2 }
  0xac   : > { %v2017_v34 = vsel %vm1786_vm0, %v2015_v28, %v2016_v37  ;;  %v2165_v62 = vpack.c.bf16 %v2007_v63, %v1999_v32  ;;  %v5675_v28 = vld [vmem:[%s7245_s1 + $0x1f8] sm:$0xff]   ;;  %v1815_v32 = vrot.slane %v1515_v3, 1 }
  0xb0   : > { %5301 = vmatmul.mubr.bf16.vlgmr.msra.gmra.mrb[64].mxu0 %v877_v49  ;;  %v1992_v49 = vsel %vm1786_vm0, %v1971_v9, %v1991_v56  ;;  %v5665_v9 = vld [vmem:[%s7245_s1 + $0x190] sm:$0xff]   ;;  %v3074_v56 = vrot.slane %v2783_v55, 2  ;;  %v2801_v55 = vld [vmem:[#allocation3 + $0x98] sm:$0xfc] }
  0xb1   : > { %2493 = vmatmul.mubr.bf16.gmra.mrb[64].mxu1 %v2159_v23  ;;  %5149 = vmatpush3.bf16.msra.mxu0 %v5661_v42  ;;  %v2789_v42 = vld [vmem:[#allocation3 + $0x38] sm:$0x3]  ;;  %v2021_v23 = vrot.slane %v1639_v4, 1 }
  0xb2   : > { %5150 = vmatprep.subr.bf16.mxu0 %v5662_v57  ;;  %5304 = vmatprep.mubr.bf16.mxu0 %v880_v27  ;;  %v2162_v27 = vpack.c.bf16 %v1992_v49, %v1984_v44  ;;  %v1800_v57 = vrot.slane %v1506_v50, 1  ;;  %v3082_v58 = vrot.slane %v2789_v42, 2  ;;  %v2792_v44 = vld [vmem:[#allocation3 + $0x50] sm:$0xfc]  ;;  %v2798_v49 = vld [vmem:[#allocation3 + $0x80] sm:$0x3] }
  0xb3   : > { %2500 = vmatprep.mubr.bf16.mxu1 %v2163_v1  ;;  %v3075_v1 = vrot.slane %v2786_v8, 2  ;;  %v3089_v18 = vrot.slane %v2792_v44, 2  ;;  %v2791_v50 = vld [vmem:[#allocation3 + $0x48] sm:$0xfc]  ;;  %v2804_v8 = vld [vmem:[#allocation3 + $0xb0] sm:$0xff]  ;;  %v1839_v44 = vrot.slane %v6361_v13, 1 }
  0xb4   : > { %v1801_v48 = vsel %vm1786_vm0, %v1794_v59, %v1800_v57  ;;  %v2807_v42 = vld [vmem:[#allocation3 + $0xc8] sm:$0x3] }
  0xb5   : > { %5151 = vmatpush3.bf16.msra.mxu0 %v5663_v2  ;;  %v2795_v2 = vld [vmem:[#allocation3 + $0x68] sm:$0xff]  ;;  %v3083_v0 = vsel %vm3070_vm1, %v3075_v1, %v3082_v58  ;;  %v1542_v58 = vld [vmem:[#allocation3 + $0x160] sm:$0x1] }
  0xb6   : > { %5152 = vmatprep.subr.bf16.mxu0 %v5664_v45  ;;  %v1795_v45 = vsel %vm1786_vm0, %v1793_v26, %v1794_v59  ;;  %v3090_v31 = vrot.slane %v2795_v2, 2  ;;  %v3105_v2 = vrot.slane %v2804_v8, 2  ;;  %v1860_v3 = vrot.slane %v1542_v58, 1  ;;  %v5680_v8 = vld [vmem:[%s7245_s1 + $0x218] sm:$0xff]  }
  0xb8   : > { %5305 = vmatmul.mubr.bf16.gmra.mrb[68].mxu0 %v883_v60  ;;  %v1633_v60 = vld [vmem:[#allocation3 + $0x438] sm:$0xfe]  ;;  %v3091_v47 = vsel %vm3070_vm1, %v3089_v18, %v3090_v31 }
  0xb9   : > { %2501 = vmatmul.mubr.bf16.gmra.mrb[68].mxu1 %v2162_v27  ;;  %5153 = vmatpush3.bf16.msra.mxu0 %v5665_v9  ;;  %v2012_v21 = vrot.slane %v1633_v60, 1  ;;  %v3071_v27 = vrot.slane %v2782_v24, 2  ;;  %v1524_v9 = vld [vmem:[#allocation3 + $0xd0] sm:$0x1]  ;;  %v1824_v60 = vrot.slane %v6350_v7, 1  ;;  %v3104_v24 = vrot.slane %v2801_v55, 2 }
  0xba   : > { %5154 = vmatprep.subr.bf16.mxu0 %v5666_v22  ;;  %5308 = vmatprep.mubr.bf16.mxu0 %v886_v51  ;;  %v2024_v51 = vsel %vm1786_vm0, %v2016_v37, %v2023_v40  ;;  %v5674_v22 = vld [vmem:[%s7245_s1 + $0x1b0] sm:$0xff]   ;;  %v2125_v37 = vpack.c.bf16 %v1801_v48, %v1795_v45  ;;  %v1808_v40 = vrot.slane %v1509_v25, 1  ;;  %v1830_v4 = vrot.slane %v1524_v9, 1  ;;  %v5678_v45 = vld [vmem:[%s7245_s1 + $0x208] sm:$0xff]  }
  0xbb   : > { %2508 = vmatprep.mubr.bf16.mxu1 %v2166_v29  ;;  %v2169_v5 = vpack.c.bf16 %v2024_v51, %v2017_v34  ;;  %v2014_v33 = vsel %vm1786_vm0, %v2012_v21, %v6514_v36  ;;  %v3097_v29 = vrot.slane %v2798_v49, 2  ;;  %v2794_v34 = vld [vmem:[#allocation3 + $0x60] sm:$0xff]  ;;  %v5676_v51 = vld [vmem:[%s7245_s1 + $0x1b8] sm:$0xff]   ;;  %v1854_v25 = vrot.slane %v6383_v38, 1 }
  0xbc   : > { %v1831_v21 = vsel %vm1786_vm0, %v1824_v60, %v1830_v4  ;;  %v3087_v26 = vrot.slane %v2794_v34, 2  ;;  %v2806_v9 = vld [vmem:[#allocation3 + $0xc0] sm:$0x3]  ;;  %v1560_v4 = vld [vmem:[#allocation3 + $0x1f0] sm:$0x1] }
  0xbd   : > { %5155 = vmatpush3.bf16.msra.mxu0 %v5667_v30  ;;  %v1809_v30 = vrot.slane %v6319_v35, 1  ;;  %v3081_v35 = vsel %vm3070_vm1, %v3072_v54, %v3080_v12  ;;  %v3098_v7 = vsel %vm3070_vm1, %v3090_v31, %v3097_v29  ;;  %v2816_v12 = vld [vmem:[#allocation3 + $0x110] sm:$0x3]  ;;  %v1861_v29 = vsel %vm1786_vm0, %v1854_v25, %v1860_v3 }
  0xbe   : > { %5156 = vmatprep.subr.bf16.mxu0 %v5669_v41  ;;  %v3411_v57 = vpack.c.bf16 %v3098_v7, %v3091_v47  ;;  %v1890_v55 = vrot.slane %v1560_v4, 1 }
  0xbf   : > { %v1810_v19 = vsel %vm1786_vm0, %v1808_v40, %v1809_v30 }
  0xc0   : > { %5309 = vmatmul.mubr.bf16.gmra.mrb[72].mxu0 %v889_v17  ;;  %v2022_v17 = vsel %vm1786_vm0, %v6514_v36, %v2021_v23  ;;  %v1518_v36 = vld [vmem:[#allocation3 + $0xa0] sm:$0xfe]  ;;  %v1527_v23 = vld [vmem:[#allocation3 + $0xe8] sm:$0xfe] }
  0xc1   : > { %2509 = vmatmul.mubr.bf16.gmra.mrb[72].mxu1 %v2165_v62  ;;  %5157 = vmatpush3.bf16.msra.mxu0 %v5670_v43  ;;  %v2168_v16 = vpack.c.bf16 %v2022_v17, %v2014_v33  ;;  %v1823_v41 = vrot.slane %v1518_v36, 1  ;;  %v3073_v43 = vsel %vm3070_vm1, %v3071_v27, %v3072_v54  ;;  %v2797_v62 = vld [vmem:[#allocation3 + $0x78] sm:$0x3]  ;;  %v3112_v33 = vrot.slane %v2807_v42, 2  ;;  %v2803_v36 = vld [vmem:[#allocation3 + $0xa8] sm:$0xff] }
  0xc2   : > { %5158 = vmatprep.subr.bf16.mxu0 %v5671_v6  ;;  %5312 = vmatprep.mubr.bf16.mxu0 %v892_v61  ;;  %v3076_v61 = vsel %vm3070_vm1, %v3074_v56, %v3075_v1  ;;  %v3407_v59 = vpack.c.bf16 %v3081_v35, %v3073_v43  ;;  %v3095_v56 = vrot.slane %v2797_v62, 2  ;;  %v1536_v1 = vld [vmem:[#allocation3 + $0x130] sm:$0xfe]  ;;  %v1838_v52 = vrot.slane %v1527_v23, 1 }
  0xc3   : > { %2516 = vmatprep.mubr.bf16.mxu1 %v2169_v5  ;;  %v3408_v63 = vpack.c.bf16 %v3083_v0, %v3076_v61  ;;  %v1825_v6 = vsel %vm1786_vm0, %v1823_v41, %v1824_v60  ;;  %v1533_v5 = vld [vmem:[#allocation3 + $0x118] sm:$0x1]  ;;  %v1853_v48 = vrot.slane %v1536_v1, 1  ;;  %v2800_v61 = vld [vmem:[#allocation3 + $0x90] sm:$0xfc]  ;;  %v3106_v27 = vsel %vm3070_vm1, %v3104_v24, %v3105_v2 }
  0xc4   : > { %v2131_v17 = vpack.c.bf16 %v1831_v21, %v1825_v6  ;;  %v1845_v49 = vrot.slane %v1533_v5, 1  ;;  %v3096_v0 = vsel %vm3070_vm1, %v3087_v26, %v3095_v56  ;;  %v3113_v13 = vsel %vm3070_vm1, %v3105_v2, %v3112_v33  ;;  %v1554_v60 = vld [vmem:[#allocation3 + $0x1c0] sm:$0xfe]  ;;  %v2809_v6 = vld [vmem:[#allocation3 + $0xd8] sm:$0xfc]  ;;  %v2812_v21 = vld [vmem:[#allocation3 + $0xf0] sm:$0xff] }
  0xc5   : > { %5159 = vmatpush3.bf16.msra.mxu0 %v5672_v53  ;;  %v3086_v53 = vrot.slane %v2791_v50, 2  ;;  %v1840_v38 = vsel %vm1786_vm0, %v1838_v52, %v1839_v44  ;;  %v1855_v18 = vsel %vm1786_vm0, %v1853_v48, %v1854_v25  ;;  %v3101_v40 = vrot.slane %v2800_v61, 2  ;;  %v2822_v56 = vld [vmem:[#allocation3 + $0x140] sm:$0xff]  ;;  %v2825_v1 = vld [vmem:[#allocation3 + $0x158] sm:$0x3]  ;;  %v6641_v48 = vld [vmem:[#allocation3 + $0x268] sm:$0xff] }
  0xc6   : > { %5160 = vmatprep.subr.bf16.mxu0 %v5673_v11  ;;  %v1846_v31 = vsel %vm1786_vm0, %v1839_v44, %v1845_v49  ;;  %v3110_v41 = vrot.slane %v2806_v9, 2  ;;  %v3127_v35 = vrot.slane %v2816_v12, 2  ;;  %v2137_v47 = vpack.c.bf16 %v1861_v29, %v1855_v18  ;;  %v1569_v24 = vld [vmem:[#allocation3 + $0x238] sm:$0x1]  ;;  %v1578_v25 = vld [vmem:[#allocation3 + $0x280] sm:$0x1] }
  0xc7   : > { %v3088_v54 = vsel %vm3070_vm1, %v3086_v53, %v3087_v26  ;;  %v2134_v43 = vpack.c.bf16 %v1846_v31, %v1840_v38  ;;  %v1869_v50 = vrot.slane %v6391_v10, 1  ;;  %v1563_v26 = vld [vmem:[#allocation3 + $0x208] sm:$0xfe]  ;;  %v3116_v2 = vrot.slane %v2809_v6, 2  ;;  %v2818_v18 = vld [vmem:[#allocation3 + $0x120] sm:$0xfc] }
  0xc8   : > { %5313 = vmatmul.mubr.bf16.gmra.mrb[76].mxu0 %v895_v46  ;;  %v1816_v46 = vsel %vm1786_vm0, %v1809_v30, %v1815_v32  ;;  %v3410_v30 = vpack.c.bf16 %v3096_v0, %v3088_v54  ;;  %v3414_v32 = vpack.c.bf16 %v3113_v13, %v3106_v27  ;;  %v2819_v53 = vld [vmem:[#allocation3 + $0x128] sm:$0xfc]  ;;  %v3117_v33 = vrot.slane %v2812_v21, 2  ;;  %v2821_v29 = vld [vmem:[#allocation3 + $0x138] sm:$0xff] }
  0xc9   : > { %2517 = vmatmul.mubr.bf16.gmra.mrb[76].mxu1 %v2168_v16  ;;  %5161 = vmatpush3.bf16.msra.mxu0 %v5674_v22  ;;  %v2128_v11 = vpack.c.bf16 %v1816_v46, %v1810_v19  ;;  %v2810_v16 = vld [vmem:[#allocation3 + $0xe0] sm:$0xfc]  ;;  %v2813_v22 = vld [vmem:[#allocation3 + $0xf8] sm:$0xff]  ;;  %v1883_v19 = vrot.slane %v1554_v60, 1  ;;  %v1884_v46 = vrot.slane %v6419_v15, 1  ;;  %v3134_v54 = vrot.slane %v2819_v53, 2 }
  0xca   : > { %5162 = vmatprep.subr.bf16.mxu0 %v5675_v28  ;;  %5348 = vmatprep.mubr.bf16.mxu1 %v2125_v37  ;;  %v1545_v28 = vld [vmem:[#allocation3 + $0x178] sm:$0xfe]  ;;  %v1551_v37 = vld [vmem:[#allocation3 + $0x1a8] sm:$0x1]  ;;  %v3119_v34 = vrot.slane %v2810_v16, 2  ;;  %v3135_v61 = vrot.slane %v2822_v56, 2  ;;  %v3118_v12 = vsel %vm3070_vm1, %v3116_v2, %v3117_v33 }
  0xcb   : > { %3680 = vmatprep.mubr.bf16.mxu0 %v3408_v63  ;;  %v3102_v63 = vrot.slane %v2803_v36, 2  ;;  %v1868_v7 = vrot.slane %v1545_v28, 1  ;;  %v1875_v62 = vrot.slane %v1551_v37, 1  ;;  %v2815_v15 = vld [vmem:[#allocation3 + $0x108] sm:$0x3]  ;;  %v1885_v58 = vsel %vm1786_vm0, %v1883_v19, %v1884_v46 }
  0xcc   : > { %v3125_v49 = vrot.slane %v2815_v15, 2  ;;  %v3142_v0 = vrot.slane %v2825_v1, 2  ;;  %v1898_v13 = vrot.slane %v1563_v26, 1  ;;  %v1899_v36 = vrot.slane %v6430_v39, 1  ;;  %v2834_v60 = vld [vmem:[#allocation3 + $0x1a0] sm:$0x3] }
  0xcd   : > { %5163 = vmatpush3.bf16.msra.mxu0 %v5676_v51  ;;  %v3120_v51 = vrot.slane %v2813_v22, 2  ;;  %v3103_v42 = vsel %vm3070_vm1, %v3101_v40, %v3102_v63  ;;  %v3111_v23 = vsel %vm3070_vm1, %v3102_v63, %v3110_v41  ;;  %v1905_v9 = vrot.slane %v1569_v24, 1  ;;  %v5682_v22 = vld [vmem:[%s7245_s1 + $0x228] sm:$0xff]   ;;  %v2828_v63 = vld [vmem:[#allocation3 + $0x170] sm:$0xfc]  ;;  %v2831_v41 = vld [vmem:[#allocation3 + $0x188] sm:$0xff] }
  0xce   : > { %v3413_v52 = vpack.c.bf16 %v3111_v23, %v3103_v42  ;;  %v1914_v31 = vrot.slane %v6641_v48, 1  ;;  %v1920_v16 = vrot.slane %v1578_v25, 1  ;;  %v3126_v39 = vsel %vm3070_vm1, %v3117_v33, %v3125_v49  ;;  %v1581_v40 = vld [vmem:[#allocation3 + $0x298] sm:$0xfe]  ;;  %v5684_v56 = vld [vmem:[%s7245_s1 + $0x238] sm:$0xff]   ;;  %v2840_v25 = vld [vmem:[#allocation3 + $0x1d0] sm:$0xff] }
  0xcf   : > { %v3121_v10 = vsel %vm3070_vm1, %v3119_v34, %v3120_v51  ;;  %v3128_v5 = vsel %vm3070_vm1, %v3120_v51, %v3127_v35  ;;  %v3136_v28 = vsel %vm3070_vm1, %v3134_v54, %v3135_v61  ;;  %v3143_v37 = vsel %vm3070_vm1, %v3135_v61, %v3142_v0  ;;  %v6656_v34 = vld [vmem:[#allocation3 + $0x2b0] sm:$0xff]  ;;  %v1587_v51 = vld [vmem:[#allocation3 + $0x2c8] sm:$0x1]  ;;  %v1599_v0 = vld [vmem:[#allocation3 + $0x328] sm:$0xfe] }
  0xd0   : > { %3681 = vmatmul.mubr.bf16.vlgmr.msra.gmra.mrb[80].mxu0 %v3407_v59  ;;  %v1870_v59 = vsel %vm1786_vm0, %v1868_v7, %v1869_v50  ;;  %v3417_v44 = vpack.c.bf16 %v3128_v5, %v3121_v10  ;;  %v3131_v35 = vrot.slane %v2818_v18, 2  ;;  %v5683_v7 = vld [vmem:[%s7245_s1 + $0x230] sm:$0xff]   ;;  %v3149_v6 = vrot.slane %v2828_v63, 2 }
  0xd1   : > { %5349 = vmatmul.mubr.bf16.vlgmr.msra.gmra.mrb[80].mxu1 %v2128_v11  ;;  %3688 = vmatprep.mubr.bf16.mxu0 %v3411_v57  ;;  %v1876_v57 = vsel %vm1786_vm0, %v1869_v50, %v1875_v62  ;;  %v1891_v11 = vsel %vm1786_vm0, %v1884_v46, %v1890_v55  ;;  %v3416_v50 = vpack.c.bf16 %v3126_v39, %v3118_v12  ;;  %v1590_v46 = vld [vmem:[#allocation3 + $0x2e0] sm:$0xfe]  ;;  %v6661_v55 = vld [vmem:[#allocation3 + $0x2f8] sm:$0xff]  ;;  %v3150_v21 = vrot.slane %v2831_v41, 2  ;;  %v1614_v12 = vld [vmem:[#allocation3 + $0x3a0] sm:$0x1] }
  0xd2   : > { %5381 = vmatpush3.bf16.msra.mxu1 %v6451_v14  ;;  %5352 = vmatprep.mubr.bf16.mxu1 %v2131_v17  ;;  %v5679_v14 = vld [vmem:[%s7245_s1 + $0x210] sm:$0xff]   ;;  %v5681_v17 = vld [vmem:[%s7245_s1 + $0x220] sm:$0xff]   ;;  %v2140_v3 = vpack.c.bf16 %v1876_v57, %v1870_v59  ;;  %v2143_v27 = vpack.c.bf16 %v1891_v11, %v1885_v58  ;;  %v3420_v62 = vpack.c.bf16 %v3143_v37, %v3136_v28  ;;  %v3157_v23 = vrot.slane %v2834_v60, 2  ;;  %v2827_v58 = vld [vmem:[#allocation3 + $0x168] sm:$0xfc] }
  0xd3   : > { %5382 = vmatprep.subr.bf16.mxu1 %v5678_v45  ;;  %v1928_v5 = vrot.slane %v1581_v40, 1  ;;  %v1929_v26 = vrot.slane %v6656_v34, 1  ;;  %v1935_v15 = vrot.slane %v1587_v51, 1  ;;  %v1943_v59 = vrot.slane %v1590_v46, 1  ;;  %v2830_v11 = vld [vmem:[#allocation3 + $0x180] sm:$0xff] }
  0xd4   : > { %v1944_v57 = vrot.slane %v6661_v55, 1  ;;  %v3151_v2 = vsel %vm3070_vm1, %v3149_v6, %v3150_v21  ;;  %v3158_v33 = vsel %vm3070_vm1, %v3150_v21, %v3157_v23  ;;  %v3165_v39 = vrot.slane %v2840_v25, 2  ;;  %v2846_v46 = vld [vmem:[#allocation3 + $0x200] sm:$0xfc]  ;;  %v6690_v23 = vld [vmem:[#allocation3 + $0x3d0] sm:$0xff] }
  0xd5   : > { %v1936_v49 = vsel %vm1786_vm0, %v1929_v26, %v1935_v15  ;;  %v1958_v40 = vrot.slane %v1599_v0, 1  ;;  %v1980_v41 = vrot.slane %v1614_v12, 1 }
  0xd6   : > { %5383 = vmatpush3.bf16.msra.mxu1 %v5678_v45  ;;  %v1572_v45 = vld [vmem:[#allocation3 + $0x250] sm:$0xfe]  ;;  %v1945_v54 = vsel %vm1786_vm0, %v1943_v59, %v1944_v57 }
  0xd7   : > { %5384 = vmatprep.subr.bf16.mxu1 %v5679_v14  ;;  %v1913_v38 = vrot.slane %v1572_v45, 1  ;;  %v2837_v45 = vld [vmem:[#allocation3 + $0x1b8] sm:$0xfc] }
  0xd8   : > { %3689 = vmatmul.mubr.bf16.gmra.mrb[84].mxu0 %v3410_v30  ;;  %v1900_v30 = vsel %vm1786_vm0, %v1898_v13, %v1899_v36  ;;  %v3146_v13 = vrot.slane %v2827_v58, 2 }
  0xd9   : > { %5353 = vmatmul.mubr.bf16.gmra.mrb[84].mxu1 %v2134_v43  ;;  %3696 = vmatprep.mubr.bf16.mxu0 %v3414_v32  ;;  %v1906_v32 = vsel %vm1786_vm0, %v1899_v36, %v1905_v9  ;;  %v1915_v4 = vsel %vm1786_vm0, %v1913_v38, %v1914_v31  ;;  %v1921_v43 = vsel %vm1786_vm0, %v1914_v31, %v1920_v16  ;;  %v3147_v36 = vrot.slane %v2830_v11, 2  ;;  %v1608_v16 = vld [vmem:[#allocation3 + $0x370] sm:$0xfe] }
  0xda   : > { %5356 = vmatprep.mubr.bf16.mxu1 %v2137_v47  ;;  %5385 = vmatpush3.bf16.msra.mxu1 %v5679_v14  ;;  %v2824_v14 = vld [vmem:[#allocation3 + $0x150] sm:$0x3]  ;;  %v3132_v47 = vrot.slane %v2821_v29, 2  ;;  %v2146_v42 = vpack.c.bf16 %v1906_v32, %v1900_v30  ;;  %v2149_v10 = vpack.c.bf16 %v1921_v43, %v1915_v4  ;;  %v3423_v38 = vpack.c.bf16 %v3158_v33, %v3151_v2  ;;  %v2836_v4 = vld [vmem:[#allocation3 + $0x1b0] sm:$0xfc]  ;;  %v2839_v43 = vld [vmem:[#allocation3 + $0x1c8] sm:$0xff] }
  0xdb   : > { %5386 = vmatprep.subr.bf16.mxu1 %v5680_v8  ;;  %v3140_v19 = vrot.slane %v2824_v14, 2  ;;  %v3164_v29 = vrot.slane %v2837_v45, 2  ;;  %v1973_v32 = vrot.slane %v1608_v16, 1  ;;  %v3148_v60 = vsel %vm3070_vm1, %v3146_v13, %v3147_v36 }
  0xdc   : > { %v3133_v1 = vsel %vm3070_vm1, %v3131_v35, %v3132_v47  ;;  %v3179_v11 = vrot.slane %v2846_v46, 2 }
  0xdd   : > { %v3141_v24 = vsel %vm3070_vm1, %v3132_v47, %v3140_v19  ;;  %v3166_v35 = vsel %vm3070_vm1, %v3164_v29, %v3165_v39  ;;  %v2858_v29 = vld [vmem:[#allocation3 + $0x260] sm:$0xff] }
  0xde   : > { %5387 = vmatpush3.bf16.msra.mxu1 %v5680_v8  ;;  %v1596_v8 = vld [vmem:[#allocation3 + $0x310] sm:$0x1]  ;;  %v3419_v9 = vpack.c.bf16 %v3141_v24, %v3133_v1 }
  0xdf   : > { %5388 = vmatprep.subr.bf16.mxu1 %v5681_v17  ;;  %v1950_v53 = vrot.slane %v1596_v8, 1  ;;  %v2849_v8 = vld [vmem:[#allocation3 + $0x218] sm:$0xff]  ;;  %v1632_v1 = vld [vmem:[#allocation3 + $0x430] sm:$0x1] }
  0xe0   : > { %3697 = vmatmul.mubr.bf16.gmra.mrb[88].mxu0 %v3413_v52  ;;  %v2833_v52 = vld [vmem:[#allocation3 + $0x198] sm:$0x3]  ;;  %v3180_v24 = vrot.slane %v2849_v8, 2 }
  0xe1   : > { %5357 = vmatmul.mubr.bf16.gmra.mrb[88].mxu1 %v2140_v3  ;;  %3704 = vmatprep.mubr.bf16.mxu0 %v3417_v44  ;;  %v1930_v44 = vsel %vm1786_vm0, %v1928_v5, %v1929_v26  ;;  %v2843_v3 = vld [vmem:[#allocation3 + $0x1e8] sm:$0x3]  ;;  %v1951_v61 = vsel %vm1786_vm0, %v1944_v57, %v1950_v53  ;;  %v3155_v31 = vrot.slane %v2833_v52, 2  ;;  %v3161_v5 = vrot.slane %v2836_v4, 2  ;;  %v1626_v53 = vld [vmem:[#allocation3 + $0x400] sm:$0xfe] }
  0xe2   : > { %5360 = vmatprep.mubr.bf16.mxu1 %v2143_v27  ;;  %5389 = vmatpush3.bf16.msra.mxu1 %v5681_v17  ;;  %v6672_v17 = vld [vmem:[#allocation3 + $0x340] sm:$0xff]  ;;  %v1605_v27 = vld [vmem:[#allocation3 + $0x358] sm:$0x1]  ;;  %v2152_v18 = vpack.c.bf16 %v1936_v49, %v1930_v44  ;;  %v3172_v28 = vrot.slane %v2843_v3, 2  ;;  %v2155_v37 = vpack.c.bf16 %v1951_v61, %v1945_v54  ;;  %v3162_v26 = vrot.slane %v2839_v43, 2 }
  0xe3   : > { %5390 = vmatprep.subr.bf16.mxu1 %v5682_v22  ;;  %v1959_v14 = vrot.slane %v6672_v17, 1  ;;  %v1965_v30 = vrot.slane %v1605_v27, 1  ;;  %v3156_v51 = vsel %vm3070_vm1, %v3147_v36, %v3155_v31  ;;  %v1989_v44 = vrot.slane %v6690_v23, 1  ;;  %v1635_v54 = vld [vmem:[#allocation3 + $0x448] sm:$0xfe] }
  0xe4   : > { %v3173_v47 = vsel %vm3070_vm1, %v3165_v39, %v3172_v28  ;;  %v3422_v15 = vpack.c.bf16 %v3156_v51, %v3148_v60  ;;  %v2003_v45 = vrot.slane %v1626_v53, 1  ;;  %v2010_v3 = vrot.slane %v1632_v1, 1  ;;  %v2845_v36 = vld [vmem:[#allocation3 + $0x1f8] sm:$0xfc]  ;;  %v2861_v39 = vld [vmem:[#allocation3 + $0x278] sm:$0x3] }
  0xe5   : > { %v1966_v19 = vsel %vm1786_vm0, %v1959_v14, %v1965_v30  ;;  %v3426_v59 = vpack.c.bf16 %v3173_v47, %v3166_v35  ;;  %v3163_v61 = vsel %vm3070_vm1, %v3161_v5, %v3162_v26  ;;  %v3181_v27 = vsel %vm3070_vm1, %v3179_v11, %v3180_v24  ;;  %v2790_v51 = vld [vmem:[#allocation3 + $0x40] sm:$0x3]  ;;  %v2864_v11 = vld [vmem:[#allocation3 + $0x290] sm:$0xfc] }
  0xe6   : > { %5391 = vmatpush3.bf16.msra.mxu1 %v5682_v22  ;;  %v6678_v22 = vld [vmem:[#allocation3 + $0x388] sm:$0xff]  ;;  %v2018_v12 = vrot.slane %v1635_v54, 1  ;;  %v2019_v30 = vrot.slane %v6581_v20, 1  ;;  %v3176_v60 = vrot.slane %v2845_v36, 2  ;;  %v2793_v20 = vld [vmem:[#allocation3 + $0x58] sm:$0xfc] }
  0xe7   : > { %5392 = vmatprep.subr.bf16.mxu1 %v5683_v7  ;;  %v1974_v63 = vrot.slane %v6678_v22, 1 }
  0xe8   : > { %3705 = vmatmul.mubr.bf16.gmra.mrb[92].mxu0 %v3416_v50  ;;  %v2842_v50 = vld [vmem:[#allocation3 + $0x1e0] sm:$0x3] }
  0xe9   : > { %5361 = vmatmul.mubr.bf16.gmra.mrb[92].mxu1 %v2146_v42  ;;  %3712 = vmatprep.mubr.bf16.mxu0 %v3420_v62  ;;  %v1960_v62 = vsel %vm1786_vm0, %v1958_v40, %v1959_v14  ;;  %v2852_v42 = vld [vmem:[#allocation3 + $0x230] sm:$0x3]  ;;  %v1975_v6 = vsel %vm1786_vm0, %v1973_v32, %v1974_v63  ;;  %v1981_v21 = vsel %vm1786_vm0, %v1974_v63, %v1980_v41  ;;  %v3170_v57 = vrot.slane %v2842_v50, 2  ;;  %v1641_v14 = vld [vmem:[#allocation3 + $0x478] sm:$0x1]  ;;  %v2787_v63 = vld [vmem:[#allocation3 + $0x28] sm:$0xff] }
  0xea   : > { %5364 = vmatprep.mubr.bf16.mxu1 %v2149_v10  ;;  %5393 = vmatpush3.bf16.msra.mxu1 %v5683_v7  ;;  %v1617_v7 = vld [vmem:[#allocation3 + $0x3b8] sm:$0xfe]  ;;  %v1623_v10 = vld [vmem:[#allocation3 + $0x3e8] sm:$0x1]  ;;  %v2158_v58 = vpack.c.bf16 %v1966_v19, %v1960_v62  ;;  %v3187_v2 = vrot.slane %v2852_v42, 2  ;;  %v2161_v33 = vpack.c.bf16 %v1981_v21, %v1975_v6  ;;  %v3202_v50 = vrot.slane %v2861_v39, 2 }
  0xeb   : > { %5394 = vmatprep.subr.bf16.mxu1 %v5684_v56  ;;  %v1988_v52 = vrot.slane %v1617_v7, 1  ;;  %v1995_v49 = vrot.slane %v1623_v10, 1  ;;  %v3171_v0 = vsel %vm3070_vm1, %v3162_v26, %v3170_v57  ;;  %v2784_v32 = vld [vmem:[#allocation3 + $0x10] sm:$0xfc]  ;;  %v3195_v7 = vrot.slane %v2858_v29, 2  ;;  %v2857_v21 = vld [vmem:[#allocation3 + $0x258] sm:$0xff] }
  0xec   : > { %v3188_v13 = vsel %vm3070_vm1, %v3180_v24, %v3187_v2  ;;  %v3425_v28 = vpack.c.bf16 %v3171_v0, %v3163_v61  ;;  %v2025_v19 = vrot.slane %v1641_v14, 1  ;;  %v3077_v46 = vrot.slane %v2784_v32, 2  ;;  %v2854_v42 = vld [vmem:[#allocation3 + $0x240] sm:$0xfc]  ;;  %v2860_v10 = vld [vmem:[#allocation3 + $0x270] sm:$0x3] }
  0xed   : > { %v1990_v31 = vsel %vm1786_vm0, %v1988_v52, %v1989_v44  ;;  %v1996_v16 = vsel %vm1786_vm0, %v1989_v44, %v1995_v49  ;;  %v3429_v41 = vpack.c.bf16 %v3188_v13, %v3181_v27  ;;  %v3078_v8 = vrot.slane %v2787_v63, 2  ;;  %v2867_v24 = vld [vmem:[#allocation3 + $0x2a8] sm:$0xff]  ;;  %v2870_v49 = vld [vmem:[#allocation3 + $0x2c0] sm:$0x3]  ;;  %v2802_v61 = vld [vmem:[#allocation3 + $0xa0] sm:$0xfc] }
  0xee   : > { %5395 = vmatpush3.bf16.msra.mxu1 %v5684_v56  ;;  %v6692_v56 = vld [vmem:[#allocation3 + $0x418] sm:$0xff]  ;;  %v2164_v35 = vpack.c.bf16 %v1996_v16, %v1990_v31  ;;  %v3084_v6 = vrot.slane %v2790_v51, 2  ;;  %v3203_v53 = vsel %vm3070_vm1, %v3195_v7, %v3202_v50  ;;  %v3191_v1 = vrot.slane %v2854_v42, 2  ;;  %v2808_v27 = vld [vmem:[#allocation3 + $0xd0] sm:$0x3]  ;;  %v2814_v51 = vld [vmem:[#allocation3 + $0x100] sm:$0xff] }
  0xef   : > { %v2004_v25 = vrot.slane %v6692_v56, 1  ;;  %v2026_v2 = vsel %vm1786_vm0, %v2019_v30, %v2025_v19  ;;  %v3200_v52 = vrot.slane %v2860_v10, 2  ;;  %v3092_v44 = vrot.slane %v2793_v20, 2  ;;  %v2805_v0 = vld [vmem:[#allocation3 + $0xb8] sm:$0xff]  ;;  %v2879_v10 = vld [vmem:[#allocation3 + $0x308] sm:$0x3] }
  0xf0   : > { %3713 = vmatmul.mubr.bf16.gmra.mrb[96].mxu0 %v3419_v9  ;;  %v2848_v9 = vld [vmem:[#allocation3 + $0x210] sm:$0xff]  ;;  %v3085_v54 = vsel %vm3070_vm1, %v3078_v8, %v3084_v6  ;;  %v3210_v31 = vrot.slane %v2867_v24, 2  ;;  %v3217_v39 = vrot.slane %v2870_v49, 2  ;;  %v3108_v32 = vrot.slane %v2805_v0, 2  ;;  %v2873_v19 = vld [vmem:[#allocation3 + $0x2d8] sm:$0xfc] }
  0xf1   : > { %5365 = vmatmul.mubr.bf16.gmra.mrb[0].mxu1 %v2152_v18  ;;  %3720 = vmatprep.mubr.bf16.mxu0 %v3423_v38  ;;  %v2851_v38 = vld [vmem:[#allocation3 + $0x228] sm:$0x3]  ;;  %v2855_v18 = vld [vmem:[#allocation3 + $0x248] sm:$0xfc]  ;;  %v2011_v40 = vsel %vm1786_vm0, %v2004_v25, %v2010_v3  ;;  %v3177_v4 = vrot.slane %v2848_v9, 2  ;;  %v3079_v3 = vsel %vm3070_vm1, %v3077_v46, %v3078_v8  ;;  %v3114_v63 = vrot.slane %v2808_v27, 2 }
  0xf2   : > { %5368 = vmatprep.mubr.bf16.mxu1 %v2155_v37  ;;  %v2005_v37 = vsel %vm1786_vm0, %v2003_v45, %v2004_v25  ;;  %v3185_v43 = vrot.slane %v2851_v38, 2  ;;  %v3194_v47 = vrot.slane %v2855_v18, 2  ;;  %v3209_v38 = vrot.slane %v2864_v11, 2 }
  0xf3   : > { %v2167_v62 = vpack.c.bf16 %v2011_v40, %v2005_v37  ;;  %v3178_v5 = vsel %vm3070_vm1, %v3176_v60, %v3177_v4  ;;  %v2866_v37 = vld [vmem:[#allocation3 + $0x2a0] sm:$0xff]  ;;  %v3409_v14 = vpack.c.bf16 %v3085_v54, %v3079_v3  ;;  %v3218_v46 = vsel %vm3070_vm1, %v3210_v31, %v3217_v39  ;;  %v2875_v39 = vld [vmem:[#allocation3 + $0x2e8] sm:$0xff] }
  0xf4   : > { %v3186_v26 = vsel %vm3070_vm1, %v3177_v4, %v3185_v43  ;;  %v3196_v57 = vsel %vm3070_vm1, %v3194_v47, %v3195_v7  ;;  %v2811_v43 = vld [vmem:[#allocation3 + $0xe8] sm:$0xfc]  ;;  %v3211_v50 = vsel %vm3070_vm1, %v3209_v38, %v3210_v31  ;;  %v3207_v42 = vrot.slane %v2866_v37, 2  ;;  %v2829_v37 = vld [vmem:[#allocation3 + $0x178] sm:$0xfc] }
  0xf5   : > { %v3428_v25 = vpack.c.bf16 %v3186_v26, %v3178_v5  ;;  %v3432_v29 = vpack.c.bf16 %v3203_v53, %v3196_v57  ;;  %v3115_v5 = vsel %vm3070_vm1, %v3108_v32, %v3114_v63  ;;  %v3122_v26 = vrot.slane %v2811_v43, 2  ;;  %v2820_v53 = vld [vmem:[#allocation3 + $0x130] sm:$0xfc]  ;;  %v2888_v43 = vld [vmem:[#allocation3 + $0x350] sm:$0x3] }
  0xf6   : > { %v3224_v24 = vrot.slane %v2873_v19, 2  ;;  %v2844_v19 = vld [vmem:[#allocation3 + $0x1f0] sm:$0x3] }
  0xf8   : > { %3721 = vmatmul.mubr.bf16.gmra.mrb[100].mxu0 %v3422_v15  ;;  %v2796_v15 = vld [vmem:[#allocation3 + $0x70] sm:$0xff] }
  0xf9   : > { %5369 = vmatmul.mubr.bf16.gmra.mrb[4].mxu1 %v2158_v58  ;;  %3728 = vmatprep.mubr.bf16.mxu0 %v3426_v59  ;;  %v2020_v59 = vsel %vm1786_vm0, %v2018_v12, %v2019_v30  ;;  %v2799_v58 = vld [vmem:[#allocation3 + $0x88] sm:$0x3]  ;;  %v3093_v36 = vrot.slane %v2796_v15, 2  ;;  %v3107_v30 = vrot.slane %v2802_v61, 2  ;;  %v3123_v15 = vrot.slane %v2814_v51, 2 }
  0xfa   : > { %5372 = vmatprep.mubr.bf16.mxu1 %v2161_v33  ;;  %v3192_v33 = vrot.slane %v2857_v21, 2  ;;  %v3099_v9 = vrot.slane %v2799_v58, 2  ;;  %v2170_v18 = vpack.c.bf16 %v2026_v2, %v2020_v59  ;;  %v2876_v21 = vld [vmem:[#allocation3 + $0x2f0] sm:$0xff] }
  0xfb   : > { %v3094_v47 = vsel %vm3070_vm1, %v3092_v44, %v3093_v36  ;;  %v3109_v20 = vsel %vm3070_vm1, %v3107_v30, %v3108_v32  ;;  %v3225_v2 = vrot.slane %v2876_v21, 2  ;;  %v3124_v27 = vsel %vm3070_vm1, %v3122_v26, %v3123_v15 }
  0xfc   : > { %v3193_v4 = vsel %vm3070_vm1, %v3191_v1, %v3192_v33  ;;  %v3100_v7 = vsel %vm3070_vm1, %v3093_v36, %v3099_v9  ;;  %v2823_v1 = vld [vmem:[#allocation3 + $0x148] sm:$0xff]  ;;  %v3415_v3 = vpack.c.bf16 %v3115_v5, %v3109_v20 }
  0xfd   : > { %v3138_v38 = vrot.slane %v2823_v1, 2 }
 0x100   : > { %3729 = vmatmul.mubr.bf16.gmra.mrb[104].mxu0 %v3425_v28  ;;  %v2863_v28 = vld [vmem:[#allocation3 + $0x288] sm:$0xfc] }
 0x101   : > { %5373 = vmatmul.mubr.bf16.gmra.mrb[8].mxu1 %v2164_v35  ;;  %3736 = vmatprep.mubr.bf16.mxu0 %v3429_v41  ;;  %v2869_v41 = vld [vmem:[#allocation3 + $0x2b8] sm:$0x3]  ;;  %v3201_v35 = vsel %vm3070_vm1, %v3192_v33, %v3200_v52  ;;  %v3206_v8 = vrot.slane %v2863_v28, 2  ;;  %v3232_v33 = vrot.slane %v2879_v10, 2  ;;  %v2826_v52 = vld [vmem:[#allocation3 + $0x160] sm:$0x3] }
 0x102   : > { %5376 = vmatprep.mubr.bf16.mxu1 %v2167_v62  ;;  %v2817_v62 = vld [vmem:[#allocation3 + $0x118] sm:$0x3]  ;;  %v3215_v6 = vrot.slane %v2869_v41, 2  ;;  %v3431_v11 = vpack.c.bf16 %v3201_v35, %v3193_v4  ;;  %v3144_v31 = vrot.slane %v2826_v52, 2  ;;  %v2878_v28 = vld [vmem:[#allocation3 + $0x300] sm:$0x3] }
 0x103   : > { %v4892_v45 = vpop.f32.mrb[0].mxu0  ;;  %v3129_v57 = vrot.slane %v2817_v62, 2  ;;  %v3208_v61 = vsel %vm3070_vm1, %v3206_v8, %v3207_v42  ;;  %v2882_v41 = vld [vmem:[#allocation3 + $0x320] sm:$0xfc]  ;;  %v2885_v4 = vld [vmem:[#allocation3 + $0x338] sm:$0xff]  ;;  %v3230_v8 = vrot.slane %v2878_v28, 2 }
 0x104   : > { %v4893_v13 = vpop.f32.mrb[1].mxu0  ;;  %v3216_v0 = vsel %vm3070_vm1, %v3207_v42, %v3215_v6  ;;  %v2838_v62 = vld [vmem:[#allocation3 + $0x1c0] sm:$0xfc]  ;;  %v3152_v42 = vrot.slane %v2829_v37, 2  ;;  %v2841_v10 = vld [vmem:[#allocation3 + $0x1d8] sm:$0xff]  ;;  %v3239_v26 = vrot.slane %v2882_v41, 2 }
 0x105   : > { %v6713_v16 = vadd.f32 %v4893_v13, %v4892_v45  ;;  %v4895_v12 = vpop.f32.mrb[2].mxu0  ;;  %v3412_v45 = vpack.c.bf16 %v3100_v7, %v3094_v47  ;;  %v3137_v13 = vrot.slane %v2820_v53, 2  ;;  %v3130_v9 = vsel %vm3070_vm1, %v3123_v15, %v3129_v57  ;;  %v2881_v57 = vld [vmem:[#allocation3 + $0x318] sm:$0xfc] }
 0x106   : > { %v4896_v40 = vpop.f32.mrb[3].mxu0  ;;  %v3434_v30 = vpack.c.bf16 %v3216_v0, %v3208_v61  ;;  %v3418_v32 = vpack.c.bf16 %v3130_v9, %v3124_v27  ;;  %v3145_v7 = vsel %vm3070_vm1, %v3138_v38, %v3144_v31  ;;  %v3240_v15 = vrot.slane %v2885_v4, 2  ;;  %v2894_v27 = vld [vmem:[#allocation3 + $0x380] sm:$0xff] }
 0x107   : > { %v6715_v60 = vadd.f32 %v4896_v40, %v4895_v12  ;;  %v2872_v12 = vld [vmem:[#allocation3 + $0x2d0] sm:$0xfc]  ;;  %v3139_v47 = vsel %vm3070_vm1, %v3137_v13, %v3138_v38  ;;  %v3168_v52 = vrot.slane %v2841_v10, 2  ;;  %v3236_v38 = vrot.slane %v2881_v57, 2  ;;  %v2890_v10 = vld [vmem:[#allocation3 + $0x360] sm:$0xfc] }
 0x108   : > { %3737 = vmatmul.mubr.bf16.gmra.mrb[108].mxu0 %v3428_v25  ;;  %v3435_v25 = vpack.c.bf16 %v3218_v46, %v3211_v50  ;;  %v2832_v40 = vld [vmem:[#allocation3 + $0x190] sm:$0xff]  ;;  %v3221_v63 = vrot.slane %v2872_v12, 2  ;;  %v3222_v50 = vrot.slane %v2875_v39, 2  ;;  %v3421_v1 = vpack.c.bf16 %v3145_v7, %v3139_v47  ;;  %v2891_v12 = vld [vmem:[#allocation3 + $0x368] sm:$0xfc]  ;;  %v2893_v57 = vld [vmem:[#allocation3 + $0x378] sm:$0xff] }
 0x109   : > { %5377 = vmatmul.mubr.bf16.gmra.mrb[12].mxu1 %v2170_v18  ;;  %3744 = vmatprep.mubr.bf16.mxu0 %v3432_v29  ;;  %v3226_v18 = vsel %vm3070_vm1, %v3224_v24, %v3225_v2  ;;  %v3233_v29 = vsel %vm3070_vm1, %v3225_v2, %v3232_v33  ;;  %v3153_v6 = vrot.slane %v2832_v40, 2  ;;  %v2847_v24 = vld [vmem:[#allocation3 + $0x208] sm:$0xfc]  ;;  %v3167_v33 = vrot.slane %v2838_v62, 2 }
 0x10a   : > { %5396 = vmatprep.mubr.bf16.mxu1 %v3409_v14  ;;  %v2835_v14 = vld [vmem:[#allocation3 + $0x1a8] sm:$0x3]  ;;  %v3438_v35 = vpack.c.bf16 %v3233_v29, %v3226_v18  ;;  %v3241_v13 = vsel %vm3070_vm1, %v3239_v26, %v3240_v15  ;;  %v2897_v18 = vld [vmem:[#allocation3 + $0x398] sm:$0x3]  ;;  %v3182_v39 = vrot.slane %v2847_v24, 2  ;;  %v3254_v4 = vrot.slane %v2891_v12, 2 }
 0x10b   : > { %v4898_v59 = vpop.f32.mrb[4].mxu0  ;;  %v3159_v21 = vrot.slane %v2835_v14, 2  ;;  %v3154_v61 = vsel %vm3070_vm1, %v3152_v42, %v3153_v6  ;;  %v3169_v14 = vsel %vm3070_vm1, %v3167_v33, %v3168_v52  ;;  %v2903_v24 = vld [vmem:[#allocation3 + $0x3c8] sm:$0xff] }
 0x10c   : > { %v4899_v58 = vpop.f32.mrb[5].mxu0 }
 0x10d   : > { %v6725_v44 = vadd.f32 %v4899_v58, %v4898_v59  ;;  %v4901_v49 = vpop.f32.mrb[6].mxu0  ;;  %v3247_v59 = vrot.slane %v2888_v43, 2  ;;  %v2884_v58 = vld [vmem:[#allocation3 + $0x330] sm:$0xff]  ;;  %v3160_v0 = vsel %vm3070_vm1, %v3153_v6, %v3159_v21  ;;  %v3255_v43 = vrot.slane %v2894_v27, 2 }
 0x10e   : > { %v4902_v54 = vpop.f32.mrb[7].mxu0  ;;  %v3237_v31 = vrot.slane %v2884_v58, 2 }
 0x10f   : > { %v6730_v36 = vadd.f32 %v4902_v54, %v4901_v49  ;;  %v3174_v49 = vrot.slane %v2844_v19, 2  ;;  %v3231_v54 = vsel %vm3070_vm1, %v3222_v50, %v3230_v8  ;;  %v3248_v9 = vsel %vm3070_vm1, %v3240_v15, %v3247_v59 }
 0x110   : > { %3745 = vmatmul.mubr.bf16.gmra.mrb[112].mxu0 %v3431_v11  ;;  %v2887_v11 = vld [vmem:[#allocation3 + $0x348] sm:$0x3]  ;;  %v3441_v62 = vpack.c.bf16 %v3248_v9, %v3241_v13  ;;  %v3238_v19 = vsel %vm3070_vm1, %v3236_v38, %v3237_v31  ;;  %v3198_v15 = vrot.slane %v6641_v48, 2 }
 0x111   : > { %5397 = vmatmul.mubr.bf16.vlgmr.msra.gmra.mrb[80].mxu1 %v3412_v45  ;;  %3752 = vmatprep.mubr.bf16.mxu0 %v3435_v25  ;;  %v2850_v45 = vld [vmem:[#allocation3 + $0x220] sm:$0xff]  ;;  %v2853_v25 = vld [vmem:[#allocation3 + $0x238] sm:$0x3]  ;;  %v3245_v29 = vrot.slane %v2887_v11, 2  ;;  %v2865_v11 = vld [vmem:[#allocation3 + $0x298] sm:$0xfc] }
 0x112   : > { %5400 = vmatprep.mubr.bf16.mxu1 %v3415_v3  ;;  %v3223_v3 = vsel %vm3070_vm1, %v3221_v63, %v3222_v50  ;;  %v3183_v28 = vrot.slane %v2850_v45, 2  ;;  %v3189_v37 = vrot.slane %v2853_v25, 2  ;;  %v3424_v50 = vpack.c.bf16 %v3160_v0, %v3154_v61  ;;  %v2906_v45 = vld [vmem:[#allocation3 + $0x3e0] sm:$0x3]  ;;  %v2874_v61 = vld [vmem:[#allocation3 + $0x2e0] sm:$0xfc] }
 0x113   : > { %v4904_v51 = vpop.f32.mrb[8].mxu0  ;;  %v3437_v41 = vpack.c.bf16 %v3231_v54, %v3223_v3  ;;  %v3246_v42 = vsel %vm3070_vm1, %v3237_v31, %v3245_v29  ;;  %v3251_v25 = vrot.slane %v2890_v10, 2  ;;  %v3252_v3 = vrot.slane %v2893_v57, 2  ;;  %v2880_v31 = vld [vmem:[#allocation3 + $0x310] sm:$0x3] }
 0x114   : > { %v4905_v46 = vpop.f32.mrb[9].mxu0  ;;  %v6754_v6 = vsel %vm3070_vm1, %v3182_v39, %v3183_v28  ;;  %v6757_v21 = vsel %vm3070_vm1, %v3183_v28, %v3189_v37  ;;  %v3440_v33 = vpack.c.bf16 %v3246_v42, %v3238_v19  ;;  %v3212_v38 = vrot.slane %v2865_v11, 2  ;;  %v2905_v42 = vld [vmem:[#allocation3 + $0x3d8] sm:$0x3]  ;;  %v2909_v11 = vld [vmem:[#allocation3 + $0x3f8] sm:$0xfc] }
 0x115   : > { %v6737_v20 = vadd.f32 %v4905_v46, %v4904_v51  ;;  %v4907_v5 = vpop.f32.mrb[10].mxu0  ;;  %v3262_v51 = vrot.slane %v2897_v18, 2  ;;  %v3430_v48 = vpack.c.bf16 %v6757_v21, %v6754_v6  ;;  %v3213_v29 = vrot.slane %v6656_v34, 2  ;;  %v2883_v6 = vld [vmem:[#allocation3 + $0x328] sm:$0xfc] }
 0x116   : > { %v4908_v53 = vpop.f32.mrb[11].mxu0  ;;  %v3270_v37 = vrot.slane %v2903_v24, 2  ;;  %v2915_v24 = vld [vmem:[#allocation3 + $0x428] sm:$0x3] }
 0x117   : > { %v6739_v2 = vadd.f32 %v4908_v53, %v4907_v5  ;;  %v2896_v53 = vld [vmem:[#allocation3 + $0x390] sm:$0x3]  ;;  %v3263_v58 = vsel %vm3070_vm1, %v3255_v43, %v3262_v51 }
 0x118   : > { %3753 = vmatmul.mubr.bf16.gmra.mrb[116].mxu0 %v3434_v30  ;;  %v3175_v30 = vsel %vm3070_vm1, %v3168_v52, %v3174_v49  ;;  %v2871_v52 = vld [vmem:[#allocation3 + $0x2c8] sm:$0x3]  ;;  %v2900_v49 = vld [vmem:[#allocation3 + $0x3b0] sm:$0xfc]  ;;  %v3260_v54 = vrot.slane %v2896_v53, 2 }
 0x119   : > { %5401 = vmatmul.mubr.bf16.gmra.mrb[84].mxu1 %v3418_v32  ;;  %3760 = vmatprep.mubr.bf16.mxu0 %v3438_v35  ;;  %v2856_v32 = vld [vmem:[#allocation3 + $0x250] sm:$0xfc]  ;;  %v2862_v35 = vld [vmem:[#allocation3 + $0x280] sm:$0x3]  ;;  %v3427_v8 = vpack.c.bf16 %v3175_v30, %v3169_v14  ;;  %v3219_v39 = vrot.slane %v2871_v52, 2  ;;  %v3269_v28 = vrot.slane %v2900_v49, 2 }
 0x11a   : > { %5404 = vmatprep.mubr.bf16.mxu1 %v3421_v1  ;;  %v3197_v26 = vrot.slane %v2856_v32, 2  ;;  %v3204_v59 = vrot.slane %v2862_v35, 2  ;;  %v3256_v1 = vsel %vm3070_vm1, %v3254_v4, %v3255_v43  ;;  %v3277_v32 = vrot.slane %v2906_v45, 2 }
 0x11b   : > { %v4910_v40 = vpop.f32.mrb[12].mxu0  ;;  %v3444_v27 = vpack.c.bf16 %v3263_v58, %v3256_v1  ;;  %v3220_v10 = vsel %vm3070_vm1, %v3213_v29, %v3219_v39  ;;  %v3275_v52 = vrot.slane %v2905_v42, 2  ;;  %v3242_v49 = vrot.slane %v2883_v6, 2  ;;  %v2908_v42 = vld [vmem:[#allocation3 + $0x3f0] sm:$0xfc] }
 0x11c   : > { %v4911_v63 = vpop.f32.mrb[13].mxu0  ;;  %v3199_v13 = vsel %vm3070_vm1, %v3197_v26, %v3198_v15  ;;  %v3205_v9 = vsel %vm3070_vm1, %v3198_v15, %v3204_v59  ;;  %v3271_v26 = vsel %vm3070_vm1, %v3269_v28, %v3270_v37  ;;  %v2889_v15 = vld [vmem:[#allocation3 + $0x358] sm:$0x3]  ;;  %v2912_v59 = vld [vmem:[#allocation3 + $0x410] sm:$0xff]  ;;  %v3278_v57 = vsel %vm3070_vm1, %v3270_v37, %v3277_v32  ;;  %v2914_v6 = vld [vmem:[#allocation3 + $0x420] sm:$0x3] }
 0x11d   : > { %v6749_v47 = vadd.f32 %v4911_v63, %v4910_v40  ;;  %v4913_v7 = vpop.f32.mrb[14].mxu0  ;;  %v3227_v63 = vrot.slane %v2874_v61, 2  ;;  %v3433_v35 = vpack.c.bf16 %v3205_v9, %v3199_v13  ;;  %v3243_v45 = vrot.slane %v6672_v17, 2 }
 0x11e   : > { %v4914_v46 = vpop.f32.mrb[15].mxu0  ;;  %v3284_v13 = vrot.slane %v2909_v11, 2  ;;  %v3285_v9 = vrot.slane %v2912_v59, 2  ;;  %v3447_v39 = vpack.c.bf16 %v3278_v57, %v3271_v26  ;;  %v2907_v26 = vld [vmem:[#allocation3 + $0x3e8] sm:$0x3]  ;;  %v2921_v11 = vld [vmem:[#allocation3 + $0x458] sm:$0xff] }
 0x11f   : > { %v6759_v5 = vadd.f32 %v4914_v46, %v4913_v7  ;;  %v3234_v7 = vrot.slane %v2880_v31, 2  ;;  %v3253_v46 = vsel %vm3070_vm1, %v3251_v25, %v3252_v3 }
 0x120   : > { %3761 = vmatmul.mubr.bf16.gmra.mrb[120].mxu0 %v3437_v41  ;;  %v3228_v41 = vrot.slane %v6661_v55, 2  ;;  %v3214_v55 = vsel %vm3070_vm1, %v3212_v38, %v3213_v29  ;;  %v3292_v38 = vrot.slane %v2915_v24, 2  ;;  %v2910_v24 = vld [vmem:[#allocation3 + $0x400] sm:$0xfc] }
 0x121   : > { %5405 = vmatmul.mubr.bf16.gmra.mrb[88].mxu1 %v3424_v50  ;;  %3768 = vmatprep.mubr.bf16.mxu0 %v3441_v62  ;;  %v2899_v50 = vld [vmem:[#allocation3 + $0x3a8] sm:$0xfc]  ;;  %v2902_v62 = vld [vmem:[#allocation3 + $0x3c0] sm:$0xff]  ;;  %v3436_v29 = vpack.c.bf16 %v3220_v10, %v3214_v55  ;;  %v2901_v55 = vld [vmem:[#allocation3 + $0x3b8] sm:$0xfc] }
 0x122   : > { %5408 = vmatprep.mubr.bf16.mxu1 %v3427_v8  ;;  %v3261_v8 = vsel %vm3070_vm1, %v3252_v3, %v3260_v54  ;;  %v3229_v53 = vsel %vm3070_vm1, %v3227_v63, %v3228_v41  ;;  %v3266_v1 = vrot.slane %v2899_v50, 2  ;;  %v3267_v58 = vrot.slane %v2902_v62, 2  ;;  %v2892_v54 = vld [vmem:[#allocation3 + $0x370] sm:$0xfc] }
 0x123   : > { %v4916_v0 = vpop.f32.mrb[16].mxu0  ;;  %v3443_v3 = vpack.c.bf16 %v3261_v8, %v3253_v46  ;;  %v3244_v63 = vsel %vm3070_vm1, %v3242_v49, %v3243_v45  ;;  %v3293_v46 = vsel %vm3070_vm1, %v3285_v9, %v3292_v38  ;;  %v2911_v8 = vld [vmem:[#allocation3 + $0x408] sm:$0xff] }
 0x124   : > { %v5028_v12 = vpop.f32.mrb[16].mxu1  ;;  %v4917_v18 = vpop.f32.mrb[17].mxu0  ;;  %v3276_v32 = vsel %vm3070_vm1, %v3267_v58, %v3275_v52 }
 0x125   : > { %v6769_v40 = vadd.f32 %v4917_v18, %v4916_v0  ;;  %v5029_v14 = vpop.f32.mrb[17].mxu1  ;;  %v4919_v30 = vpop.f32.mrb[18].mxu0 }
 0x126   : > { %v6772_v4 = vadd.f32 %v5029_v14, %v5028_v12  ;;  %v5031_v43 = vpop.f32.mrb[18].mxu1  ;;  %v4920_v51 = vpop.f32.mrb[19].mxu0 }
 0x127   : > { %v6774_v34 = vadd.f32 %v4920_v51, %v4919_v30  ;;  %v5032_v19 = vpop.f32.mrb[19].mxu1  ;;  %v3268_v30 = vsel %vm3070_vm1, %v3266_v1, %v3267_v58  ;;  %v3257_v51 = vrot.slane %v2892_v54, 2  ;;  %v3272_v54 = vrot.slane %v2901_v55, 2 }
 0x128   : > { %v6778_v21 = vadd.f32 %v5032_v19, %v5031_v43  ;;  %3769 = vmatmul.mubr.bf16.gmra.mrb[124].mxu0 %v3440_v33  ;;  %v3235_v33 = vsel %vm3070_vm1, %v3228_v41, %v3234_v7  ;;  %v3286_v19 = vsel %vm3070_vm1, %v3284_v13, %v3285_v9  ;;  %v3446_v10 = vpack.c.bf16 %v3276_v32, %v3268_v30 }
 0x129   : > { %5409 = vmatmul.mubr.bf16.gmra.mrb[92].mxu1 %v3430_v48  ;;  %3776 = vmatprep.mubr.bf16.mxu0 %v3444_v27  ;;  %v2898_v48 = vld [vmem:[#allocation3 + $0x3a0] sm:$0x3]  ;;  %v3249_v27 = vrot.slane %v2889_v15, 2  ;;  %v3439_v28 = vpack.c.bf16 %v3235_v33, %v3229_v53  ;;  %v2924_v15 = vld [vmem:[#allocation3 + $0x470] sm:$0x3]  ;;  %v3450_v53 = vpack.c.bf16 %v3293_v46, %v3286_v19  ;;  %v3279_v13 = vrot.slane %v2907_v26, 2 }
 0x12a   : > { %5412 = vmatprep.mubr.bf16.mxu1 %v3433_v35  ;;  %v3258_v35 = vrot.slane %v6678_v22, 2  ;;  %v3264_v7 = vrot.slane %v2898_v48, 2  ;;  %v2918_v22 = vld [vmem:[#allocation3 + $0x440] sm:$0xfc]  ;;  %v2916_v33 = vld [vmem:[#allocation3 + $0x430] sm:$0x3] }
 0x12b   : > { %v4922_v25 = vpop.f32.mrb[20].mxu0  ;;  %v3250_v62 = vsel %vm3070_vm1, %v3243_v45, %v3249_v27  ;;  %v3281_v45 = vrot.slane %v2908_v42, 2  ;;  %v3273_v27 = vrot.slane %v6690_v23, 2  ;;  %v3299_v9 = vrot.slane %v2918_v22, 2  ;;  %v2920_v19 = vld [vmem:[#allocation3 + $0x450] sm:$0xff] }
 0x12c   : > { %v5034_v61 = vpop.f32.mrb[20].mxu1  ;;  %v4923_v0 = vpop.f32.mrb[21].mxu0  ;;  %v3442_v57 = vpack.c.bf16 %v3250_v62, %v3244_v63  ;;  %v3259_v1 = vsel %vm3070_vm1, %v3257_v51, %v3258_v35  ;;  %v3265_v58 = vsel %vm3070_vm1, %v3258_v35, %v3264_v7  ;;  %v3287_v30 = vrot.slane %v2910_v24, 2  ;;  %v2917_v62 = vld [vmem:[#allocation3 + $0x438] sm:$0xfc] }
 0x12d   : > { %v6787_v31 = vadd.f32 %v4923_v0, %v4922_v25  ;;  %v5035_v12 = vpop.f32.mrb[21].mxu1  ;;  %v4925_v18 = vpop.f32.mrb[22].mxu0  ;;  %v3282_v25 = vrot.slane %v2911_v8, 2  ;;  %v3288_v32 = vrot.slane %v6692_v56, 2  ;;  %v3294_v63 = vrot.slane %v2916_v33, 2 }
 0x12e   : > { %v6789_v37 = vadd.f32 %v5035_v12, %v5034_v61  ;;  %v5037_v17 = vpop.f32.mrb[22].mxu1  ;;  %v4926_v14 = vpop.f32.mrb[23].mxu0  ;;  %v3274_v35 = vsel %vm3070_vm1, %v3272_v54, %v3273_v27  ;;  %v3280_v7 = vsel %vm3070_vm1, %v3273_v27, %v3279_v13  ;;  %v2923_v8 = vld [vmem:[#allocation3 + $0x468] sm:$0x3]  ;;  %v2919_v42 = vld [vmem:[#allocation3 + $0x448] sm:$0xfc] }
 0x12f   : > { %v6794_v41 = vadd.f32 %v4926_v14, %v4925_v18  ;;  %v5038_v43 = vpop.f32.mrb[23].mxu1  ;;  %v3283_v23 = vsel %vm3070_vm1, %v3281_v45, %v3282_v25  ;;  %v3289_v55 = vsel %vm3070_vm1, %v3287_v30, %v3288_v32  ;;  %v2925_v26 = vld [vmem:[#allocation3 + $0x478] sm:$0x3] }
 0x130   : > { %v6797_v50 = vadd.f32 %v5038_v43, %v5037_v17  ;;  %3777 = vmatmul.mubr.bf16.gmra.mrb[128].mxu0 %v3443_v3  ;;  %v3290_v3 = vrot.slane %v2914_v6, 2  ;;  %v3309_v27 = vrot.slane %v2925_v26, 2 }
 0x131   : > { %5413 = vmatmul.mubr.bf16.gmra.mrb[0].mxu1 %v3436_v29  ;;  %3784 = vmatprep.mubr.bf16.mxu0 %v3447_v39  ;;  %v3445_v29 = vpack.c.bf16 %v3265_v58, %v3259_v1  ;;  %v3300_v39 = vrot.slane %v2921_v11, 2  ;;  %v3297_v1 = vrot.slane %v2920_v19, 2 }
 0x132   : > { %5416 = vmatprep.mubr.bf16.mxu1 %v3439_v28  ;;  %v3307_v28 = vrot.slane %v2924_v15, 2  ;;  %v3291_v51 = vsel %vm3070_vm1, %v3282_v25, %v3290_v3 }
 0x133   : > { %v4928_v59 = vpop.f32.mrb[24].mxu0  ;;  %v3301_v46 = vsel %vm3070_vm1, %v3299_v9, %v3300_v39 }
 0x134   : > { %v5040_v52 = vpop.f32.mrb[24].mxu1  ;;  %v4929_v49 = vpop.f32.mrb[25].mxu0  ;;  %v3308_v56 = vsel %vm3070_vm1, %v3300_v39, %v3307_v28 }
 0x135   : > { %v6804_v48 = vadd.f32 %v4929_v49, %v4928_v59  ;;  %v5041_v61 = vpop.f32.mrb[25].mxu1  ;;  %v4931_v0 = vpop.f32.mrb[26].mxu0  ;;  %v3449_v59 = vpack.c.bf16 %v3291_v51, %v3283_v23  ;;  %v3453_v33 = vpack.c.bf16 %v3308_v56, %v3301_v46  ;;  %v3302_v49 = vrot.slane %v2919_v42, 2 }
 0x136   : > { %v6807_v38 = vadd.f32 %v5041_v61, %v5040_v52  ;;  %v5043_v12 = vpop.f32.mrb[26].mxu1  ;;  %v4932_v18 = vpop.f32.mrb[27].mxu0  ;;  %v3305_v52 = vrot.slane %v2923_v8, 2  ;;  %v5686_v61 = vld [vmem:[#allocation2 + $0x8] sm:$0xff] }
 0x137   : > { %v6809_v17 = vadd.f32 %v4932_v18, %v4931_v0  ;;  %v5044_v14 = vpop.f32.mrb[27].mxu1  ;;  %v3303_v0 = vrot.slane %v5686_v61, 2 }
 0x138   : > { %v6812_v43 = vadd.f32 %v5044_v14, %v5043_v12  ;;  %3785 = vmatmul.mubr.bf16.gmra.mrb[132].mxu0 %v3446_v10  ;;  %v3295_v10 = vsel %vm3070_vm1, %v3288_v32, %v3294_v63 }
 0x139   : > { %5417 = vmatmul.mubr.bf16.gmra.mrb[4].mxu1 %v3442_v57  ;;  %3792 = vmatprep.mubr.bf16.mxu0 %v3450_v53  ;;  %v3448_v57 = vpack.c.bf16 %v3280_v7, %v3274_v35  ;;  %v3296_v53 = vrot.slane %v2917_v62, 2  ;;  %v3451_v54 = vpack.c.bf16 %v3295_v10, %v3289_v55  ;;  %v3304_v39 = vsel %vm3070_vm1, %v3302_v49, %v3303_v0 }
 0x13a   : > { %5420 = vmatprep.mubr.bf16.mxu1 %v3445_v29  ;;  %v3306_v29 = vsel %vm3070_vm1, %v3297_v1, %v3305_v52  ;;  %v3310_v28 = vsel %vm3070_vm1, %v3303_v0, %v3309_v27 }
 0x13b   : > { %v4934_v6 = vpop.f32.mrb[28].mxu0  ;;  %v3298_v18 = vsel %vm3070_vm1, %v3296_v53, %v3297_v1  ;;  %v3454_v7 = vpack.c.bf16 %v3310_v28, %v3304_v39 }
 0x13c   : > { %v5046_v22 = vpop.f32.mrb[28].mxu1  ;;  %v4935_v15 = vpop.f32.mrb[29].mxu0  ;;  %v3452_v63 = vpack.c.bf16 %v3306_v29, %v3298_v18 }
 0x13d   : > { %v6822_v58 = vadd.f32 %v4935_v15, %v4934_v6  ;;  %v5047_v11 = vpop.f32.mrb[29].mxu1  ;;  %v4937_v24 = vpop.f32.mrb[30].mxu0 }
 0x13e   : > { %v6824_v45 = vadd.f32 %v5047_v11, %v5046_v22  ;;  %v5049_v25 = vpop.f32.mrb[30].mxu1  ;;  %v4938_v3 = vpop.f32.mrb[31].mxu0 }
 0x13f   : > { %v6826_v13 = vadd.f32 %v4938_v3, %v4937_v24  ;;  %v5050_v9 = vpop.f32.mrb[31].mxu1 }
 0x140   : > { %v6828_v12 = vadd.f32 %v5050_v9, %v5049_v25  ;;  %3793 = vmatmul.mubr.bf16.gmra.mrb[136].mxu0 %v3449_v59 }
 0x141   : > { %5421 = vmatmul.mubr.bf16.gmra.mrb[8].mxu1 %v3448_v57  ;;  %3800 = vmatprep.mubr.bf16.mxu0 %v3453_v33 }
 0x142   : > { %5424 = vmatprep.mubr.bf16.mxu1 %v3451_v54 }
 0x143   : > { %v4940_v14 = vpop.f32.mrb[32].mxu0 }
 0x144   : > { %v5052_v30 = vpop.f32.mrb[32].mxu1  ;;  %v4941_v32 = vpop.f32.mrb[33].mxu0 }
 0x145   : > { %v4942_v23 = vadd.f32 %v4941_v32, %v4940_v14  ;;  %v5053_v51 = vpop.f32.mrb[33].mxu1  ;;  %v4943_v35 = vpop.f32.mrb[34].mxu0 }
 0x146   : > { %v6834_v62 = vadd.f32 %v5053_v51, %v5052_v30  ;;  %v5055_v19 = vpop.f32.mrb[34].mxu1  ;;  %v4944_v46 = vpop.f32.mrb[35].mxu0 }
 0x147   : > { %v4945_v56 = vadd.f32 %v4944_v46, %v4943_v35  ;;  %v5056_v8 = vpop.f32.mrb[35].mxu1 }
 0x148   : > { %v6836_v42 = vadd.f32 %v5056_v8, %v5055_v19  ;;  %3801 = vmatmul.mubr.bf16.gmra.mrb[140].mxu0 %v3452_v63 }
 0x149   : > { %5425 = vmatmul.mubr.bf16.gmra.mrb[12].mxu1 %v3454_v7 }
 0x14b   : > { %v4946_v6 = vpop.f32.mrb[36].mxu0 }
 0x14c   : > { %v5058_v55 = vpop.f32.mrb[36].mxu1  ;;  %v4947_v10 = vpop.f32.mrb[37].mxu0 }
 0x14d   : > { %v4948_v26 = vadd.f32 %v4947_v10, %v4946_v6  ;;  %v5059_v22 = vpop.f32.mrb[37].mxu1  ;;  %v4949_v15 = vpop.f32.mrb[38].mxu0 }
 0x14e   : > { %v6838_v59 = vadd.f32 %v5059_v22, %v5058_v55  ;;  %v5061_v57 = vpop.f32.mrb[38].mxu1  ;;  %v4950_v53 = vpop.f32.mrb[39].mxu0 }
 0x14f   : > { %v4951_v1 = vadd.f32 %v4950_v53, %v4949_v15  ;;  %v5062_v11 = vpop.f32.mrb[39].mxu1 }
 0x150   : > { %v6840_v24 = vadd.f32 %v5062_v11, %v5061_v57 }
 0x153   : > { %v4952_v33 = vpop.f32.mrb[40].mxu0 }
 0x154   : > { %v5064_v52 = vpop.f32.mrb[40].mxu1  ;;  %v4953_v49 = vpop.f32.mrb[41].mxu0 }
 0x155   : > { %v4954_v25 = vadd.f32 %v4953_v49, %v4952_v33  ;;  %v5065_v3 = vpop.f32.mrb[41].mxu1  ;;  %v4955_v54 = vpop.f32.mrb[42].mxu0 }
 0x156   : > { %v6842_v61 = vadd.f32 %v5065_v3, %v5064_v52  ;;  %v5067_v0 = vpop.f32.mrb[42].mxu1  ;;  %v4956_v27 = vpop.f32.mrb[43].mxu0 }
 0x157   : > { %v4957_v9 = vadd.f32 %v4956_v27, %v4955_v54  ;;  %v5068_v18 = vpop.f32.mrb[43].mxu1 }
 0x158   : > { %v6844_v29 = vadd.f32 %v5068_v18, %v5067_v0 }
 0x15b   : > { %v4958_v39 = vpop.f32.mrb[44].mxu0 }
 0x15c   : > { %v5070_v28 = vpop.f32.mrb[44].mxu1  ;;  %v4959_v14 = vpop.f32.mrb[45].mxu0 }
 0x15d   : > { %v4960_v30 = vadd.f32 %v4959_v14, %v4958_v39  ;;  %v5071_v32 = vpop.f32.mrb[45].mxu1  ;;  %v4961_v63 = vpop.f32.mrb[46].mxu0 }
 0x15e   : > { %v6846_v51 = vadd.f32 %v5071_v32, %v5070_v28  ;;  %v5073_v35 = vpop.f32.mrb[46].mxu1  ;;  %v4962_v7 = vpop.f32.mrb[47].mxu0 }
 0x15f   : > { %v4963_v19 = vadd.f32 %v4962_v7, %v4961_v63  ;;  %v5074_v46 = vpop.f32.mrb[47].mxu1 }
 0x160   : > { %v6848_v8 = vadd.f32 %v5074_v46, %v5073_v35 }
 0x163   : > { %v4964_v6 = vpop.f32.mrb[48].mxu0 }
 0x164   : > { %v5076_v55 = vpop.f32.mrb[48].mxu1  ;;  %v4965_v10 = vpop.f32.mrb[49].mxu0 }
 0x165   : > { %v6850_v22 = vadd.f32 %v4965_v10, %v4964_v6  ;;  %v5077_v15 = vpop.f32.mrb[49].mxu1  ;;  %v4967_v57 = vpop.f32.mrb[50].mxu0 }
 0x166   : > { %v5078_v53 = vadd.f32 %v5077_v15, %v5076_v55  ;;  %v5079_v11 = vpop.f32.mrb[50].mxu1  ;;  %v4968_v33 = vpop.f32.mrb[51].mxu0 }
 0x167   : > { %v6852_v52 = vadd.f32 %v4968_v33, %v4967_v57  ;;  %v5080_v49 = vpop.f32.mrb[51].mxu1 }
 0x168   : > { %v6854_v3 = vadd.f32 %v5078_v53, %v4942_v23  ;;  %v5081_v54 = vadd.f32 %v5080_v49, %v5079_v11 }
 0x16a   : > { %v6856_v0 = vadd.f32 %v5081_v54, %v4945_v56 }
 0x16b   : > { %v4970_v27 = vpop.f32.mrb[52].mxu0 }
 0x16c   : > { %v5082_v18 = vpop.f32.mrb[52].mxu1  ;;  %v4971_v39 = vpop.f32.mrb[53].mxu0 }
 0x16d   : > { %v6858_v28 = vadd.f32 %v4971_v39, %v4970_v27  ;;  %v5083_v14 = vpop.f32.mrb[53].mxu1  ;;  %v4973_v32 = vpop.f32.mrb[54].mxu0 }
 0x16e   : > { %v5084_v63 = vadd.f32 %v5083_v14, %v5082_v18  ;;  %v5085_v35 = vpop.f32.mrb[54].mxu1  ;;  %v4974_v7 = vpop.f32.mrb[55].mxu0 }
 0x16f   : > { %v6860_v46 = vadd.f32 %v4974_v7, %v4973_v32  ;;  %v5086_v6 = vpop.f32.mrb[55].mxu1 }
 0x170   : > { %v6862_v55 = vadd.f32 %v5084_v63, %v4948_v26  ;;  %v5087_v23 = vadd.f32 %v5086_v6, %v5085_v35 }
 0x172   : > { %v6864_v10 = vadd.f32 %v5087_v23, %v4951_v1 }
 0x173   : > { %v4976_v56 = vpop.f32.mrb[56].mxu0 }
 0x174   : > { %v5088_v15 = vpop.f32.mrb[56].mxu1  ;;  %v4977_v57 = vpop.f32.mrb[57].mxu0 }
 0x175   : > { %v6866_v53 = vadd.f32 %v4977_v57, %v4976_v56  ;;  %v5089_v11 = vpop.f32.mrb[57].mxu1  ;;  %v4979_v33 = vpop.f32.mrb[58].mxu0 }
 0x176   : > { %v5090_v49 = vadd.f32 %v5089_v11, %v5088_v15  ;;  %v5091_v54 = vpop.f32.mrb[58].mxu1  ;;  %v4980_v27 = vpop.f32.mrb[59].mxu0 }
 0x177   : > { %v6868_v18 = vadd.f32 %v4980_v27, %v4979_v33  ;;  %v5092_v39 = vpop.f32.mrb[59].mxu1 }
 0x178   : > { %v6870_v14 = vadd.f32 %v5090_v49, %v4954_v25  ;;  %v5093_v26 = vadd.f32 %v5092_v39, %v5091_v54 }
 0x17a   : > { %v6872_v32 = vadd.f32 %v5093_v26, %v4957_v9 }
 0x17b   : > { %v4982_v1 = vpop.f32.mrb[60].mxu0 }
 0x17c   : > { %7250 = vst [vmem:[#allocation5_spill] sm:$0xff] %v6872_v32  ;;  %v5094_v63 = vpop.f32.mrb[60].mxu1  ;;  %v4983_v35 = vpop.f32.mrb[61].mxu0 }
 0x17d   : > { %v6874_v7 = vadd.f32 %v4983_v35, %v4982_v1  ;;  %v5095_v6 = vpop.f32.mrb[61].mxu1  ;;  %v4985_v23 = vpop.f32.mrb[62].mxu0 }
 0x17e   : > { %v5096_v56 = vadd.f32 %v5095_v6, %v5094_v63  ;;  %v5097_v57 = vpop.f32.mrb[62].mxu1  ;;  %v4986_v15 = vpop.f32.mrb[63].mxu0 }
 0x17f   : > { %v6876_v11 = vadd.f32 %v4986_v15, %v4985_v23  ;;  %v5098_v33 = vpop.f32.mrb[63].mxu1 }
 0x180   : > { %v6878_v27 = vadd.f32 %v5096_v56, %v4960_v30  ;;  %v5099_v25 = vadd.f32 %v5098_v33, %v5097_v57 }
 0x182   : > { %v6880_v49 = vadd.f32 %v5099_v25, %v4963_v19 }
 0x183   : > { %v5302_v9 = vpop.f32.mrb[64].mxu0 }
 0x184   : > { %v1316_v54 = vadd.f32 %v5302_v9, %v6725_v44  ;;  %v5100_v39 = vpop.f32.mrb[64].mxu1  ;;  %v1307_v26 = vpop.f32.mrb[65].mxu0 }
 0x185   : > { %v1308_v1 = vadd.f32 %v6713_v16, %v1307_v26  ;;  %v5101_v35 = vpop.f32.mrb[65].mxu1  ;;  %v5303_v32 = vpop.f32.mrb[66].mxu0 }
 0x186   : > { %v6885_v63 = vadd.f32 %v6789_v37, %v1316_v54  ;;  %v5102_v6 = vadd.f32 %v5101_v35, %v5100_v39  ;;  %v1319_v23 = vadd.f32 %v5303_v32, %v6730_v36  ;;  %v5103_v30 = vpop.f32.mrb[66].mxu1  ;;  %v1310_v56 = vpop.f32.mrb[67].mxu0 }
 0x187   : > { %v6889_v19 = vadd.f32 %v6772_v4, %v1308_v1  ;;  %v1311_v57 = vadd.f32 %v6715_v60, %v1310_v56  ;;  %v5104_v44 = vpop.f32.mrb[67].mxu1 }
 0x188   : > { %v6893_v15 = vadd.f32 %v5102_v6, %v6850_v22  ;;  %v6896_v16 = vadd.f32 %v6797_v50, %v1319_v23  ;;  %v5105_v33 = vadd.f32 %v5104_v44, %v5103_v30 }
 0x189   : > { %v6899_v37 = vadd.f32 %v6778_v21, %v1311_v57 }
 0x18a   : > { %v6902_v36 = vadd.f32 %v5105_v33, %v6852_v52 }
 0x18b   : > { %v5306_v32 = vpop.f32.mrb[68].mxu0 }
 0x18c   : > { %v1332_v4 = vadd.f32 %v5306_v32, %v6749_v47  ;;  %v5106_v25 = vpop.f32.mrb[68].mxu1  ;;  %v1323_v9 = vpop.f32.mrb[69].mxu0 }
 0x18d   : > { %v1324_v60 = vadd.f32 %v6737_v20, %v1323_v9  ;;  %v5107_v54 = vpop.f32.mrb[69].mxu1  ;;  %v5307_v22 = vpop.f32.mrb[70].mxu0 }
 0x18e   : > { %v6907_v39 = vadd.f32 %v6824_v45, %v1332_v4  ;;  %v5108_v50 = vadd.f32 %v5107_v54, %v5106_v25  ;;  %v1335_v26 = vadd.f32 %v5307_v22, %v6759_v5  ;;  %v5109_v21 = vpop.f32.mrb[70].mxu1  ;;  %v1326_v1 = vpop.f32.mrb[71].mxu0 }
 0x18f   : > { %v6911_v52 = vadd.f32 %v6807_v38, %v1324_v60  ;;  %v1327_v35 = vadd.f32 %v6739_v2, %v1326_v1  ;;  %v5110_v47 = vpop.f32.mrb[71].mxu1 }
 0x190   : > { %v6915_v6 = vadd.f32 %v5108_v50, %v6858_v28  ;;  %v6918_v20 = vadd.f32 %v6828_v12, %v1335_v26  ;;  %v5111_v23 = vadd.f32 %v5110_v47, %v5109_v21 }
 0x191   : > { %v6921_v45 = vadd.f32 %v6812_v43, %v1327_v35 }
 0x192   : > { %v6924_v5 = vadd.f32 %v5111_v23, %v6860_v46 }
 0x193   : > { %v5310_v30 = vpop.f32.mrb[72].mxu0 }
 0x194   : > { %v1348_v38 = vadd.f32 %v5310_v30, %v6787_v31  ;;  %v5112_v56 = vpop.f32.mrb[72].mxu1  ;;  %v1339_v57 = vpop.f32.mrb[73].mxu0 }
 0x195   : > { %v1340_v2 = vadd.f32 %v6769_v40, %v1339_v57  ;;  %v5113_v44 = vpop.f32.mrb[73].mxu1  ;;  %v5311_v28 = vpop.f32.mrb[74].mxu0 }
 0x196   : > { %v6929_v33 = vadd.f32 %v6838_v59, %v1348_v38  ;;  %v5114_v12 = vadd.f32 %v5113_v44, %v5112_v56  ;;  %v1351_v32 = vadd.f32 %v5311_v28, %v6794_v41  ;;  %v5115_v43 = vpop.f32.mrb[74].mxu1  ;;  %v1342_v4 = vpop.f32.mrb[75].mxu0 }
 0x197   : > { %v6933_v46 = vadd.f32 %v6834_v62, %v1340_v2  ;;  %v1343_v25 = vadd.f32 %v6774_v34, %v1342_v4  ;;  %v5116_v31 = vpop.f32.mrb[75].mxu1 }
 0x198   : > { %v6937_v9 = vadd.f32 %v5114_v12, %v6866_v53  ;;  %v6940_v40 = vadd.f32 %v6840_v24, %v1351_v32  ;;  %v5117_v60 = vadd.f32 %v5116_v31, %v5115_v43 }
 0x199   : > { %v5489_v59 = vadd.f32 %v6836_v42, %v1343_v25 }
 0x19a   : > { %v6944_v54 = vadd.f32 %v5117_v60, %v6868_v18 }
 0x19b   : > { %v5314_v41 = vpop.f32.mrb[76].mxu0 }
 0x19c   : > { %v1364_v22 = vadd.f32 %v5314_v41, %v6822_v58  ;;  %v5118_v62 = vpop.f32.mrb[76].mxu1  ;;  %v1355_v50 = vpop.f32.mrb[77].mxu0 }
 0x19d   : > { %v1356_v34 = vadd.f32 %v6804_v48, %v1355_v50  ;;  %v5119_v26 = vpop.f32.mrb[77].mxu1  ;;  %v5315_v21 = vpop.f32.mrb[78].mxu0 }
 0x19e   : > { %v6949_v53 = vadd.f32 %v6846_v51, %v1364_v22  ;;  %v5120_v24 = vadd.f32 %v5119_v26, %v5118_v62  ;;  %v1367_v1 = vadd.f32 %v5315_v21, %v6826_v13  ;;  %v5121_v35 = vpop.f32.mrb[78].mxu1  ;;  %v1358_v42 = vpop.f32.mrb[79].mxu0 }
 0x19f   : > { %v5497_v18 = vadd.f32 %v6842_v61, %v1356_v34  ;;  %v1359_v47 = vadd.f32 %v6809_v17, %v1358_v42  ;;  %v5122_v23 = vpop.f32.mrb[79].mxu1 }
 0x1a0   : > { %v6955_v58 = vadd.f32 %v5120_v24, %v6874_v7  ;;  %v6958_v48 = vadd.f32 %v6848_v8, %v1367_v1  ;;  %v5123_v30 = vadd.f32 %v5122_v23, %v5121_v35 }
 0x1a1   : > { %v5505_v51 = vadd.f32 %v6844_v29, %v1359_v47 }
 0x1a2   : > { %v6962_v38 = vadd.f32 %v5123_v30, %v6876_v11 }
 0x1a3   : > { %v5164_v13 = vpop.f32.mrb[80].mxu0 }
 0x1a4   : > { %v5165_v56 = vpop.f32.mrb[81].mxu0 }
 0x1a5   : > { %v5166_v57 = vadd.f32 %v5165_v56, %v5164_v13  ;;  %v5167_v2 = vpop.f32.mrb[82].mxu0 }
 0x1a6   : > { %v5168_v61 = vpop.f32.mrb[83].mxu0 }
 0x1a7   : > { %v5169_v44 = vadd.f32 %v5168_v61, %v5167_v2  ;;  %v6965_v17 = vadd.f32 %v6889_v19, %v5166_v57 }
 0x1a9   : > { %v6968_v7 = vadd.f32 %v6899_v37, %v5169_v44 }
 0x1ab   : > { %v5170_v8 = vpop.f32.mrb[84].mxu0 }
 0x1ac   : > { %v5171_v28 = vpop.f32.mrb[85].mxu0 }
 0x1ad   : > { %v5172_v12 = vadd.f32 %v5171_v28, %v5170_v8  ;;  %v5173_v32 = vpop.f32.mrb[86].mxu0 }
 0x1ae   : > { %v5174_v29 = vpop.f32.mrb[87].mxu0 }
 0x1af   : > { %v5175_v43 = vadd.f32 %v5174_v29, %v5173_v32  ;;  %v5446_v11 = vadd.f32 %v6885_v63, %v5172_v12 }
 0x1b1   : > { %v5454_v4 = vadd.f32 %v6896_v16, %v5175_v43 }
 0x1b3   : > { %v5176_v25 = vpop.f32.mrb[88].mxu0 }
 0x1b4   : > { %v5177_v31 = vpop.f32.mrb[89].mxu0 }
 0x1b5   : > { %v5178_v60 = vadd.f32 %v5177_v31, %v5176_v25  ;;  %v5179_v41 = vpop.f32.mrb[90].mxu0 }
 0x1b6   : > { %v5180_v22 = vpop.f32.mrb[91].mxu0 }
 0x1b7   : > { %v5181_v19 = vadd.f32 %v5180_v22, %v5179_v41  ;;  %v6973_v62 = vadd.f32 %v6911_v52, %v5178_v60 }
 0x1b9   : > { %v6976_v37 = vadd.f32 %v6921_v45, %v5181_v19 }
 0x1bb   : > { %v5182_v50 = vpop.f32.mrb[92].mxu0 }
 0x1bc   : > { %v5183_v34 = vpop.f32.mrb[93].mxu0 }
 0x1bd   : > { %v5184_v26 = vadd.f32 %v5183_v34, %v5182_v50  ;;  %v5185_v21 = vpop.f32.mrb[94].mxu0 }
 0x1be   : > { %v5186_v24 = vpop.f32.mrb[95].mxu0 }
 0x1bf   : > { %v5187_v63 = vadd.f32 %v5186_v24, %v5185_v21  ;;  %v5462_v16 = vadd.f32 %v6907_v39, %v5184_v26 }
 0x1c1   : > { %v6980_v1 = vadd.f32 %v6918_v20, %v5187_v63 }
 0x1c3   : > { %v5188_v35 = vpop.f32.mrb[96].mxu0 }
 0x1c4   : > { %v5189_v42 = vpop.f32.mrb[97].mxu0 }
 0x1c5   : > { %v5190_v47 = vadd.f32 %v5189_v42, %v5188_v35  ;;  %v5191_v23 = vpop.f32.mrb[98].mxu0 }
 0x1c6   : > { %v5192_v52 = vpop.f32.mrb[99].mxu0 }
 0x1c7   : > { %v5193_v30 = vadd.f32 %v5192_v52, %v5191_v23  ;;  %v6983_v45 = vadd.f32 %v6933_v46, %v5190_v47 }
 0x1c9   : > { %v6985_v13 = vadd.f32 %v5489_v59, %v5193_v30 }
 0x1cb   : > { %v5194_v56 = vpop.f32.mrb[100].mxu0 }
 0x1cc   : > { %v5195_v57 = vpop.f32.mrb[101].mxu0 }
 0x1cd   : > { %v5196_v2 = vadd.f32 %v5195_v57, %v5194_v56  ;;  %v5197_v61 = vpop.f32.mrb[102].mxu0 }
 0x1ce   : > { %v5198_v44 = vpop.f32.mrb[103].mxu0 }
 0x1cf   : > { %v5199_v39 = vadd.f32 %v5198_v44, %v5197_v61  ;;  %v6988_v20 = vadd.f32 %v6929_v33, %v5196_v2 }
 0x1d1   : > { %v6991_v8 = vadd.f32 %v6940_v40, %v5199_v39 }
 0x1d3   : > { %v5200_v28 = vpop.f32.mrb[104].mxu0 }
 0x1d4   : > { %v5201_v12 = vpop.f32.mrb[105].mxu0 }
 0x1d5   : > { %v5202_v32 = vadd.f32 %v5201_v12, %v5200_v28  ;;  %v5203_v29 = vpop.f32.mrb[106].mxu0 }
 0x1d6   : > { %v5204_v46 = vpop.f32.mrb[107].mxu0 }
 0x1d7   : > { %v5205_v43 = vadd.f32 %v5204_v46, %v5203_v29  ;;  %v6993_v59 = vadd.f32 %v5497_v18, %v5202_v32 }
 0x1d9   : > { %v6995_v25 = vadd.f32 %v5505_v51, %v5205_v43 }
 0x1db   : > { %v5206_v31 = vpop.f32.mrb[108].mxu0 }
 0x1dc   : > { %v5207_v60 = vpop.f32.mrb[109].mxu0 }
 0x1dd   : > { %v5208_v41 = vadd.f32 %v5207_v60, %v5206_v31  ;;  %v5209_v22 = vpop.f32.mrb[110].mxu0 }
 0x1de   : > { %v5210_v19 = vpop.f32.mrb[111].mxu0 }
 0x1df   : > { %v5211_v33 = vadd.f32 %v5210_v19, %v5209_v22  ;;  %v6998_v50 = vadd.f32 %v6949_v53, %v5208_v41 }
 0x1e1   : > { %v7001_v40 = vadd.f32 %v6958_v48, %v5211_v33 }
 0x1e3   : > { %v5212_v34 = vpop.f32.mrb[112].mxu0 }
 0x1e4   : > { %v5398_v26 = vpop.f32.mrb[80].mxu1  ;;  %v5213_v21 = vpop.f32.mrb[113].mxu0 }
 0x1e5   : > { %v7003_v18 = vadd.f32 %v5446_v11, %v5398_v26  ;;  %v5214_v51 = vadd.f32 %v5213_v21, %v5212_v34  ;;  %v3843_v24 = vpop.f32.mrb[81].mxu1  ;;  %v5215_v63 = vpop.f32.mrb[114].mxu0 }
 0x1e6   : > { %v7006_v35 = vadd.f32 %v6965_v17, %v3843_v24  ;;  %v5399_v42 = vpop.f32.mrb[82].mxu1  ;;  %v5216_v47 = vpop.f32.mrb[115].mxu0 }
 0x1e7   : > { %v7008_v23 = vadd.f32 %v5454_v4, %v5399_v42  ;;  %v5217_v53 = vadd.f32 %v5216_v47, %v5215_v63  ;;  %v3846_v52 = vpop.f32.mrb[83].mxu1  ;;  %v7011_v48 = vadd.f32 %v6854_v3, %v5214_v51 }
 0x1e8   : > { %v7021_v17 = vadd.f32 %v6968_v7, %v3846_v52 }
 0x1e9   : > { %v4774_v11 = vpack.c.bf16 %v7008_v23, %v7003_v18  ;;  %v7026_v4 = vadd.f32 %v6856_v0, %v5217_v53 }
 0x1ea   : > { %v4769_v3 = vpack.c.bf16 %v7021_v17, %v7006_v35  ;;  %v4226_v30 = vadd.f32 %v7021_v17, %v7006_v35 }
 0x1eb   : > { %4861 = vst [vmem:[%s7018_s17 + $0x8] sm:$0xff] %v4774_v11   ;;  %v5218_v56 = vpop.f32.mrb[116].mxu0 }
 0x1ec   : > { %4770 = vst [vmem:[%s7018_s17] sm:$0xff] %v4769_v3   ;;  %v4227_v57 = vadd.f32 %v7003_v18, %v4226_v30  ;;  %v5402_v2 = vpop.f32.mrb[84].mxu1  ;;  %v5219_v7 = vpop.f32.mrb[117].mxu0 }
 0x1ed   : > { %v7035_v61 = vadd.f32 %v5462_v16, %v5402_v2  ;;  %v5220_v44 = vadd.f32 %v5219_v7, %v5218_v56  ;;  %v3859_v39 = vpop.f32.mrb[85].mxu1  ;;  %v5221_v0 = vpop.f32.mrb[118].mxu0  ;;  %v7251_v56 = vld [vmem:[#allocation5_spill] sm:$0xff] }
 0x1ee   : > { %v7038_v28 = vadd.f32 %v6973_v62, %v3859_v39  ;;  %v4228_v12 = vadd.f32 %v7008_v23, %v4227_v57  ;;  %v5403_v32 = vpop.f32.mrb[86].mxu1  ;;  %v5222_v29 = vpop.f32.mrb[119].mxu0 }
 0x1ef   : > { %v7042_v46 = vadd.f32 %v6980_v1, %v5403_v32  ;;  %v5223_v43 = vadd.f32 %v5222_v29, %v5221_v0  ;;  %v3862_v31 = vpop.f32.mrb[87].mxu1  ;;  %v5509_v16 = vadd.f32 %v6862_v55, %v5220_v44 }
 0x1f0   : > { %v4229_v60 = vadd.f32 %v7038_v28, %v4228_v12  ;;  %v7047_v41 = vadd.f32 %v6976_v37, %v3862_v31 }
 0x1f1   : > { %v4784_v62 = vpack.c.bf16 %v7042_v46, %v7035_v61  ;;  %v7052_v22 = vadd.f32 %v6864_v10, %v5223_v43 }
 0x1f2   : > { %v4779_v19 = vpack.c.bf16 %v7047_v41, %v7038_v28  ;;  %v4230_v1 = vadd.f32 %v7047_v41, %v4229_v60 }
 0x1f3   : > { %4863 = vst [vmem:[%s7018_s17 + $0x18] sm:$0xff] %v4784_v62   ;;  %v5224_v33 = vpop.f32.mrb[120].mxu0 }
 0x1f4   : > { %4862 = vst [vmem:[%s7018_s17 + $0x10] sm:$0xff] %v4779_v19   ;;  %v4231_v55 = vadd.f32 %v7035_v61, %v4230_v1  ;;  %v5406_v34 = vpop.f32.mrb[88].mxu1  ;;  %v5225_v26 = vpop.f32.mrb[121].mxu0 }
 0x1f5   : > { %v7061_v37 = vadd.f32 %v6988_v20, %v5406_v34  ;;  %v5226_v21 = vadd.f32 %v5225_v26, %v5224_v33  ;;  %v3875_v51 = vpop.f32.mrb[89].mxu1  ;;  %v5227_v10 = vpop.f32.mrb[122].mxu0 }
 0x1f6   : > { %v7064_v24 = vadd.f32 %v6983_v45, %v3875_v51  ;;  %v4232_v63 = vadd.f32 %v7042_v46, %v4231_v55  ;;  %v5407_v42 = vpop.f32.mrb[90].mxu1  ;;  %v5228_v47 = vpop.f32.mrb[123].mxu0 }
 0x1f7   : > { %v7068_v53 = vadd.f32 %v6991_v8, %v5407_v42  ;;  %v5229_v52 = vadd.f32 %v5228_v47, %v5227_v10  ;;  %v3878_v11 = vpop.f32.mrb[91].mxu1  ;;  %v7071_v20 = vadd.f32 %v6870_v14, %v5226_v21 }
 0x1f8   : > { %v4233_v3 = vadd.f32 %v7064_v24, %v4232_v63  ;;  %v7075_v30 = vadd.f32 %v6985_v13, %v3878_v11 }
 0x1f9   : > { %v4794_v45 = vpack.c.bf16 %v7068_v53, %v7061_v37  ;;  %v7080_v57 = vadd.f32 %v7251_v56, %v5229_v52 }
 0x1fa   : > { %v4789_v8 = vpack.c.bf16 %v7075_v30, %v7064_v24  ;;  %v4234_v2 = vadd.f32 %v7075_v30, %v4233_v3 }
 0x1fb   : > { %4865 = vst [vmem:[%s7018_s17 + $0x28] sm:$0xff] %v4794_v45   ;;  %v5230_v7 = vpop.f32.mrb[124].mxu0 }
 0x1fc   : > { %4864 = vst [vmem:[%s7018_s17 + $0x20] sm:$0xff] %v4789_v8   ;;  %v4235_v14 = vadd.f32 %v7061_v37, %v4234_v2  ;;  %v5410_v44 = vpop.f32.mrb[92].mxu1  ;;  %v5231_v39 = vpop.f32.mrb[125].mxu0 }
 0x1fd   : > { %v7089_v13 = vadd.f32 %v6998_v50, %v5410_v44  ;;  %v5232_v0 = vadd.f32 %v5231_v39, %v5230_v7  ;;  %v3891_v12 = vpop.f32.mrb[93].mxu1  ;;  %v5233_v32 = vpop.f32.mrb[126].mxu0 }
 0x1fe   : > { %v7092_v29 = vadd.f32 %v6993_v59, %v3891_v12  ;;  %v4236_v43 = vadd.f32 %v7068_v53, %v4235_v14  ;;  %v5411_v31 = vpop.f32.mrb[94].mxu1  ;;  %v5234_v60 = vpop.f32.mrb[127].mxu0 }
 0x1ff   : > { %v7096_v62 = vadd.f32 %v7001_v40, %v5411_v31  ;;  %v5235_v19 = vadd.f32 %v5234_v60, %v5233_v32  ;;  %v3894_v1 = vpop.f32.mrb[95].mxu1  ;;  %v5521_v50 = vadd.f32 %v6878_v27, %v5232_v0 }
 0x200   : > { %v4237_v33 = vadd.f32 %v7092_v29, %v4236_v43  ;;  %v7101_v55 = vadd.f32 %v6995_v25, %v3894_v1 }
 0x201   : > { %v4804_v59 = vpack.c.bf16 %v7096_v62, %v7089_v13  ;;  %v5527_v34 = vadd.f32 %v6880_v49, %v5235_v19 }
 0x202   : > { %v4799_v26 = vpack.c.bf16 %v7101_v55, %v7092_v29  ;;  %v4238_v40 = vadd.f32 %v7101_v55, %v4237_v33 }
 0x203   : > { %4867 = vst [vmem:[%s7018_s17 + $0x38] sm:$0xff] %v4804_v59   ;;  %v5236_v21 = vpop.f32.mrb[128].mxu0 }
 0x204   : > { %4866 = vst [vmem:[%s7018_s17 + $0x30] sm:$0xff] %v4799_v26   ;;  %v4239_v27 = vadd.f32 %v7089_v13, %v4238_v40  ;;  %v5414_v51 = vpop.f32.mrb[0].mxu1  ;;  %v5237_v10 = vpop.f32.mrb[129].mxu0 }
 0x205   : > { %v7112_v63 = vadd.f32 %v5509_v16, %v5414_v51  ;;  %v5238_v25 = vadd.f32 %v5237_v10, %v5236_v21  ;;  %v3907_v42 = vpop.f32.mrb[1].mxu1  ;;  %v5239_v47 = vpop.f32.mrb[130].mxu0 }
 0x206   : > { %v7115_v49 = vadd.f32 %v7011_v48, %v3907_v42  ;;  %v4240_v52 = vadd.f32 %v7096_v62, %v4239_v27  ;;  %v5415_v11 = vpop.f32.mrb[2].mxu1  ;;  %v5240_v3 = vpop.f32.mrb[131].mxu0 }
 0x207   : > { %v7119_v45 = vadd.f32 %v7052_v22, %v5415_v11  ;;  %v5241_v56 = vadd.f32 %v5240_v3, %v5239_v47  ;;  %v3910_v8 = vpop.f32.mrb[3].mxu1  ;;  %v5536_v16 = vadd.f32 %v6893_v15, %v5238_v25 }
 0x208   : > { %v4241_v2 = vadd.f32 %v7115_v49, %v4240_v52  ;;  %v7124_v7 = vadd.f32 %v7026_v4, %v3910_v8 }
 0x209   : > { %v4814_v48 = vpack.c.bf16 %v7119_v45, %v7112_v63  ;;  %v5542_v14 = vadd.f32 %v6902_v36, %v5241_v56 }
 0x20a   : > { %v4809_v44 = vpack.c.bf16 %v7124_v7, %v7115_v49  ;;  %v4242_v22 = vadd.f32 %v7124_v7, %v4241_v2 }
 0x20b   : > { %4869 = vst [vmem:[%s7018_s17 + $0x48] sm:$0xff] %v4814_v48   ;;  %v5242_v39 = vpop.f32.mrb[132].mxu0 }
 0x20c   : > { %4868 = vst [vmem:[%s7018_s17 + $0x40] sm:$0xff] %v4809_v44   ;;  %v4243_v15 = vadd.f32 %v7112_v63, %v4242_v22  ;;  %v5418_v0 = vpop.f32.mrb[4].mxu1  ;;  %v5243_v12 = vpop.f32.mrb[133].mxu0 }
 0x20d   : > { %v7135_v32 = vadd.f32 %v5521_v50, %v5418_v0  ;;  %v5244_v4 = vadd.f32 %v5243_v12, %v5242_v39  ;;  %v3923_v43 = vpop.f32.mrb[5].mxu1  ;;  %v5245_v31 = vpop.f32.mrb[134].mxu0 }
 0x20e   : > { %v7138_v36 = vadd.f32 %v7071_v20, %v3923_v43  ;;  %v4244_v60 = vadd.f32 %v7119_v45, %v4243_v15  ;;  %v5419_v19 = vpop.f32.mrb[6].mxu1  ;;  %v5246_v1 = vpop.f32.mrb[135].mxu0 }
 0x20f   : > { %v7141_v33 = vadd.f32 %v5527_v34, %v5419_v19  ;;  %v5247_v59 = vadd.f32 %v5246_v1, %v5245_v31  ;;  %v3926_v26 = vpop.f32.mrb[7].mxu1  ;;  %v5533_v40 = vadd.f32 %v6915_v6, %v5244_v4 }
 0x210   : > { %v4245_v50 = vadd.f32 %v7138_v36, %v4244_v60  ;;  %v7146_v21 = vadd.f32 %v7080_v57, %v3926_v26 }
 0x211   : > { %v4824_v20 = vpack.c.bf16 %v7141_v33, %v7135_v32  ;;  %v5539_v27 = vadd.f32 %v6924_v5, %v5247_v59 }
 0x212   : > { %v4819_v51 = vpack.c.bf16 %v7146_v21, %v7138_v36  ;;  %v4246_v34 = vadd.f32 %v7146_v21, %v4245_v50 }
 0x213   : > { %4871 = vst [vmem:[%s7018_s17 + $0x58] sm:$0xff] %v4824_v20   ;;  %v5248_v10 = vpop.f32.mrb[136].mxu0 }
 0x214   : > { %4870 = vst [vmem:[%s7018_s17 + $0x50] sm:$0xff] %v4819_v51   ;;  %v4247_v6 = vadd.f32 %v7135_v32, %v4246_v34  ;;  %v5422_v25 = vpop.f32.mrb[8].mxu1  ;;  %v5249_v42 = vpop.f32.mrb[137].mxu0 }
 0x215   : > { %v7157_v47 = vadd.f32 %v5533_v40, %v5422_v25  ;;  %v5250_v57 = vadd.f32 %v5249_v42, %v5248_v10  ;;  %v3939_v52 = vpop.f32.mrb[9].mxu1  ;;  %v5251_v11 = vpop.f32.mrb[138].mxu0 }
 0x216   : > { %v7159_v3 = vadd.f32 %v5536_v16, %v3939_v52  ;;  %v4248_v5 = vadd.f32 %v7141_v33, %v4247_v6  ;;  %v5423_v56 = vpop.f32.mrb[10].mxu1  ;;  %v5252_v8 = vpop.f32.mrb[139].mxu0 }
 0x217   : > { %v7162_v2 = vadd.f32 %v5539_v27, %v5423_v56  ;;  %v5253_v48 = vadd.f32 %v5252_v8, %v5251_v11  ;;  %v3942_v44 = vpop.f32.mrb[11].mxu1  ;;  %v5548_v22 = vadd.f32 %v6937_v9, %v5250_v57 }
 0x218   : > { %v4249_v39 = vadd.f32 %v7159_v3, %v4248_v5  ;;  %v5543_v15 = vadd.f32 %v5542_v14, %v3942_v44 }
 0x219   : > { %v4834_v0 = vpack.c.bf16 %v7162_v2, %v7157_v47  ;;  %v5554_v16 = vadd.f32 %v6944_v54, %v5253_v48 }
 0x21a   : > { %v4829_v12 = vpack.c.bf16 %v5543_v15, %v7159_v3  ;;  %v4250_v4 = vadd.f32 %v5543_v15, %v4249_v39 }
 0x21b   : > { %4873 = vst [vmem:[%s7018_s17 + $0x68] sm:$0xff] %v4834_v0   ;;  %v5254_v43 = vpop.f32.mrb[140].mxu0 }
 0x21c   : > { %4872 = vst [vmem:[%s7018_s17 + $0x60] sm:$0xff] %v4829_v12   ;;  %v4251_v31 = vadd.f32 %v7157_v47, %v4250_v4  ;;  %v5426_v60 = vpop.f32.mrb[12].mxu1  ;;  %v5255_v19 = vpop.f32.mrb[141].mxu0 }
 0x21d   : > { %v5256_v1 = vadd.f32 %v5255_v19, %v5254_v43  ;;  %v3955_v9 = vpop.f32.mrb[13].mxu1  ;;  %v5257_v59 = vpop.f32.mrb[142].mxu0 }
 0x21e   : > { %v5549_v14 = vadd.f32 %v5548_v22, %v3955_v9  ;;  %v4252_v26 = vadd.f32 %v7162_v2, %v4251_v31  ;;  %v5427_v40 = vpop.f32.mrb[14].mxu1  ;;  %v5258_v54 = vpop.f32.mrb[143].mxu0 }
 0x21f   : > { %v5545_v50 = vadd.f32 %v6955_v58, %v5256_v1  ;;  %v5259_v20 = vadd.f32 %v5258_v54, %v5257_v59  ;;  %v3958_v27 = vpop.f32.mrb[15].mxu1 }
 0x220   : > { %v4253_v51 = vadd.f32 %v5549_v14, %v4252_v26  ;;  %v5555_v34 = vadd.f32 %v5554_v16, %v3958_v27 }
 0x221   : > { %v5546_v10 = vadd.f32 %v5545_v50, %v5426_v60  ;;  %v5551_v6 = vadd.f32 %v6962_v38, %v5259_v20 }
 0x222   : > { %v4839_v25 = vpack.c.bf16 %v5555_v34, %v5549_v14  ;;  %v4254_v42 = vadd.f32 %v5555_v34, %v4253_v51 }
 0x223   : > { %v5552_v57 = vadd.f32 %v5551_v6, %v5427_v40 }
 0x224   : > { %4874 = vst [vmem:[%s7018_s17 + $0x70] sm:$0xff] %v4839_v25   ;;  %v4255_v52 = vadd.f32 %v5546_v10, %v4254_v42 }
 0x225   : > { %v4844_v11 = vpack.c.bf16 %v5552_v57, %v5546_v10 }
 0x226   : > { %v4256_v5 = vadd.f32 %v5552_v57, %v4255_v52 }
 0x227   : > { %4875 = vst [vmem:[%s7018_s17 + $0x78] sm:$0xff] %v4844_v11  }
 0x228   : > { %v4257_v56 = vrot.slane %v4256_v5, 4 }
 0x22a   : > { %v4258_v8 = vadd.f32 %v4257_v56, %v4256_v5 }
 0x22c   : > { %v4259_v48 = vrot.slane %v4258_v8, 2 }
 0x22e   : > { %v4260_v58 = vadd.f32 %v4259_v48, %v4258_v8 }
 0x230   : > { %v4261_v44 = vrot.slane %v4260_v58, 1 }
 0x232   : > { %v4262_v38 = vadd.f32 %v4261_v44, %v4260_v58 }
 0x234   : > { %v4264_v22 = vmul.f32 0.00390625, %v4262_v38  ;;  %4297 = vst [vmem:[%s7182_s22] sm:$0x1] %v4262_v38 }
 0x236   : > { %v4273_v39 = vsub.f32 %v7064_v24, %v4264_v22  ;;  %v4274_v0 = vsub.f32 %v7075_v30, %v4264_v22  ;;  %v4275_v16 = vsub.f32 %v7061_v37, %v4264_v22  ;;  %v4276_v12 = vsub.f32 %v7068_v53, %v4264_v22 }
 0x237   : > { %v4277_v4 = vsub.f32 %v7092_v29, %v4264_v22  ;;  %v4278_v43 = vsub.f32 %v7101_v55, %v4264_v22  ;;  %v4279_v31 = vsub.f32 %v7089_v13, %v4264_v22  ;;  %v4280_v60 = vsub.f32 %v7096_v62, %v4264_v22 }
 0x238   : > { %v4281_v19 = vsub.f32 %v7115_v49, %v4264_v22  ;;  %v4282_v1 = vsub.f32 %v7124_v7, %v4264_v22  ;;  %v4283_v24 = vsub.f32 %v7112_v63, %v4264_v22  ;;  %v4284_v30 = vsub.f32 %v7119_v45, %v4264_v22 }
 0x239   : > { %v4285_v37 = vsub.f32 %v7138_v36, %v4264_v22  ;;  %v4286_v53 = vsub.f32 %v7146_v21, %v4264_v22  ;;  %v4287_v29 = vsub.f32 %v7135_v32, %v4264_v22  ;;  %v4288_v55 = vsub.f32 %v7141_v33, %v4264_v22 }
 0x23a   : > { %v4289_v13 = vsub.f32 %v7159_v3, %v4264_v22  ;;  %v7202_v9 = vsub.f32 %v5543_v15, %v4264_v22  ;;  %v7205_v62 = vsub.f32 %v7157_v47, %v4264_v22  ;;  %v7208_v49 = vsub.f32 %v7162_v2, %v4264_v22 }
 0x23b   : > { %v7210_v63 = vsub.f32 %v5549_v14, %v4264_v22  ;;  %v7212_v45 = vsub.f32 %v5555_v34, %v4264_v22  ;;  %v7214_v7 = vsub.f32 %v5546_v10, %v4264_v22  ;;  %v7216_v36 = vsub.f32 %v5552_v57, %v4264_v22 }
 0x23c   : > { %v4265_v32 = vsub.f32 %v7006_v35, %v4264_v22  ;;  %v4266_v33 = vsub.f32 %v7021_v17, %v4264_v22  ;;  %v4267_v21 = vsub.f32 %v7003_v18, %v4264_v22  ;;  %v4268_v15 = vsub.f32 %v7008_v23, %v4264_v22 }
 0x23d   : > { %v4269_v2 = vsub.f32 %v7038_v28, %v4264_v22  ;;  %v4270_v26 = vsub.f32 %v7047_v41, %v4264_v22  ;;  %v4271_v50 = vsub.f32 %v7035_v61, %v4264_v22  ;;  %v4272_v17 = vsub.f32 %v7042_v46, %v4264_v22 }
 0x23e   : > { %v4298_v3 = vmul.f32 %v4265_v32, %v4265_v32  ;;  %v4299_v47 = vmul.f32 %v4266_v33, %v4266_v33  ;;  %v4300_v59 = vmul.f32 %v4267_v21, %v4267_v21  ;;  %v4301_v40 = vmul.f32 %v4268_v15, %v4268_v15 }
 0x23f   : > { %v4302_v20 = vmul.f32 %v4269_v2, %v4269_v2  ;;  %v4303_v27 = vmul.f32 %v4270_v26, %v4270_v26  ;;  %v4304_v51 = vmul.f32 %v4271_v50, %v4271_v50  ;;  %v4305_v10 = vmul.f32 %v4272_v17, %v4272_v17 }
 0x240   : > { %v4330_v14 = vadd.f32 %v4299_v47, %v4298_v3  ;;  %v4306_v6 = vmul.f32 %v4273_v39, %v4273_v39  ;;  %v4307_v25 = vmul.f32 %v4274_v0, %v4274_v0  ;;  %v4308_v57 = vmul.f32 %v4275_v16, %v4275_v16 }
 0x241   : > { %v4309_v52 = vmul.f32 %v4276_v12, %v4276_v12  ;;  %v4310_v5 = vmul.f32 %v4277_v4, %v4277_v4  ;;  %v4311_v56 = vmul.f32 %v4278_v43, %v4278_v43  ;;  %v4312_v48 = vmul.f32 %v4279_v31, %v4279_v31 }
 0x242   : > { %v4331_v54 = vadd.f32 %v4330_v14, %v4300_v59  ;;  %v4313_v58 = vmul.f32 %v4280_v60, %v4280_v60  ;;  %v4314_v38 = vmul.f32 %v4281_v19, %v4281_v19  ;;  %v4315_v32 = vmul.f32 %v4282_v1, %v4282_v1 }
 0x243   : > { %v4316_v39 = vmul.f32 %v4283_v24, %v4283_v24  ;;  %v4317_v0 = vmul.f32 %v4284_v30, %v4284_v30  ;;  %v4318_v16 = vmul.f32 %v4285_v37, %v4285_v37  ;;  %v4319_v12 = vmul.f32 %v4286_v53, %v4286_v53 }
 0x244   : > { %v4332_v35 = vadd.f32 %v4331_v54, %v4301_v40  ;;  %v4320_v4 = vmul.f32 %v4287_v29, %v4287_v29  ;;  %v4321_v43 = vmul.f32 %v4288_v55, %v4288_v55  ;;  %v4322_v31 = vmul.f32 %v4289_v13, %v4289_v13 }
 0x245   : > { %v4323_v60 = vmul.f32 %v7202_v9, %v7202_v9  ;;  %v4324_v1 = vmul.f32 %v7205_v62, %v7205_v62  ;;  %v4325_v30 = vmul.f32 %v7208_v49, %v7208_v49  ;;  %v4326_v53 = vmul.f32 %v7210_v63, %v7210_v63 }
 0x246   : > { %v4333_v18 = vadd.f32 %v4332_v35, %v4302_v20  ;;  %v4327_v55 = vmul.f32 %v7212_v45, %v7212_v45  ;;  %v4328_v9 = vmul.f32 %v7214_v7, %v7214_v7  ;;  %v4329_v62 = vmul.f32 %v7216_v36, %v7216_v36 }
 0x248   : > { %v4334_v34 = vadd.f32 %v4333_v18, %v4303_v27 }
 0x24a   : > { %v4335_v23 = vadd.f32 %v4334_v34, %v4304_v51 }
 0x24c   : > { %v4336_v28 = vadd.f32 %v4335_v23, %v4305_v10 }
 0x24e   : > { %v4337_v42 = vadd.f32 %v4336_v28, %v4306_v6 }
 0x250   : > { %v4338_v41 = vadd.f32 %v4337_v42, %v4307_v25 }
 0x252   : > { %v4339_v11 = vadd.f32 %v4338_v41, %v4308_v57 }
 0x254   : > { %v4340_v61 = vadd.f32 %v4339_v11, %v4309_v52 }
 0x256   : > { %v4341_v8 = vadd.f32 %v4340_v61, %v4310_v5 }
 0x258   : > { %v4342_v46 = vadd.f32 %v4341_v8, %v4311_v56 }
 0x25a   : > { %v4343_v44 = vadd.f32 %v4342_v46, %v4312_v48 }
 0x25c   : > { %v4344_v22 = vadd.f32 %v4343_v44, %v4313_v58 }
 0x25e   : > { %v4345_v33 = vadd.f32 %v4344_v22, %v4314_v38 }
 0x260   : > { %v4346_v21 = vadd.f32 %v4345_v33, %v4315_v32 }
 0x262   : > { %v4347_v3 = vadd.f32 %v4346_v21, %v4316_v39 }
 0x264   : > { %v4348_v47 = vadd.f32 %v4347_v3, %v4317_v0 }
 0x266   : > { %v4349_v15 = vadd.f32 %v4348_v47, %v4318_v16 }
 0x268   : > { %v4350_v2 = vadd.f32 %v4349_v15, %v4319_v12 }
 0x26a   : > { %v4351_v59 = vadd.f32 %v4350_v2, %v4320_v4 }
 0x26c   : > { %v4352_v14 = vadd.f32 %v4351_v59, %v4321_v43 }
 0x26e   : > { %v4353_v19 = vadd.f32 %v4352_v14, %v4322_v31 }
 0x270   : > { %v4354_v24 = vadd.f32 %v4353_v19, %v4323_v60 }
 0x272   : > { %v4355_v37 = vadd.f32 %v4354_v24, %v4324_v1 }
 0x274   : > { %v4356_v29 = vadd.f32 %v4355_v37, %v4325_v30 }
 0x276   : > { %v4357_v13 = vadd.f32 %v4356_v29, %v4326_v53 }
 0x278   : > { %v4358_v26 = vadd.f32 %v4357_v13, %v4327_v55 }
 0x27a   : > { %v4359_v40 = vadd.f32 %v4358_v26, %v4328_v9 }
 0x27c   : > { %v4360_v54 = vadd.f32 %v4359_v40, %v4329_v62 }
 0x27e   : > { %v4361_v49 = vrot.slane %v4360_v54, 4 }
 0x280   : > { %v4362_v50 = vadd.f32 %v4361_v49, %v4360_v54 }
 0x282   : > { %v4363_v20 = vrot.slane %v4362_v50, 2 }
 0x284   : > { %v4364_v35 = vadd.f32 %v4363_v20, %v4362_v50 }
 0x286   : > { %v4365_v17 = vrot.slane %v4364_v35, 1 }
 0x288   : > { %v4366_v63 = vadd.f32 %v4365_v17, %v4364_v35 }
 0x28a   : > { %4367 = vst [vmem:[%s7182_s22 + $0x1] sm:$0x1] %v4366_v63 }
 0x28b PF: > { %s16_s18 = sadd.s32 1, %s5693_s18  }
 0x28c   : > { %p13_p4 = scmp.ge.s32.totalorder %s16_s18, 4  }
 0x28e   :  { %15 = sbr.rel (!%p13_p4) target bundleno = 1 (0x1), region = 83 }

</bundles_post_ra>
